<compile_context>
chip_gen: v7x
topology: tpu7x:2x2x1
jax: 0.10.0
libtpu: 0.0.40
codegen_flags: <defaults>
</compile_context>

<pallas_src>
import functools

import jax
import jax.numpy as jnp
import numpy as np
from jax import lax
from jax.experimental import pallas as pl
from jax.experimental.pallas import tpu as pltpu


def _silu(y):
    return y * (1.0 / (1.0 + jnp.exp(-y)))


# ---------------------------------------------------------------------------
# In-kernel building blocks (operate on VMEM-resident values / scratch refs)
# ---------------------------------------------------------------------------
def _pad_hw(a, pad_ref):
    """Zero-pad (H, W, C) by 1 on each spatial side via a VMEM scratch ref."""
    H, W, _ = a.shape
    pad_ref[...] = jnp.zeros(pad_ref.shape, pad_ref.dtype)
    pad_ref[1:H + 1, 1:W + 1, :] = a
    return pad_ref[...]


def _conv3x3_im2col(xp, w_ref, b_ref, *, act, H, W):
    """3x3 conv (stride 1, pad 1) as ONE im2col MXU matmul.

    xp:    (H+2, W+2, C) f32 padded activation (VMEM value)
    w_ref: (9*C, Cout) bf16 (BN scale folded in)   b_ref: (1, Cout) f32 bias
    """
    C = xp.shape[-1]
    cols = [xp[t // 3:t // 3 + H, t % 3:t % 3 + W, :]
            .reshape(H * W, C).astype(jnp.bfloat16) for t in range(9)]
    patches = jnp.concatenate(cols, axis=-1)                      # (H*W, 9C) bf16
    y = jnp.dot(patches, w_ref[...], preferred_element_type=jnp.float32)
    y = y + b_ref[0]
    return _silu(y) if act else y


def _dw3x3(xp, w_ref, b_ref, *, act, H, W):
    """Depthwise 3x3 conv via 9 shifted f32 VPU multiply-accumulates."""
    C = xp.shape[-1]
    acc = jnp.zeros((H, W, C), jnp.float32)
    for t in range(9):
        acc = acc + xp[t // 3:t // 3 + H, t % 3:t % 3 + W, :] * w_ref[t]
    y = acc + b_ref[0]
    return _silu(y) if act else y


def _pointwise(a2d, w_ref, b_ref, *, act):
    """1x1 conv = (H*W, Cin) @ (Cin, Cout) on the MXU, f32 accumulate."""
    y = jnp.dot(a2d.astype(jnp.bfloat16), w_ref[...],
                preferred_element_type=jnp.float32)
    y = y + b_ref[0]
    return _silu(y) if act else y


# ---------------------------------------------------------------------------
# Fused per-level Detect head kernel
# ---------------------------------------------------------------------------
def _detect_level_kernel(
        x_ref,
        w0_ref, b0_ref,
        w1_ref, b1_ref,
        w2_ref, b2_ref,
        dw0_ref, db0_ref,
        pw0_ref, pb0_ref,
        dw1_ref, db1_ref,
        pw1_ref, pb1_ref,
        w3_ref, b3_ref,
        o_ref,
        xpad_ref, apad_ref, bpad_ref,
        *, H, W):
    cin = x_ref.shape[-1]
    c2 = w0_ref.shape[-1]
    c3 = pw0_ref.shape[-1]

    x = x_ref[0].astype(jnp.float32)            # (H, W, Cin)
    xp = _pad_hw(x, xpad_ref)                   # padded once, shared by both branches

    # ---- cv2 branch: Conv3x3 -> Conv3x3 -> Conv1x1(+bias) ----
    a = _conv3x3_im2col(xp, w0_ref, b0_ref, act=True, H=H, W=W)
    ap = _pad_hw(a.reshape(H, W, c2), apad_ref)
    a = _conv3x3_im2col(ap, w1_ref, b1_ref, act=True, H=H, W=W)
    a = _pointwise(a, w2_ref, b2_ref, act=False)                  # (H*W, 4*reg_max)

    # ---- cv3 branch: DW3x3 -> 1x1 -> DW3x3 -> 1x1 -> 1x1(+bias) ----
    b = _dw3x3(xp, dw0_ref, db0_ref, act=True, H=H, W=W)
    b = _pointwise(b.reshape(H * W, cin), pw0_ref, pb0_ref, act=True)
    bp = _pad_hw(b.reshape(H, W, c3), bpad_ref)
    b = _dw3x3(bp, dw1_ref, db1_ref, act=True, H=H, W=W)
    b = _pointwise(b.reshape(H * W, c3), pw1_ref, pb1_ref, act=True)
    b = _pointwise(b, w3_ref, b3_ref, act=False)                  # (H*W, nc)

    # torch.cat((cv2_out, cv3_out), dim=1) -> single store of the full block
    out = jnp.concatenate([a, b], axis=-1)                        # (H*W, no)
    o_ref[0] = out.reshape(H, W, out.shape[-1]).astype(o_ref.dtype)


def _fold_level_params(p2, p3, cin):
    """Fold eval-mode BatchNorm scales into weights; cast MXU weights to bf16.

    Returns the exact arrays fed to the kernel (the pure-JAX reference uses the
    same fold so numerics line up).
    """
    bf16, f32 = jnp.bfloat16, jnp.float32
    c2 = p2["w0"].shape[-1]
    c3 = p3["pw0"].shape[-1]
    reg4 = p2["w2"].shape[-1]
    nc = p3["w2"].shape[-1]
    return [
        (p2["w0"] * p2["s0"]).reshape(9 * cin, c2).astype(bf16),   # im2col W, BN folded
        p2["b0"].reshape(1, c2).astype(f32),
        (p2["w1"] * p2["s1"]).reshape(9 * c2, c2).astype(bf16),
        p2["b1"].reshape(1, c2).astype(f32),
        p2["w2"].astype(bf16),                                     # final 1x1 of cv2
        p2["bias2"].reshape(1, reg4).astype(f32),
        (p3["dw0"] * p3["ds0"]).reshape(9, cin).astype(f32),       # depthwise, BN folded
        p3["db0"].reshape(1, cin).astype(f32),
        (p3["pw0"] * p3["ps0"]).astype(bf16),
        p3["pb0"].reshape(1, c3).astype(f32),
        (p3["dw1"] * p3["ds1"]).reshape(9, c3).astype(f32),
        p3["db1"].reshape(1, c3).astype(f32),
        (p3["pw1"] * p3["ps1"]).astype(bf16),
        p3["pb1"].reshape(1, c3).astype(f32),
        p3["w2"].astype(bf16),                                     # final 1x1 of cv3
        p3["bias2"].reshape(1, nc).astype(f32),
    ]


def detect_level(x, p2, p3):
    """One fused pallas_call for one feature level of Detect.forward."""
    B, H, W, Cin = x.shape
    c2 = p2["w0"].shape[-1]
    c3 = p3["pw0"].shape[-1]
    reg4 = p2["w2"].shape[-1]
    nc = p3["w2"].shape[-1]
    no = reg4 + nc

    args = _fold_level_params(p2, p3, Cin)

    flops = 2 * B * H * W * (
        9 * Cin * c2 + 9 * c2 * c2 + c2 * reg4
        + 9 * Cin + Cin * c3 + 9 * c3 + c3 * c3 + c3 * nc)
    transcendentals = B * H * W * (2 * c2 + Cin + 3 * c3)
    bytes_accessed = int(x.size * 4 + B * H * W * no * 4
                         + sum(int(a.size) * a.dtype.itemsize for a in args))

    kern = functools.partial(_detect_level_kernel, H=H, W=W)
    return pl.pallas_call(
        kern,
        out_shape=jax.ShapeDtypeStruct((B, H, W, no), jnp.float32),
        grid=(B,),
        in_specs=[pl.BlockSpec((1, H, W, Cin), lambda b: (b, 0, 0, 0))]
                + [pl.BlockSpec(a.shape, lambda b: (0, 0)) for a in args],
        out_specs=pl.BlockSpec((1, H, W, no), lambda b: (b, 0, 0, 0)),
        scratch_shapes=[
            pltpu.VMEM((H + 2, W + 2, Cin), jnp.float32),   # padded x (shared)
            pltpu.VMEM((H + 2, W + 2, c2), jnp.float32),    # padded cv2 intermediate
            pltpu.VMEM((H + 2, W + 2, c3), jnp.float32),    # padded cv3 intermediate
        ],
        compiler_params=pltpu.CompilerParams(
            dimension_semantics=("parallel",),
            vmem_limit_bytes=32 * 1024 * 1024),
        cost_estimate=pl.CostEstimate(
            flops=int(flops), transcendentals=int(transcendentals),
            bytes_accessed=bytes_accessed),
    )(x, *args)


def detect_forward(params, xs):
    return [detect_level(x, params["cv2"][i], params["cv3"][i])
            for i, x in enumerate(xs)]


# ---------------------------------------------------------------------------
# Parameter construction (deterministic, mirrors Detect.__init__ shapes)
# ---------------------------------------------------------------------------
def _bn_fold(key, c):
    k1, k2, k3, k4 = jax.random.split(key, 4)
    gamma = jax.random.uniform(k1, (c,), minval=0.5, maxval=1.5)
    beta = 0.1 * jax.random.normal(k2, (c,))
    mean = 0.1 * jax.random.normal(k3, (c,))
    var = jax.random.uniform(k4, (c,), minval=0.5, maxval=1.5)
    scale = gamma * lax.rsqrt(var + 1e-5)
    bias = beta - mean * scale
    return scale.astype(jnp.float32), bias.astype(jnp.float32)


def make_detect_params(key, nc, ch, reg_max=16):
    c2 = max(16, ch[0] // 4, reg_max * 4)
    c3 = max(ch[0], min(nc, 100))
    params = {"cv2": [], "cv3": [], "c2": c2, "c3": c3, "nc": nc, "reg_max": reg_max}
    for x in ch:
        key, *ks = jax.random.split(key, 17)
        cv2 = {
            "w0": 0.1 * jax.random.normal(ks[0], (3, 3, x, c2)),
            "w1": 0.1 * jax.random.normal(ks[1], (3, 3, c2, c2)),
            "w2": 0.1 * jax.random.normal(ks[2], (c2, 4 * reg_max)),
            "bias2": 0.1 * jax.random.normal(ks[3], (4 * reg_max,)),
        }
        cv2["s0"], cv2["b0"] = _bn_fold(ks[4], c2)
        cv2["s1"], cv2["b1"] = _bn_fold(ks[5], c2)
        cv3 = {
            "dw0": 0.1 * jax.random.normal(ks[6], (3, 3, x)),
            "pw0": 0.1 * jax.random.normal(ks[7], (x, c3)),
            "dw1": 0.1 * jax.random.normal(ks[8], (3, 3, c3)),
            "pw1": 0.1 * jax.random.normal(ks[9], (c3, c3)),
            "w2": 0.1 * jax.random.normal(ks[10], (c3, nc)),
            "bias2": 0.1 * jax.random.normal(ks[11], (nc,)),
        }
        cv3["ds0"], cv3["db0"] = _bn_fold(ks[12], x)
        cv3["ps0"], cv3["pb0"] = _bn_fold(ks[13], c3)
        cv3["ds1"], cv3["db1"] = _bn_fold(ks[14], c3)
        cv3["ps1"], cv3["pb1"] = _bn_fold(ks[15], c3)
        params["cv2"].append(cv2)
        params["cv3"].append(cv3)
    return params


# ---------------------------------------------------------------------------
# Pure-JAX reference (lax.conv), mirroring the kernel's BN-fold + bf16 policy
# ---------------------------------------------------------------------------
def _ref_conv(x, w_hwio, bias, act):
    # Standard conv: bf16 inputs/weights (BN folded), f32 accumulation.
    y = lax.conv_general_dilated(
        x.astype(jnp.bfloat16), w_hwio.astype(jnp.bfloat16), (1, 1), "SAME",
        dimension_numbers=("NHWC", "HWIO", "NHWC"),
        preferred_element_type=jnp.float32)
    y = y + bias
    return _silu(y) if act else y


def _ref_dwconv(x, w_hwc, bias, act):
    # Depthwise conv stays in f32 (the kernel uses f32 VPU MACs).
    C = x.shape[-1]
    y = lax.conv_general_dilated(
        x, w_hwc[:, :, None, :].astype(jnp.float32), (1, 1), "SAME",
        dimension_numbers=("NHWC", "HWIO", "NHWC"),
        feature_group_count=C,
        precision=lax.Precision.HIGHEST,
        preferred_element_type=jnp.float32)
    y = y + bias
    return _silu(y) if act else y


def detect_forward_ref(params, xs):
    outs = []
    for i, x in enumerate(xs):
        p2, p3 = params["cv2"][i], params["cv3"][i]
        a = _ref_conv(x, p2["w0"] * p2["s0"], p2["b0"], act=True)
        a = _ref_conv(a, p2["w1"] * p2["s1"], p2["b1"], act=True)
        a = _ref_conv(a, p2["w2"][None, None], p2["bias2"], act=False)
        b = _ref_dwconv(x, p3["dw0"] * p3["ds0"], p3["db0"], act=True)
        b = _ref_conv(b, (p3["pw0"] * p3["ps0"])[None, None], p3["pb0"], act=True)
        b = _ref_dwconv(b, p3["dw1"] * p3["ds1"], p3["db1"], act=True)
        b = _ref_conv(b, (p3["pw1"] * p3["ps1"])[None, None], p3["pb1"], act=True)
        b = _ref_conv(b, p3["w2"][None, None], p3["bias2"], act=False)
        outs.append(jnp.concatenate([a, b], axis=-1))
    return outs


if __name__ == "__main__":
    nc = 8                   # small class count
    ch = (16, 32)            # two feature levels
    B = 2
    spatial = [(8, 8), (4, 4)]

    key = jax.random.PRNGKey(0)
    kp, kx0, kx1 = jax.random.split(key, 3)
    params = make_detect_params(kp, nc, ch)

    xs = [
        0.5 * jax.random.normal(kx0, (B, spatial[0][0], spatial[0][1], ch[0]), jnp.float32),
        0.5 * jax.random.normal(kx1, (B, spatial[1][0], spatial[1][1], ch[1]), jnp.float32),
    ]

    outs = detect_forward(params, xs)
    outs = [jax.block_until_ready(o) for o in outs]

    refs = detect_forward_ref(params, xs)
    no = nc + 4 * params["reg_max"]
    for i, (o, r) in enumerate(zip(outs, refs)):
        assert o.shape == (B, spatial[i][0], spatial[i][1], no), o.shape
        np.testing.assert_allclose(np.asarray(o), np.asarray(r), rtol=2e-3, atol=2e-3)

    print("KERNEL_OK")
</pallas_src>

<mosaic_0001>
module attributes {stable_mosaic.version = 11 : i64} {
  func.func @_detect_level_kernel(%arg0: i32, %arg1: memref<1x8x8x16xf32, #tpu.memory_space<vmem>>, %arg2: memref<144x64xbf16, #tpu.memory_space<vmem>>, %arg3: memref<1x64xf32, #tpu.memory_space<vmem>>, %arg4: memref<576x64xbf16, #tpu.memory_space<vmem>>, %arg5: memref<1x64xf32, #tpu.memory_space<vmem>>, %arg6: memref<64x64xbf16, #tpu.memory_space<vmem>>, %arg7: memref<1x64xf32, #tpu.memory_space<vmem>>, %arg8: memref<9x16xf32, #tpu.memory_space<vmem>>, %arg9: memref<1x16xf32, #tpu.memory_space<vmem>>, %arg10: memref<16x16xbf16, #tpu.memory_space<vmem>>, %arg11: memref<1x16xf32, #tpu.memory_space<vmem>>, %arg12: memref<9x16xf32, #tpu.memory_space<vmem>>, %arg13: memref<1x16xf32, #tpu.memory_space<vmem>>, %arg14: memref<16x16xbf16, #tpu.memory_space<vmem>>, %arg15: memref<1x16xf32, #tpu.memory_space<vmem>>, %arg16: memref<16x8xbf16, #tpu.memory_space<vmem>>, %arg17: memref<1x8xf32, #tpu.memory_space<vmem>>, %arg18: memref<1x8x8x72xf32, #tpu.memory_space<vmem>>, %arg19: memref<10x10x16xf32, #tpu.memory_space<vmem>>, %arg20: memref<10x10x64xf32, #tpu.memory_space<vmem>>, %arg21: memref<10x10x16xf32, #tpu.memory_space<vmem>>) attributes {dimension_semantics = [#tpu.dimension_semantics<parallel>], iteration_bounds = array<i64: 2>, scalar_prefetch = 0 : i64, scratch_operands = 3 : i64, tpu.core_type = #tpu.core_type<tc>, window_params = [{transform_indices = @transform_0, window_bounds = array<i64: 1, 8, 8, 16>}, {pipeline_mode = #tpu.pipeline_mode<synchronous>, transform_indices = @transform_1, window_bounds = array<i64: 144, 64>}, {pipeline_mode = #tpu.pipeline_mode<synchronous>, transform_indices = @transform_2, window_bounds = array<i64: 1, 64>}, {pipeline_mode = #tpu.pipeline_mode<synchronous>, transform_indices = @transform_3, window_bounds = array<i64: 576, 64>}, {pipeline_mode = #tpu.pipeline_mode<synchronous>, transform_indices = @transform_4, window_bounds = array<i64: 1, 64>}, {pipeline_mode = #tpu.pipeline_mode<synchronous>, transform_indices = @transform_5, window_bounds = array<i64: 64, 64>}, {pipeline_mode = #tpu.pipeline_mode<synchronous>, transform_indices = @transform_6, window_bounds = array<i64: 1, 64>}, {pipeline_mode = #tpu.pipeline_mode<synchronous>, transform_indices = @transform_7, window_bounds = array<i64: 9, 16>}, {pipeline_mode = #tpu.pipeline_mode<synchronous>, transform_indices = @transform_8, window_bounds = array<i64: 1, 16>}, {pipeline_mode = #tpu.pipeline_mode<synchronous>, transform_indices = @transform_9, window_bounds = array<i64: 16, 16>}, {pipeline_mode = #tpu.pipeline_mode<synchronous>, transform_indices = @transform_10, window_bounds = array<i64: 1, 16>}, {pipeline_mode = #tpu.pipeline_mode<synchronous>, transform_indices = @transform_11, window_bounds = array<i64: 9, 16>}, {pipeline_mode = #tpu.pipeline_mode<synchronous>, transform_indices = @transform_12, window_bounds = array<i64: 1, 16>}, {pipeline_mode = #tpu.pipeline_mode<synchronous>, transform_indices = @transform_13, window_bounds = array<i64: 16, 16>}, {pipeline_mode = #tpu.pipeline_mode<synchronous>, transform_indices = @transform_14, window_bounds = array<i64: 1, 16>}, {pipeline_mode = #tpu.pipeline_mode<synchronous>, transform_indices = @transform_15, window_bounds = array<i64: 16, 8>}, {pipeline_mode = #tpu.pipeline_mode<synchronous>, transform_indices = @transform_16, window_bounds = array<i64: 1, 8>}, {transform_indices = @transform_17, window_bounds = array<i64: 1, 8, 8, 72>}]} {
    %c0 = arith.constant 0 : index
    %c0_0 = arith.constant 0 : index
    %c0_1 = arith.constant 0 : index
    %c0_2 = arith.constant 0 : index
    %0 = vector.load %arg1[%c0, %c0_0, %c0_1, %c0_2] : memref<1x8x8x16xf32, #tpu.memory_space<vmem>>, vector<1x8x8x16xf32>
    %1 = vector.shape_cast %0 : vector<1x8x8x16xf32> to vector<8x8x16xf32>
    %cst = arith.constant 0.000000e+00 : f32
    %2 = vector.broadcast %cst : f32 to vector<10x10x16xf32>
    %c0_3 = arith.constant 0 : index
    %c0_4 = arith.constant 0 : index
    %c0_5 = arith.constant 0 : index
    %3 = vector.load %arg19[%c0_3, %c0_4, %c0_5] : memref<10x10x16xf32, #tpu.memory_space<vmem>>, vector<10x10x16xf32>
    tpu.vector_store %arg19[%c0_3, %c0_4, %c0_5], %2 {strides = array<i32>} : memref<10x10x16xf32, #tpu.memory_space<vmem>>, vector<10x10x16xf32>,
    %c1 = arith.constant 1 : index
    %c1_6 = arith.constant 1 : index
    %c0_7 = arith.constant 0 : index
    %4 = vector.load %arg19[%c1, %c1_6, %c0_7] : memref<10x10x16xf32, #tpu.memory_space<vmem>>, vector<8x8x16xf32>
    tpu.vector_store %arg19[%c1, %c1_6, %c0_7], %1 {strides = array<i32>} : memref<10x10x16xf32, #tpu.memory_space<vmem>>, vector<8x8x16xf32>,
    %c0_8 = arith.constant 0 : index
    %c0_9 = arith.constant 0 : index
    %c0_10 = arith.constant 0 : index
    %5 = vector.load %arg19[%c0_8, %c0_9, %c0_10] : memref<10x10x16xf32, #tpu.memory_space<vmem>>, vector<10x10x16xf32>
    %6 = vector.extract_strided_slice %5 {offsets = [0, 0, 0], sizes = [8, 8, 16], strides = [1, 1, 1]} : vector<10x10x16xf32> to vector<8x8x16xf32>
    %7 = vector.shape_cast %6 : vector<8x8x16xf32> to vector<64x16xf32>
    %8 = arith.truncf %7 : vector<64x16xf32> to vector<64x16xbf16>
    %9 = vector.extract_strided_slice %5 {offsets = [0, 1, 0], sizes = [8, 8, 16], strides = [1, 1, 1]} : vector<10x10x16xf32> to vector<8x8x16xf32>
    %10 = vector.shape_cast %9 : vector<8x8x16xf32> to vector<64x16xf32>
    %11 = arith.truncf %10 : vector<64x16xf32> to vector<64x16xbf16>
    %12 = vector.extract_strided_slice %5 {offsets = [0, 2, 0], sizes = [8, 8, 16], strides = [1, 1, 1]} : vector<10x10x16xf32> to vector<8x8x16xf32>
    %13 = vector.shape_cast %12 : vector<8x8x16xf32> to vector<64x16xf32>
    %14 = arith.truncf %13 : vector<64x16xf32> to vector<64x16xbf16>
    %15 = vector.extract_strided_slice %5 {offsets = [1, 0, 0], sizes = [8, 8, 16], strides = [1, 1, 1]} : vector<10x10x16xf32> to vector<8x8x16xf32>
    %16 = vector.shape_cast %15 : vector<8x8x16xf32> to vector<64x16xf32>
    %17 = arith.truncf %16 : vector<64x16xf32> to vector<64x16xbf16>
    %18 = vector.extract_strided_slice %5 {offsets = [1, 1, 0], sizes = [8, 8, 16], strides = [1, 1, 1]} : vector<10x10x16xf32> to vector<8x8x16xf32>
    %19 = vector.shape_cast %18 : vector<8x8x16xf32> to vector<64x16xf32>
    %20 = arith.truncf %19 : vector<64x16xf32> to vector<64x16xbf16>
    %21 = vector.extract_strided_slice %5 {offsets = [1, 2, 0], sizes = [8, 8, 16], strides = [1, 1, 1]} : vector<10x10x16xf32> to vector<8x8x16xf32>
    %22 = vector.shape_cast %21 : vector<8x8x16xf32> to vector<64x16xf32>
    %23 = arith.truncf %22 : vector<64x16xf32> to vector<64x16xbf16>
    %24 = vector.extract_strided_slice %5 {offsets = [2, 0, 0], sizes = [8, 8, 16], strides = [1, 1, 1]} : vector<10x10x16xf32> to vector<8x8x16xf32>
    %25 = vector.shape_cast %24 : vector<8x8x16xf32> to vector<64x16xf32>
    %26 = arith.truncf %25 : vector<64x16xf32> to vector<64x16xbf16>
    %27 = vector.extract_strided_slice %5 {offsets = [2, 1, 0], sizes = [8, 8, 16], strides = [1, 1, 1]} : vector<10x10x16xf32> to vector<8x8x16xf32>
    %28 = vector.shape_cast %27 : vector<8x8x16xf32> to vector<64x16xf32>
    %29 = arith.truncf %28 : vector<64x16xf32> to vector<64x16xbf16>
    %30 = vector.extract_strided_slice %5 {offsets = [2, 2, 0], sizes = [8, 8, 16], strides = [1, 1, 1]} : vector<10x10x16xf32> to vector<8x8x16xf32>
    %31 = vector.shape_cast %30 : vector<8x8x16xf32> to vector<64x16xf32>
    %32 = arith.truncf %31 : vector<64x16xf32> to vector<64x16xbf16>
    %33 = tpu.concatenate %8, %11, %14, %17, %20, %23, %26, %29, %32 in 1 : vector<64x16xbf16>, vector<64x16xbf16>, vector<64x16xbf16>, vector<64x16xbf16>, vector<64x16xbf16>, vector<64x16xbf16>, vector<64x16xbf16>, vector<64x16xbf16>, vector<64x16xbf16> -> vector<64x144xbf16>
    %c0_11 = arith.constant 0 : index
    %c0_12 = arith.constant 0 : index
    %34 = vector.load %arg2[%c0_11, %c0_12] : memref<144x64xbf16, #tpu.memory_space<vmem>>, vector<144x64xbf16>
    %cst_13 = arith.constant dense<0.000000e+00> : vector<64x64xf32>
    %35 = tpu.matmul %33, %34, %cst_13 {dimension_numbers = #tpu.dot_dimension_numbers<[1], [0], [0], [1], [0, 0, 1, 1], [], []>} : vector<64x144xbf16>, vector<144x64xbf16>, vector<64x64xf32> -> vector<64x64xf32>
    %c0_14 = arith.constant 0 : index
    %c0_15 = arith.constant 0 : index
    %36 = vector.load %arg3[%c0_14, %c0_15] : memref<1x64xf32, #tpu.memory_space<vmem>>, vector<1x64xf32>
    %37 = vector.shape_cast %36 : vector<1x64xf32> to vector<64xf32>
    %38 = vector.shape_cast %37 : vector<64xf32> to vector<1x64xf32>
    %39 = vector.broadcast %38 : vector<1x64xf32> to vector<64x64xf32>
    %40 = arith.addf %35, %39 : vector<64x64xf32>
    %cst_16 = arith.constant 0.000000e+00 : f32
    %41 = vector.broadcast %cst_16 : f32 to vector<64x64xf32>
    %42 = arith.subf %41, %40 : vector<64x64xf32>
    %43 = math.exp %42 : vector<64x64xf32>
    %cst_17 = arith.constant 1.000000e+00 : f32
    %44 = vector.broadcast %cst_17 : f32 to vector<64x64xf32>
    %45 = arith.addf %44, %43 : vector<64x64xf32>
    %cst_18 = arith.constant 1.000000e+00 : f32
    %46 = vector.broadcast %cst_18 : f32 to vector<64x64xf32>
    %47 = arith.divf %46, %45 : vector<64x64xf32>
    %48 = arith.mulf %40, %47 : vector<64x64xf32>
    %49 = vector.shape_cast %48 : vector<64x64xf32> to vector<8x8x64xf32>
    %cst_19 = arith.constant 0.000000e+00 : f32
    %50 = vector.broadcast %cst_19 : f32 to vector<10x10x64xf32>
    %c0_20 = arith.constant 0 : index
    %c0_21 = arith.constant 0 : index
    %c0_22 = arith.constant 0 : index
    %51 = vector.load %arg20[%c0_20, %c0_21, %c0_22] : memref<10x10x64xf32, #tpu.memory_space<vmem>>, vector<10x10x64xf32>
    tpu.vector_store %arg20[%c0_20, %c0_21, %c0_22], %50 {strides = array<i32>} : memref<10x10x64xf32, #tpu.memory_space<vmem>>, vector<10x10x64xf32>,
    %c1_23 = arith.constant 1 : index
    %c1_24 = arith.constant 1 : index
    %c0_25 = arith.constant 0 : index
    %52 = vector.load %arg20[%c1_23, %c1_24, %c0_25] : memref<10x10x64xf32, #tpu.memory_space<vmem>>, vector<8x8x64xf32>
    tpu.vector_store %arg20[%c1_23, %c1_24, %c0_25], %49 {strides = array<i32>} : memref<10x10x64xf32, #tpu.memory_space<vmem>>, vector<8x8x64xf32>,
    %c0_26 = arith.constant 0 : index
    %c0_27 = arith.constant 0 : index
    %c0_28 = arith.constant 0 : index
    %53 = vector.load %arg20[%c0_26, %c0_27, %c0_28] : memref<10x10x64xf32, #tpu.memory_space<vmem>>, vector<10x10x64xf32>
    %54 = vector.extract_strided_slice %53 {offsets = [0, 0, 0], sizes = [8, 8, 64], strides = [1, 1, 1]} : vector<10x10x64xf32> to vector<8x8x64xf32>
    %55 = vector.shape_cast %54 : vector<8x8x64xf32> to vector<64x64xf32>
    %56 = arith.truncf %55 : vector<64x64xf32> to vector<64x64xbf16>
    %57 = vector.extract_strided_slice %53 {offsets = [0, 1, 0], sizes = [8, 8, 64], strides = [1, 1, 1]} : vector<10x10x64xf32> to vector<8x8x64xf32>
    %58 = vector.shape_cast %57 : vector<8x8x64xf32> to vector<64x64xf32>
    %59 = arith.truncf %58 : vector<64x64xf32> to vector<64x64xbf16>
    %60 = vector.extract_strided_slice %53 {offsets = [0, 2, 0], sizes = [8, 8, 64], strides = [1, 1, 1]} : vector<10x10x64xf32> to vector<8x8x64xf32>
    %61 = vector.shape_cast %60 : vector<8x8x64xf32> to vector<64x64xf32>
    %62 = arith.truncf %61 : vector<64x64xf32> to vector<64x64xbf16>
    %63 = vector.extract_strided_slice %53 {offsets = [1, 0, 0], sizes = [8, 8, 64], strides = [1, 1, 1]} : vector<10x10x64xf32> to vector<8x8x64xf32>
    %64 = vector.shape_cast %63 : vector<8x8x64xf32> to vector<64x64xf32>
    %65 = arith.truncf %64 : vector<64x64xf32> to vector<64x64xbf16>
    %66 = vector.extract_strided_slice %53 {offsets = [1, 1, 0], sizes = [8, 8, 64], strides = [1, 1, 1]} : vector<10x10x64xf32> to vector<8x8x64xf32>
    %67 = vector.shape_cast %66 : vector<8x8x64xf32> to vector<64x64xf32>
    %68 = arith.truncf %67 : vector<64x64xf32> to vector<64x64xbf16>
    %69 = vector.extract_strided_slice %53 {offsets = [1, 2, 0], sizes = [8, 8, 64], strides = [1, 1, 1]} : vector<10x10x64xf32> to vector<8x8x64xf32>
    %70 = vector.shape_cast %69 : vector<8x8x64xf32> to vector<64x64xf32>
    %71 = arith.truncf %70 : vector<64x64xf32> to vector<64x64xbf16>
    %72 = vector.extract_strided_slice %53 {offsets = [2, 0, 0], sizes = [8, 8, 64], strides = [1, 1, 1]} : vector<10x10x64xf32> to vector<8x8x64xf32>
    %73 = vector.shape_cast %72 : vector<8x8x64xf32> to vector<64x64xf32>
    %74 = arith.truncf %73 : vector<64x64xf32> to vector<64x64xbf16>
    %75 = vector.extract_strided_slice %53 {offsets = [2, 1, 0], sizes = [8, 8, 64], strides = [1, 1, 1]} : vector<10x10x64xf32> to vector<8x8x64xf32>
    %76 = vector.shape_cast %75 : vector<8x8x64xf32> to vector<64x64xf32>
    %77 = arith.truncf %76 : vector<64x64xf32> to vector<64x64xbf16>
    %78 = vector.extract_strided_slice %53 {offsets = [2, 2, 0], sizes = [8, 8, 64], strides = [1, 1, 1]} : vector<10x10x64xf32> to vector<8x8x64xf32>
    %79 = vector.shape_cast %78 : vector<8x8x64xf32> to vector<64x64xf32>
    %80 = arith.truncf %79 : vector<64x64xf32> to vector<64x64xbf16>
    %81 = tpu.concatenate %56, %59, %62, %65, %68, %71, %74, %77, %80 in 1 : vector<64x64xbf16>, vector<64x64xbf16>, vector<64x64xbf16>, vector<64x64xbf16>, vector<64x64xbf16>, vector<64x64xbf16>, vector<64x64xbf16>, vector<64x64xbf16>, vector<64x64xbf16> -> vector<64x576xbf16>
    %c0_29 = arith.constant 0 : index
    %c0_30 = arith.constant 0 : index
    %82 = vector.load %arg4[%c0_29, %c0_30] : memref<576x64xbf16, #tpu.memory_space<vmem>>, vector<576x64xbf16>
    %cst_31 = arith.constant dense<0.000000e+00> : vector<64x64xf32>
    %83 = tpu.matmul %81, %82, %cst_31 {dimension_numbers = #tpu.dot_dimension_numbers<[1], [0], [0], [1], [0, 0, 1, 1], [], []>} : vector<64x576xbf16>, vector<576x64xbf16>, vector<64x64xf32> -> vector<64x64xf32>
    %c0_32 = arith.constant 0 : index
    %c0_33 = arith.constant 0 : index
    %84 = vector.load %arg5[%c0_32, %c0_33] : memref<1x64xf32, #tpu.memory_space<vmem>>, vector<1x64xf32>
    %85 = vector.shape_cast %84 : vector<1x64xf32> to vector<64xf32>
    %86 = vector.shape_cast %85 : vector<64xf32> to vector<1x64xf32>
    %87 = vector.broadcast %86 : vector<1x64xf32> to vector<64x64xf32>
    %88 = arith.addf %83, %87 : vector<64x64xf32>
    %cst_34 = arith.constant 0.000000e+00 : f32
    %89 = vector.broadcast %cst_34 : f32 to vector<64x64xf32>
    %90 = arith.subf %89, %88 : vector<64x64xf32>
    %91 = math.exp %90 : vector<64x64xf32>
    %cst_35 = arith.constant 1.000000e+00 : f32
    %92 = vector.broadcast %cst_35 : f32 to vector<64x64xf32>
    %93 = arith.addf %92, %91 : vector<64x64xf32>
    %cst_36 = arith.constant 1.000000e+00 : f32
    %94 = vector.broadcast %cst_36 : f32 to vector<64x64xf32>
    %95 = arith.divf %94, %93 : vector<64x64xf32>
    %96 = arith.mulf %88, %95 : vector<64x64xf32>
    %97 = arith.truncf %96 : vector<64x64xf32> to vector<64x64xbf16>
    %c0_37 = arith.constant 0 : index
    %c0_38 = arith.constant 0 : index
    %98 = vector.load %arg6[%c0_37, %c0_38] : memref<64x64xbf16, #tpu.memory_space<vmem>>, vector<64x64xbf16>
    %cst_39 = arith.constant dense<0.000000e+00> : vector<64x64xf32>
    %99 = tpu.matmul %97, %98, %cst_39 {dimension_numbers = #tpu.dot_dimension_numbers<[1], [0], [0], [1], [0, 0, 1, 1], [], []>} : vector<64x64xbf16>, vector<64x64xbf16>, vector<64x64xf32> -> vector<64x64xf32>
    %c0_40 = arith.constant 0 : index
    %c0_41 = arith.constant 0 : index
    %100 = vector.load %arg7[%c0_40, %c0_41] : memref<1x64xf32, #tpu.memory_space<vmem>>, vector<1x64xf32>
    %101 = vector.shape_cast %100 : vector<1x64xf32> to vector<64xf32>
    %102 = vector.shape_cast %101 : vector<64xf32> to vector<1x64xf32>
    %103 = vector.broadcast %102 : vector<1x64xf32> to vector<64x64xf32>
    %104 = arith.addf %99, %103 : vector<64x64xf32>
    %cst_42 = arith.constant 0.000000e+00 : f32
    %105 = vector.broadcast %cst_42 : f32 to vector<8x8x16xf32>
    %106 = vector.extract_strided_slice %5 {offsets = [0, 0, 0], sizes = [8, 8, 16], strides = [1, 1, 1]} : vector<10x10x16xf32> to vector<8x8x16xf32>
    %c0_43 = arith.constant 0 : index
    %c0_44 = arith.constant 0 : index
    %107 = vector.load %arg8[%c0_43, %c0_44] : memref<9x16xf32, #tpu.memory_space<vmem>>, vector<1x16xf32>
    %108 = vector.shape_cast %107 : vector<1x16xf32> to vector<16xf32>
    %109 = vector.shape_cast %108 : vector<16xf32> to vector<1x1x16xf32>
    %110 = vector.broadcast %109 : vector<1x1x16xf32> to vector<8x8x16xf32>
    %111 = arith.mulf %106, %110 : vector<8x8x16xf32>
    %112 = arith.addf %105, %111 : vector<8x8x16xf32>
    %113 = vector.extract_strided_slice %5 {offsets = [0, 1, 0], sizes = [8, 8, 16], strides = [1, 1, 1]} : vector<10x10x16xf32> to vector<8x8x16xf32>
    %c1_45 = arith.constant 1 : index
    %c0_46 = arith.constant 0 : index
    %114 = vector.load %arg8[%c1_45, %c0_46] : memref<9x16xf32, #tpu.memory_space<vmem>>, vector<1x16xf32>
    %115 = vector.shape_cast %114 : vector<1x16xf32> to vector<16xf32>
    %116 = vector.shape_cast %115 : vector<16xf32> to vector<1x1x16xf32>
    %117 = vector.broadcast %116 : vector<1x1x16xf32> to vector<8x8x16xf32>
    %118 = arith.mulf %113, %117 : vector<8x8x16xf32>
    %119 = arith.addf %112, %118 : vector<8x8x16xf32>
    %120 = vector.extract_strided_slice %5 {offsets = [0, 2, 0], sizes = [8, 8, 16], strides = [1, 1, 1]} : vector<10x10x16xf32> to vector<8x8x16xf32>
    %c2 = arith.constant 2 : index
    %c0_47 = arith.constant 0 : index
    %121 = vector.load %arg8[%c2, %c0_47] : memref<9x16xf32, #tpu.memory_space<vmem>>, vector<1x16xf32>
    %122 = vector.shape_cast %121 : vector<1x16xf32> to vector<16xf32>
    %123 = vector.shape_cast %122 : vector<16xf32> to vector<1x1x16xf32>
    %124 = vector.broadcast %123 : vector<1x1x16xf32> to vector<8x8x16xf32>
    %125 = arith.mulf %120, %124 : vector<8x8x16xf32>
    %126 = arith.addf %119, %125 : vector<8x8x16xf32>
    %127 = vector.extract_strided_slice %5 {offsets = [1, 0, 0], sizes = [8, 8, 16], strides = [1, 1, 1]} : vector<10x10x16xf32> to vector<8x8x16xf32>
    %c3 = arith.constant 3 : index
    %c0_48 = arith.constant 0 : index
    %128 = vector.load %arg8[%c3, %c0_48] : memref<9x16xf32, #tpu.memory_space<vmem>>, vector<1x16xf32>
    %129 = vector.shape_cast %128 : vector<1x16xf32> to vector<16xf32>
    %130 = vector.shape_cast %129 : vector<16xf32> to vector<1x1x16xf32>
    %131 = vector.broadcast %130 : vector<1x1x16xf32> to vector<8x8x16xf32>
    %132 = arith.mulf %127, %131 : vector<8x8x16xf32>
    %133 = arith.addf %126, %132 : vector<8x8x16xf32>
    %134 = vector.extract_strided_slice %5 {offsets = [1, 1, 0], sizes = [8, 8, 16], strides = [1, 1, 1]} : vector<10x10x16xf32> to vector<8x8x16xf32>
    %c4 = arith.constant 4 : index
    %c0_49 = arith.constant 0 : index
    %135 = vector.load %arg8[%c4, %c0_49] : memref<9x16xf32, #tpu.memory_space<vmem>>, vector<1x16xf32>
    %136 = vector.shape_cast %135 : vector<1x16xf32> to vector<16xf32>
    %137 = vector.shape_cast %136 : vector<16xf32> to vector<1x1x16xf32>
    %138 = vector.broadcast %137 : vector<1x1x16xf32> to vector<8x8x16xf32>
    %139 = arith.mulf %134, %138 : vector<8x8x16xf32>
    %140 = arith.addf %133, %139 : vector<8x8x16xf32>
    %141 = vector.extract_strided_slice %5 {offsets = [1, 2, 0], sizes = [8, 8, 16], strides = [1, 1, 1]} : vector<10x10x16xf32> to vector<8x8x16xf32>
    %c5 = arith.constant 5 : index
    %c0_50 = arith.constant 0 : index
    %142 = vector.load %arg8[%c5, %c0_50] : memref<9x16xf32, #tpu.memory_space<vmem>>, vector<1x16xf32>
    %143 = vector.shape_cast %142 : vector<1x16xf32> to vector<16xf32>
    %144 = vector.shape_cast %143 : vector<16xf32> to vector<1x1x16xf32>
    %145 = vector.broadcast %144 : vector<1x1x16xf32> to vector<8x8x16xf32>
    %146 = arith.mulf %141, %145 : vector<8x8x16xf32>
    %147 = arith.addf %140, %146 : vector<8x8x16xf32>
    %148 = vector.extract_strided_slice %5 {offsets = [2, 0, 0], sizes = [8, 8, 16], strides = [1, 1, 1]} : vector<10x10x16xf32> to vector<8x8x16xf32>
    %c6 = arith.constant 6 : index
    %c0_51 = arith.constant 0 : index
    %149 = vector.load %arg8[%c6, %c0_51] : memref<9x16xf32, #tpu.memory_space<vmem>>, vector<1x16xf32>
    %150 = vector.shape_cast %149 : vector<1x16xf32> to vector<16xf32>
    %151 = vector.shape_cast %150 : vector<16xf32> to vector<1x1x16xf32>
    %152 = vector.broadcast %151 : vector<1x1x16xf32> to vector<8x8x16xf32>
    %153 = arith.mulf %148, %152 : vector<8x8x16xf32>
    %154 = arith.addf %147, %153 : vector<8x8x16xf32>
    %155 = vector.extract_strided_slice %5 {offsets = [2, 1, 0], sizes = [8, 8, 16], strides = [1, 1, 1]} : vector<10x10x16xf32> to vector<8x8x16xf32>
    %c7 = arith.constant 7 : index
    %c0_52 = arith.constant 0 : index
    %156 = vector.load %arg8[%c7, %c0_52] : memref<9x16xf32, #tpu.memory_space<vmem>>, vector<1x16xf32>
    %157 = vector.shape_cast %156 : vector<1x16xf32> to vector<16xf32>
    %158 = vector.shape_cast %157 : vector<16xf32> to vector<1x1x16xf32>
    %159 = vector.broadcast %158 : vector<1x1x16xf32> to vector<8x8x16xf32>
    %160 = arith.mulf %155, %159 : vector<8x8x16xf32>
    %161 = arith.addf %154, %160 : vector<8x8x16xf32>
    %162 = vector.extract_strided_slice %5 {offsets = [2, 2, 0], sizes = [8, 8, 16], strides = [1, 1, 1]} : vector<10x10x16xf32> to vector<8x8x16xf32>
    %c8 = arith.constant 8 : index
    %c0_53 = arith.constant 0 : index
    %163 = vector.load %arg8[%c8, %c0_53] : memref<9x16xf32, #tpu.memory_space<vmem>>, vector<1x16xf32>
    %164 = vector.shape_cast %163 : vector<1x16xf32> to vector<16xf32>
    %165 = vector.shape_cast %164 : vector<16xf32> to vector<1x1x16xf32>
    %166 = vector.broadcast %165 : vector<1x1x16xf32> to vector<8x8x16xf32>
    %167 = arith.mulf %162, %166 : vector<8x8x16xf32>
    %168 = arith.addf %161, %167 : vector<8x8x16xf32>
    %c0_54 = arith.constant 0 : index
    %c0_55 = arith.constant 0 : index
    %169 = vector.load %arg9[%c0_54, %c0_55] : memref<1x16xf32, #tpu.memory_space<vmem>>, vector<1x16xf32>
    %170 = vector.shape_cast %169 : vector<1x16xf32> to vector<16xf32>
    %171 = vector.shape_cast %170 : vector<16xf32> to vector<1x1x16xf32>
    %172 = vector.broadcast %171 : vector<1x1x16xf32> to vector<8x8x16xf32>
    %173 = arith.addf %168, %172 : vector<8x8x16xf32>
    %cst_56 = arith.constant 0.000000e+00 : f32
    %174 = vector.broadcast %cst_56 : f32 to vector<8x8x16xf32>
    %175 = arith.subf %174, %173 : vector<8x8x16xf32>
    %176 = math.exp %175 : vector<8x8x16xf32>
    %cst_57 = arith.constant 1.000000e+00 : f32
    %177 = vector.broadcast %cst_57 : f32 to vector<8x8x16xf32>
    %178 = arith.addf %177, %176 : vector<8x8x16xf32>
    %cst_58 = arith.constant 1.000000e+00 : f32
    %179 = vector.broadcast %cst_58 : f32 to vector<8x8x16xf32>
    %180 = arith.divf %179, %178 : vector<8x8x16xf32>
    %181 = arith.mulf %173, %180 : vector<8x8x16xf32>
    %182 = vector.shape_cast %181 : vector<8x8x16xf32> to vector<64x16xf32>
    %183 = arith.truncf %182 : vector<64x16xf32> to vector<64x16xbf16>
    %c0_59 = arith.constant 0 : index
    %c0_60 = arith.constant 0 : index
    %184 = vector.load %arg10[%c0_59, %c0_60] : memref<16x16xbf16, #tpu.memory_space<vmem>>, vector<16x16xbf16>
    %cst_61 = arith.constant dense<0.000000e+00> : vector<64x16xf32>
    %185 = tpu.matmul %183, %184, %cst_61 {dimension_numbers = #tpu.dot_dimension_numbers<[1], [0], [0], [1], [0, 0, 1, 1], [], []>} : vector<64x16xbf16>, vector<16x16xbf16>, vector<64x16xf32> -> vector<64x16xf32>
    %c0_62 = arith.constant 0 : index
    %c0_63 = arith.constant 0 : index
    %186 = vector.load %arg11[%c0_62, %c0_63] : memref<1x16xf32, #tpu.memory_space<vmem>>, vector<1x16xf32>
    %187 = vector.shape_cast %186 : vector<1x16xf32> to vector<16xf32>
    %188 = vector.shape_cast %187 : vector<16xf32> to vector<1x16xf32>
    %189 = vector.broadcast %188 : vector<1x16xf32> to vector<64x16xf32>
    %190 = arith.addf %185, %189 : vector<64x16xf32>
    %cst_64 = arith.constant 0.000000e+00 : f32
    %191 = vector.broadcast %cst_64 : f32 to vector<64x16xf32>
    %192 = arith.subf %191, %190 : vector<64x16xf32>
    %193 = math.exp %192 : vector<64x16xf32>
    %cst_65 = arith.constant 1.000000e+00 : f32
    %194 = vector.broadcast %cst_65 : f32 to vector<64x16xf32>
    %195 = arith.addf %194, %193 : vector<64x16xf32>
    %cst_66 = arith.constant 1.000000e+00 : f32
    %196 = vector.broadcast %cst_66 : f32 to vector<64x16xf32>
    %197 = arith.divf %196, %195 : vector<64x16xf32>
    %198 = arith.mulf %190, %197 : vector<64x16xf32>
    %199 = vector.shape_cast %198 : vector<64x16xf32> to vector<8x8x16xf32>
    %cst_67 = arith.constant 0.000000e+00 : f32
    %200 = vector.broadcast %cst_67 : f32 to vector<10x10x16xf32>
    %c0_68 = arith.constant 0 : index
    %c0_69 = arith.constant 0 : index
    %c0_70 = arith.constant 0 : index
    %201 = vector.load %arg21[%c0_68, %c0_69, %c0_70] : memref<10x10x16xf32, #tpu.memory_space<vmem>>, vector<10x10x16xf32>
    tpu.vector_store %arg21[%c0_68, %c0_69, %c0_70], %200 {strides = array<i32>} : memref<10x10x16xf32, #tpu.memory_space<vmem>>, vector<10x10x16xf32>,
    %c1_71 = arith.constant 1 : index
    %c1_72 = arith.constant 1 : index
    %c0_73 = arith.constant 0 : index
    %202 = vector.load %arg21[%c1_71, %c1_72, %c0_73] : memref<10x10x16xf32, #tpu.memory_space<vmem>>, vector<8x8x16xf32>
    tpu.vector_store %arg21[%c1_71, %c1_72, %c0_73], %199 {strides = array<i32>} : memref<10x10x16xf32, #tpu.memory_space<vmem>>, vector<8x8x16xf32>,
    %c0_74 = arith.constant 0 : index
    %c0_75 = arith.constant 0 : index
    %c0_76 = arith.constant 0 : index
    %203 = vector.load %arg21[%c0_74, %c0_75, %c0_76] : memref<10x10x16xf32, #tpu.memory_space<vmem>>, vector<10x10x16xf32>
    %cst_77 = arith.constant 0.000000e+00 : f32
    %204 = vector.broadcast %cst_77 : f32 to vector<8x8x16xf32>
    %205 = vector.extract_strided_slice %203 {offsets = [0, 0, 0], sizes = [8, 8, 16], strides = [1, 1, 1]} : vector<10x10x16xf32> to vector<8x8x16xf32>
    %c0_78 = arith.constant 0 : index
    %c0_79 = arith.constant 0 : index
    %206 = vector.load %arg12[%c0_78, %c0_79] : memref<9x16xf32, #tpu.memory_space<vmem>>, vector<1x16xf32>
    %207 = vector.shape_cast %206 : vector<1x16xf32> to vector<16xf32>
    %208 = vector.shape_cast %207 : vector<16xf32> to vector<1x1x16xf32>
    %209 = vector.broadcast %208 : vector<1x1x16xf32> to vector<8x8x16xf32>
    %210 = arith.mulf %205, %209 : vector<8x8x16xf32>
    %211 = arith.addf %204, %210 : vector<8x8x16xf32>
    %212 = vector.extract_strided_slice %203 {offsets = [0, 1, 0], sizes = [8, 8, 16], strides = [1, 1, 1]} : vector<10x10x16xf32> to vector<8x8x16xf32>
    %c1_80 = arith.constant 1 : index
    %c0_81 = arith.constant 0 : index
    %213 = vector.load %arg12[%c1_80, %c0_81] : memref<9x16xf32, #tpu.memory_space<vmem>>, vector<1x16xf32>
    %214 = vector.shape_cast %213 : vector<1x16xf32> to vector<16xf32>
    %215 = vector.shape_cast %214 : vector<16xf32> to vector<1x1x16xf32>
    %216 = vector.broadcast %215 : vector<1x1x16xf32> to vector<8x8x16xf32>
    %217 = arith.mulf %212, %216 : vector<8x8x16xf32>
    %218 = arith.addf %211, %217 : vector<8x8x16xf32>
    %219 = vector.extract_strided_slice %203 {offsets = [0, 2, 0], sizes = [8, 8, 16], strides = [1, 1, 1]} : vector<10x10x16xf32> to vector<8x8x16xf32>
    %c2_82 = arith.constant 2 : index
    %c0_83 = arith.constant 0 : index
    %220 = vector.load %arg12[%c2_82, %c0_83] : memref<9x16xf32, #tpu.memory_space<vmem>>, vector<1x16xf32>
    %221 = vector.shape_cast %220 : vector<1x16xf32> to vector<16xf32>
    %222 = vector.shape_cast %221 : vector<16xf32> to vector<1x1x16xf32>
    %223 = vector.broadcast %222 : vector<1x1x16xf32> to vector<8x8x16xf32>
    %224 = arith.mulf %219, %223 : vector<8x8x16xf32>
    %225 = arith.addf %218, %224 : vector<8x8x16xf32>
    %226 = vector.extract_strided_slice %203 {offsets = [1, 0, 0], sizes = [8, 8, 16], strides = [1, 1, 1]} : vector<10x10x16xf32> to vector<8x8x16xf32>
    %c3_84 = arith.constant 3 : index
    %c0_85 = arith.constant 0 : index
    %227 = vector.load %arg12[%c3_84, %c0_85] : memref<9x16xf32, #tpu.memory_space<vmem>>, vector<1x16xf32>
    %228 = vector.shape_cast %227 : vector<1x16xf32> to vector<16xf32>
    %229 = vector.shape_cast %228 : vector<16xf32> to vector<1x1x16xf32>
    %230 = vector.broadcast %229 : vector<1x1x16xf32> to vector<8x8x16xf32>
    %231 = arith.mulf %226, %230 : vector<8x8x16xf32>
    %232 = arith.addf %225, %231 : vector<8x8x16xf32>
    %233 = vector.extract_strided_slice %203 {offsets = [1, 1, 0], sizes = [8, 8, 16], strides = [1, 1, 1]} : vector<10x10x16xf32> to vector<8x8x16xf32>
    %c4_86 = arith.constant 4 : index
    %c0_87 = arith.constant 0 : index
    %234 = vector.load %arg12[%c4_86, %c0_87] : memref<9x16xf32, #tpu.memory_space<vmem>>, vector<1x16xf32>
    %235 = vector.shape_cast %234 : vector<1x16xf32> to vector<16xf32>
    %236 = vector.shape_cast %235 : vector<16xf32> to vector<1x1x16xf32>
    %237 = vector.broadcast %236 : vector<1x1x16xf32> to vector<8x8x16xf32>
    %238 = arith.mulf %233, %237 : vector<8x8x16xf32>
    %239 = arith.addf %232, %238 : vector<8x8x16xf32>
    %240 = vector.extract_strided_slice %203 {offsets = [1, 2, 0], sizes = [8, 8, 16], strides = [1, 1, 1]} : vector<10x10x16xf32> to vector<8x8x16xf32>
    %c5_88 = arith.constant 5 : index
    %c0_89 = arith.constant 0 : index
    %241 = vector.load %arg12[%c5_88, %c0_89] : memref<9x16xf32, #tpu.memory_space<vmem>>, vector<1x16xf32>
    %242 = vector.shape_cast %241 : vector<1x16xf32> to vector<16xf32>
    %243 = vector.shape_cast %242 : vector<16xf32> to vector<1x1x16xf32>
    %244 = vector.broadcast %243 : vector<1x1x16xf32> to vector<8x8x16xf32>
    %245 = arith.mulf %240, %244 : vector<8x8x16xf32>
    %246 = arith.addf %239, %245 : vector<8x8x16xf32>
    %247 = vector.extract_strided_slice %203 {offsets = [2, 0, 0], sizes = [8, 8, 16], strides = [1, 1, 1]} : vector<10x10x16xf32> to vector<8x8x16xf32>
    %c6_90 = arith.constant 6 : index
    %c0_91 = arith.constant 0 : index
    %248 = vector.load %arg12[%c6_90, %c0_91] : memref<9x16xf32, #tpu.memory_space<vmem>>, vector<1x16xf32>
    %249 = vector.shape_cast %248 : vector<1x16xf32> to vector<16xf32>
    %250 = vector.shape_cast %249 : vector<16xf32> to vector<1x1x16xf32>
    %251 = vector.broadcast %250 : vector<1x1x16xf32> to vector<8x8x16xf32>
    %252 = arith.mulf %247, %251 : vector<8x8x16xf32>
    %253 = arith.addf %246, %252 : vector<8x8x16xf32>
    %254 = vector.extract_strided_slice %203 {offsets = [2, 1, 0], sizes = [8, 8, 16], strides = [1, 1, 1]} : vector<10x10x16xf32> to vector<8x8x16xf32>
    %c7_92 = arith.constant 7 : index
    %c0_93 = arith.constant 0 : index
    %255 = vector.load %arg12[%c7_92, %c0_93] : memref<9x16xf32, #tpu.memory_space<vmem>>, vector<1x16xf32>
    %256 = vector.shape_cast %255 : vector<1x16xf32> to vector<16xf32>
    %257 = vector.shape_cast %256 : vector<16xf32> to vector<1x1x16xf32>
    %258 = vector.broadcast %257 : vector<1x1x16xf32> to vector<8x8x16xf32>
    %259 = arith.mulf %254, %258 : vector<8x8x16xf32>
    %260 = arith.addf %253, %259 : vector<8x8x16xf32>
    %261 = vector.extract_strided_slice %203 {offsets = [2, 2, 0], sizes = [8, 8, 16], strides = [1, 1, 1]} : vector<10x10x16xf32> to vector<8x8x16xf32>
    %c8_94 = arith.constant 8 : index
    %c0_95 = arith.constant 0 : index
    %262 = vector.load %arg12[%c8_94, %c0_95] : memref<9x16xf32, #tpu.memory_space<vmem>>, vector<1x16xf32>
    %263 = vector.shape_cast %262 : vector<1x16xf32> to vector<16xf32>
    %264 = vector.shape_cast %263 : vector<16xf32> to vector<1x1x16xf32>
    %265 = vector.broadcast %264 : vector<1x1x16xf32> to vector<8x8x16xf32>
    %266 = arith.mulf %261, %265 : vector<8x8x16xf32>
    %267 = arith.addf %260, %266 : vector<8x8x16xf32>
    %c0_96 = arith.constant 0 : index
    %c0_97 = arith.constant 0 : index
    %268 = vector.load %arg13[%c0_96, %c0_97] : memref<1x16xf32, #tpu.memory_space<vmem>>, vector<1x16xf32>
    %269 = vector.shape_cast %268 : vector<1x16xf32> to vector<16xf32>
    %270 = vector.shape_cast %269 : vector<16xf32> to vector<1x1x16xf32>
    %271 = vector.broadcast %270 : vector<1x1x16xf32> to vector<8x8x16xf32>
    %272 = arith.addf %267, %271 : vector<8x8x16xf32>
    %cst_98 = arith.constant 0.000000e+00 : f32
    %273 = vector.broadcast %cst_98 : f32 to vector<8x8x16xf32>
    %274 = arith.subf %273, %272 : vector<8x8x16xf32>
    %275 = math.exp %274 : vector<8x8x16xf32>
    %cst_99 = arith.constant 1.000000e+00 : f32
    %276 = vector.broadcast %cst_99 : f32 to vector<8x8x16xf32>
    %277 = arith.addf %276, %275 : vector<8x8x16xf32>
    %cst_100 = arith.constant 1.000000e+00 : f32
    %278 = vector.broadcast %cst_100 : f32 to vector<8x8x16xf32>
    %279 = arith.divf %278, %277 : vector<8x8x16xf32>
    %280 = arith.mulf %272, %279 : vector<8x8x16xf32>
    %281 = vector.shape_cast %280 : vector<8x8x16xf32> to vector<64x16xf32>
    %282 = arith.truncf %281 : vector<64x16xf32> to vector<64x16xbf16>
    %c0_101 = arith.constant 0 : index
    %c0_102 = arith.constant 0 : index
    %283 = vector.load %arg14[%c0_101, %c0_102] : memref<16x16xbf16, #tpu.memory_space<vmem>>, vector<16x16xbf16>
    %cst_103 = arith.constant dense<0.000000e+00> : vector<64x16xf32>
    %284 = tpu.matmul %282, %283, %cst_103 {dimension_numbers = #tpu.dot_dimension_numbers<[1], [0], [0], [1], [0, 0, 1, 1], [], []>} : vector<64x16xbf16>, vector<16x16xbf16>, vector<64x16xf32> -> vector<64x16xf32>
    %c0_104 = arith.constant 0 : index
    %c0_105 = arith.constant 0 : index
    %285 = vector.load %arg15[%c0_104, %c0_105] : memref<1x16xf32, #tpu.memory_space<vmem>>, vector<1x16xf32>
    %286 = vector.shape_cast %285 : vector<1x16xf32> to vector<16xf32>
    %287 = vector.shape_cast %286 : vector<16xf32> to vector<1x16xf32>
    %288 = vector.broadcast %287 : vector<1x16xf32> to vector<64x16xf32>
    %289 = arith.addf %284, %288 : vector<64x16xf32>
    %cst_106 = arith.constant 0.000000e+00 : f32
    %290 = vector.broadcast %cst_106 : f32 to vector<64x16xf32>
    %291 = arith.subf %290, %289 : vector<64x16xf32>
    %292 = math.exp %291 : vector<64x16xf32>
    %cst_107 = arith.constant 1.000000e+00 : f32
    %293 = vector.broadcast %cst_107 : f32 to vector<64x16xf32>
    %294 = arith.addf %293, %292 : vector<64x16xf32>
    %cst_108 = arith.constant 1.000000e+00 : f32
    %295 = vector.broadcast %cst_108 : f32 to vector<64x16xf32>
    %296 = arith.divf %295, %294 : vector<64x16xf32>
    %297 = arith.mulf %289, %296 : vector<64x16xf32>
    %298 = arith.truncf %297 : vector<64x16xf32> to vector<64x16xbf16>
    %c0_109 = arith.constant 0 : index
    %c0_110 = arith.constant 0 : index
    %299 = vector.load %arg16[%c0_109, %c0_110] : memref<16x8xbf16, #tpu.memory_space<vmem>>, vector<16x8xbf16>
    %cst_111 = arith.constant dense<0.000000e+00> : vector<64x8xf32>
    %300 = tpu.matmul %298, %299, %cst_111 {dimension_numbers = #tpu.dot_dimension_numbers<[1], [0], [0], [1], [0, 0, 1, 1], [], []>} : vector<64x16xbf16>, vector<16x8xbf16>, vector<64x8xf32> -> vector<64x8xf32>
    %c0_112 = arith.constant 0 : index
    %c0_113 = arith.constant 0 : index
    %301 = vector.load %arg17[%c0_112, %c0_113] : memref<1x8xf32, #tpu.memory_space<vmem>>, vector<1x8xf32>
    %302 = vector.shape_cast %301 : vector<1x8xf32> to vector<8xf32>
    %303 = vector.shape_cast %302 : vector<8xf32> to vector<1x8xf32>
    %304 = vector.broadcast %303 : vector<1x8xf32> to vector<64x8xf32>
    %305 = arith.addf %300, %304 : vector<64x8xf32>
    %306 = tpu.concatenate %104, %305 in 1 : vector<64x64xf32>, vector<64x8xf32> -> vector<64x72xf32>
    %307 = vector.shape_cast %306 : vector<64x72xf32> to vector<8x8x72xf32>
    %c0_114 = arith.constant 0 : index
    %c0_115 = arith.constant 0 : index
    %c0_116 = arith.constant 0 : index
    %c0_117 = arith.constant 0 : index
    %308 = vector.load %arg18[%c0_114, %c0_115, %c0_116, %c0_117] : memref<1x8x8x72xf32, #tpu.memory_space<vmem>>, vector<1x8x8x72xf32>
    %309 = vector.shape_cast %308 : vector<1x8x8x72xf32> to vector<8x8x72xf32>
    %310 = vector.shape_cast %307 : vector<8x8x72xf32> to vector<1x8x8x72xf32>
    tpu.vector_store %arg18[%c0_114, %c0_115, %c0_116, %c0_117], %310 {strides = array<i32>} : memref<1x8x8x72xf32, #tpu.memory_space<vmem>>, vector<1x8x8x72xf32>,
    return
  }
  func.func @transform_0(%arg0: i32) -> (i32, i32, i32, i32) {
    %c0_i32 = arith.constant 0 : i32
    %c0_i32_0 = arith.constant 0 : i32
    %c0_i32_1 = arith.constant 0 : i32
    %c0_i32_2 = arith.constant 0 : i32
    return %arg0, %c0_i32, %c0_i32_0, %c0_i32_1 : i32, i32, i32, i32
  }
  func.func @transform_1(%arg0: i32) -> (i32, i32) {
    %c0_i32 = arith.constant 0 : i32
    %c0_i32_0 = arith.constant 0 : i32
    %c0_i32_1 = arith.constant 0 : i32
    return %c0_i32, %c0_i32_0 : i32, i32
  }
  func.func @transform_2(%arg0: i32) -> (i32, i32) {
    %c0_i32 = arith.constant 0 : i32
    %c0_i32_0 = arith.constant 0 : i32
    %c0_i32_1 = arith.constant 0 : i32
    return %c0_i32, %c0_i32_0 : i32, i32
  }
  func.func @transform_3(%arg0: i32) -> (i32, i32) {
    %c0_i32 = arith.constant 0 : i32
    %c0_i32_0 = arith.constant 0 : i32
    %c0_i32_1 = arith.constant 0 : i32
    return %c0_i32, %c0_i32_0 : i32, i32
  }
  func.func @transform_4(%arg0: i32) -> (i32, i32) {
    %c0_i32 = arith.constant 0 : i32
    %c0_i32_0 = arith.constant 0 : i32
    %c0_i32_1 = arith.constant 0 : i32
    return %c0_i32, %c0_i32_0 : i32, i32
  }
  func.func @transform_5(%arg0: i32) -> (i32, i32) {
    %c0_i32 = arith.constant 0 : i32
    %c0_i32_0 = arith.constant 0 : i32
    %c0_i32_1 = arith.constant 0 : i32
    return %c0_i32, %c0_i32_0 : i32, i32
  }
  func.func @transform_6(%arg0: i32) -> (i32, i32) {
    %c0_i32 = arith.constant 0 : i32
    %c0_i32_0 = arith.constant 0 : i32
    %c0_i32_1 = arith.constant 0 : i32
    return %c0_i32, %c0_i32_0 : i32, i32
  }
  func.func @transform_7(%arg0: i32) -> (i32, i32) {
    %c0_i32 = arith.constant 0 : i32
    %c0_i32_0 = arith.constant 0 : i32
    %c0_i32_1 = arith.constant 0 : i32
    return %c0_i32, %c0_i32_0 : i32, i32
  }
  func.func @transform_8(%arg0: i32) -> (i32, i32) {
    %c0_i32 = arith.constant 0 : i32
    %c0_i32_0 = arith.constant 0 : i32
    %c0_i32_1 = arith.constant 0 : i32
    return %c0_i32, %c0_i32_0 : i32, i32
  }
  func.func @transform_9(%arg0: i32) -> (i32, i32) {
    %c0_i32 = arith.constant 0 : i32
    %c0_i32_0 = arith.constant 0 : i32
    %c0_i32_1 = arith.constant 0 : i32
    return %c0_i32, %c0_i32_0 : i32, i32
  }
  func.func @transform_10(%arg0: i32) -> (i32, i32) {
    %c0_i32 = arith.constant 0 : i32
    %c0_i32_0 = arith.constant 0 : i32
    %c0_i32_1 = arith.constant 0 : i32
    return %c0_i32, %c0_i32_0 : i32, i32
  }
  func.func @transform_11(%arg0: i32) -> (i32, i32) {
    %c0_i32 = arith.constant 0 : i32
    %c0_i32_0 = arith.constant 0 : i32
    %c0_i32_1 = arith.constant 0 : i32
    return %c0_i32, %c0_i32_0 : i32, i32
  }
  func.func @transform_12(%arg0: i32) -> (i32, i32) {
    %c0_i32 = arith.constant 0 : i32
    %c0_i32_0 = arith.constant 0 : i32
    %c0_i32_1 = arith.constant 0 : i32
    return %c0_i32, %c0_i32_0 : i32, i32
  }
  func.func @transform_13(%arg0: i32) -> (i32, i32) {
    %c0_i32 = arith.constant 0 : i32
    %c0_i32_0 = arith.constant 0 : i32
    %c0_i32_1 = arith.constant 0 : i32
    return %c0_i32, %c0_i32_0 : i32, i32
  }
  func.func @transform_14(%arg0: i32) -> (i32, i32) {
    %c0_i32 = arith.constant 0 : i32
    %c0_i32_0 = arith.constant 0 : i32
    %c0_i32_1 = arith.constant 0 : i32
    return %c0_i32, %c0_i32_0 : i32, i32
  }
  func.func @transform_15(%arg0: i32) -> (i32, i32) {
    %c0_i32 = arith.constant 0 : i32
    %c0_i32_0 = arith.constant 0 : i32
    %c0_i32_1 = arith.constant 0 : i32
    return %c0_i32, %c0_i32_0 : i32, i32
  }
  func.func @transform_16(%arg0: i32) -> (i32, i32) {
    %c0_i32 = arith.constant 0 : i32
    %c0_i32_0 = arith.constant 0 : i32
    %c0_i32_1 = arith.constant 0 : i32
    return %c0_i32, %c0_i32_0 : i32, i32
  }
  func.func @transform_17(%arg0: i32) -> (i32, i32, i32, i32) {
    %c0_i32 = arith.constant 0 : i32
    %c0_i32_0 = arith.constant 0 : i32
    %c0_i32_1 = arith.constant 0 : i32
    %c0_i32_2 = arith.constant 0 : i32
    return %arg0, %c0_i32, %c0_i32_0, %c0_i32_1 : i32, i32, i32, i32
  }
}

</mosaic_0001>

<bundles_post_ra>
// kernel: tpu_custom_call.1
= control target key start
LH: loop header
LB: loop body
LE: loop exit
PB: predicated region body
PF: predicated region fallthrough
CT: control target
= control target key end

     0   :  { %s6422_s0 = inlined_call_operand.vmem [shape: f32[2,8,8,16], index: 0, kind: input, shape index: {}]   ;;  %s6423_s1 = inlined_call_operand.vmem [shape: bf16[144,64], index: 1, kind: input, shape index: {}]   ;;  %s6424_s2 = inlined_call_operand.vmem [shape: f32[1,64], index: 2, kind: input, shape index: {}]   ;;  %s6425_s3 = inlined_call_operand.vmem [shape: bf16[576,64], index: 3, kind: input, shape index: {}]   ;;  %s6426_s4 = inlined_call_operand.vmem [shape: f32[1,64], index: 4, kind: input, shape index: {}]   ;;  %s6427_s5 = inlined_call_operand.vmem [shape: bf16[64,64], index: 5, kind: input, shape index: {}]   ;;  %s6428_s6 = inlined_call_operand.vmem [shape: f32[1,64], index: 6, kind: input, shape index: {}]   ;;  %s6429_s7 = inlined_call_operand.vmem [shape: f32[9,16], index: 7, kind: input, shape index: {}]   ;;  %s6430_s8 = inlined_call_operand.vmem [shape: f32[1,16], index: 8, kind: input, shape index: {}]   ;;  %s6431_s9 = inlined_call_operand.vmem [shape: bf16[16,16], index: 9, kind: input, shape index: {}]   ;;  %s6432_s10 = inlined_call_operand.vmem [shape: f32[1,16], index: 10, kind: input, shape index: {}]   ;;  %s6433_s11 = inlined_call_operand.vmem [shape: f32[9,16], index: 11, kind: input, shape index: {}]   ;;  %s6434_s12 = inlined_call_operand.vmem [shape: f32[1,16], index: 12, kind: input, shape index: {}]   ;;  %s6435_s13 = inlined_call_operand.vmem [shape: bf16[16,16], index: 13, kind: input, shape index: {}]   ;;  %s6436_s14 = inlined_call_operand.vmem [shape: f32[1,16], index: 14, kind: input, shape index: {}]   ;;  %s6437_s15 = inlined_call_operand.vmem [shape: bf16[16,8], index: 15, kind: input, shape index: {}]   ;;  %s6438_s16 = inlined_call_operand.vmem [shape: f32[1,8], index: 16, kind: input, shape index: {}]   ;;  %s6439_s17 = inlined_call_operand.hbm [shape: f32[2,8,8,72], index: 17, kind: output, shape index: {}]  }
   0x1   :  { %6449 = sst [smem:[#allocation13_spill]] %s6422_s0 }
   0x2   :  { %6450 = sst [smem:[#allocation14_spill]] %s6423_s1 }
   0x3   :  { %22 = vsyncpa [#allocation6], 0 }
   0x4   :  { %24 = vsyncpa [#allocation6 + $0x1], 0  ;;  %s4580_s24 = smov 0   ;;  %s4582_s25 = smov 0  }
   0x5   :  { %s4584_s26 = smov 0   ;;  %s4586_s27 = smov 0  }
   0x6 LB: > { %6451 = sst [smem:[#allocation8_spill]] %s4464_s24  ;;  %s4601_s28 = sadd.s32 4294967295, %s4476_s27   ;;  %s4476_s27 = sphi %s4586_s27, %s6465_s27   ;;  %s4472_s26 = sphi %s4584_s26, %s6467_s26   ;;  %s4468_s25 = sphi %s4582_s25, %s6469_s25   ;;  %s4464_s24 = sphi %s4580_s24, %s6468_s24  }
   0x7   : > { %6452 = sst [smem:[#allocation9_spill]] %s4472_s26  ;;  %s3808_s29 = sadd.s32 4294967294, %s4476_s27  }
   0x8   : > { %s4605_s0 = sadd.s32 1, %s4476_s27   ;;  %s399_s30 = sadd.s32 1, %s4472_s26 }
   0x9   : > { %6453 = sst [smem:[#allocation10_spill]] %s4605_s0  ;;  %s396_s18 = ssub.s32 %s4476_s27, %s4605_s0 }
   0xa   : > { %p409_p0 = scmp.ne.s32.totalorder %s4472_s26, %s4468_s25  ;;  %p397_p1 = scmp.eq.s32.totalorder %s396_s18, 0 }
   0xb   : > { %p410_p2 = scmp.eq.s32.totalorder %s4601_s28, 1  ;;  %p415_p3 = scmp.ne.s32.totalorder %s4468_s25, %s4464_s24 }
   0xc   : > { %p416_p4 = scmp.eq.s32.totalorder %s3808_s29, 1  ;;  %p3811_p7 = scmp.ge.s32.totalorder %s4476_s27, 1 }
   0xd   : > { %s4616_s19 = scalar_select %p397_p1, %s4472_s26, %s399_s30  }
   0xe   : > { %p4618_p5 = por %p410_p2, %p409_p0  ;;  %p4622_p6 = por %p416_p4, %p415_p3 }
   0xf   : > { %6454 = sst [smem:[#allocation11_spill]] %s4616_s19  ;;  %p490_p8 = scmp.lt.s32.totalorder %s4476_s27, 3 }
  0x10   : > { %s6456_s20 = scalar_select %p4622_p6, 1, 0 }
  0x11   : > { %p491_p9 = pnand %p3811_p7, %p490_p8 }
  0x12   : > { %6457 = sst [smem:[#allocation12_spill]] %s6456_s20  ;;  %p542_p10 = scmp.lt.s32.totalorder (!%p491_p9), %s4601_s28, 1  ;;  %vm556_vm0 = vcmask (!%p491_p9), 130048   ;;  %vm558_vm1 = vcmask (!%p491_p9), 123904   ;;  %v4478_v0 = vmov (!%p491_p9), 0.0   ;;  %v4479_v1 = vmov (!%p491_p9), 0  }
  0x13   : > { %494 = sbr.rel (%p491_p9) target bundleno = 1836 (0x72c), region = 88  ;;  %560 = vst.msk [vmem:[#allocation2 + $0x10] sm:$0xff] (!%p491_p9), %vm556_vm0, %v4478_v0  ;;  %562 = vst.msk [vmem:[#allocation2 + $0x20] sm:$0xff] (!%p491_p9), %vm556_vm0, %v4478_v0  ;;  %978 = vmatprep.subr.bf16.mxu0 (!%p491_p9), %v4479_v1  ;;  %s6458_s30 = sld [smem:[#allocation13_spill]] (!%p491_p9)  ;;  %v3880_v5 = vld [vmem:[%s6429_s7 + $0x1] ss:$0 sm:$0xff] (!%p491_p9) }
  0x14   : > { %561 = vst.msk [vmem:[#allocation2 + $0x18] sm:$0x3] (!%p491_p9), %vm558_vm1, %v4478_v0  ;;  %563 = vst.msk [vmem:[#allocation2 + $0x28] sm:$0x3] (!%p491_p9), %vm558_vm1, %v4478_v0  ;;  %s6459_s0 = sld [smem:[#allocation14_spill]] (!%p491_p9)  ;;  %vm627_vm2 = vcmask (!%p491_p9), 1046528  }
  0x15   : > { %557 = vst.msk [vmem:[#allocation2] sm:$0xff] (!%p491_p9), %vm556_vm0, %v4478_v0  ;;  %564 = vst.msk [vmem:[#allocation2 + $0x30] sm:$0xff] (!%p491_p9), %vm556_vm0, %v4478_v0  ;;  %v3879_v13 = vld [vmem:[%s6429_s7] ss:$0 sm:$0xff] (!%p491_p9)  ;;  %v3881_v15 = vld [vmem:[%s6429_s7 + $0x2] ss:$0 sm:$0xff] (!%p491_p9) }
  0x16   : > { %559 = vst.msk [vmem:[#allocation2 + $0x8] sm:$0x3] (!%p491_p9), %vm558_vm1, %v4478_v0  ;;  %565 = vst.msk [vmem:[#allocation2 + $0x38] sm:$0x3] (!%p491_p9), %vm558_vm1, %v4478_v0  ;;  %vm664_vm3 = vcmask (!%p491_p9), 1045504   ;;  %s4480_s24 = smov (!%p491_p9), 48  }
  0x17   : > { %566 = vst.msk [vmem:[#allocation2 + $0x40] sm:$0xff] (!%p491_p9), %vm556_vm0, %v4478_v0  ;;  %568 = vst.msk [vmem:[#allocation2 + $0x50] sm:$0xff] (!%p491_p9), %vm556_vm0, %v4478_v0  ;;  %s4481_s20 = smov (!%p491_p9), 16   ;;  %s4483_s29 = smov (!%p491_p9), 32   ;;  %vm847_vm4 = vcmask (!%p491_p9), 523264   ;;  %vm829_vm5 = vcmask (!%p491_p9), 261120  }
  0x18   : > { %567 = vst.msk [vmem:[#allocation2 + $0x48] sm:$0x3] (!%p491_p9), %vm558_vm1, %v4478_v0  ;;  %569 = vst.msk [vmem:[#allocation2 + $0x58] sm:$0x3] (!%p491_p9), %vm558_vm1, %v4478_v0  ;;  %s4484_s26 = smov (!%p491_p9), 80   ;;  %s6446_s19 = smov (!%p491_p9), 64  }
  0x19   : > { %570 = vst.msk [vmem:[#allocation2 + $0x60] sm:$0xff] (!%p491_p9), %vm556_vm0, %v4478_v0  ;;  %572 = vst.msk [vmem:[#allocation2 + $0x70] sm:$0xff] (!%p491_p9), %vm556_vm0, %v4478_v0  ;;  %vm838_vm6 = vcmask (!%p491_p9), 392192   ;;  %vm856_vm7 = vcmask (!%p491_p9), 654336   ;;  %vm865_vm8 = vcmask (!%p491_p9), 785408   ;;  %vm874_vm9 = vcmask (!%p491_p9), 916480  }
  0x1a   : > { %571 = vst.msk [vmem:[#allocation2 + $0x68] sm:$0x3] %vm558_vm1, %v4478_v0  ;;  %573 = vst.msk [vmem:[#allocation2 + $0x78] sm:$0x3] %vm558_vm1, %v4478_v0  ;;  %s543_s21 = scalar_select %p542_p10, %s4601_s28, 1  ;;  %v4149_v2 = vld [vmem:[%s6459_s0] sm:$0xff]  }
  0x1b   : > { %574 = vst.msk [vmem:[#allocation2 + $0x80] sm:$0xff] %vm556_vm0, %v4478_v0  ;;  %576 = vst.msk [vmem:[#allocation2 + $0x90] sm:$0xff] %vm556_vm0, %v4478_v0  ;;  %979 = vmatpush1.bf16.msra.mxu0 %v4149_v2  ;;  %v4150_v20 = vld [vmem:[%s6459_s0 + $0x8] sm:$0xff]   ;;  %v4151_v28 = vld [vmem:[%s6459_s0 + $0x10] sm:$0xff]   ;;  %vm1100_vm10 = vcmask 517120   ;;  %vm3723_vm11 = vcmask 588800  }
  0x1c   : > { %575 = vst.msk [vmem:[#allocation2 + $0x88] sm:$0x3] %vm558_vm1, %v4478_v0  ;;  %577 = vst.msk [vmem:[#allocation2 + $0x98] sm:$0x3] %vm558_vm1, %v4478_v0  ;;  %s3922_s22 = sshll.u32 %s543_s21, 6  ;;  %v4725_v10 = vld [vmem:[#allocation2] sm:$0xff]  ;;  %980 = vmatprep.subr.bf16.mxu0 %v4479_v1 }
  0x1d   : > { %2790 = vst.msk [vmem:[#allocation4] sm:$0xff] %vm556_vm0, %v4478_v0  ;;  %2792 = vst.msk [vmem:[#allocation4 + $0x10] sm:$0xff] %vm556_vm0, %v4478_v0  ;;  %s546_s18 = scalar_lea.vmem %s6458_s30, %s3922_s22  ;;  %v588_v11 = vld [vmem:[#allocation2 + $0x8] sm:$0x3]  ;;  %v2068_v14 = vmul.f32 %v3880_v5, %v4725_v10  ;;  %v2145_v18 = vmul.f32 %v3881_v15, %v4725_v10  ;;  %v628_v21 = vrot.slane %v4725_v10, 1  ;;  %v2047_v24 = vmul.f32 %v3879_v13, %v4725_v10  ;;  %v4152_v42 = vld [vmem:[%s6459_s0 + $0x18] sm:$0xff]  }
  0x1e   : > { %2791 = vst.msk [vmem:[#allocation4 + $0x8] sm:$0x3] %vm558_vm1, %v4478_v0  ;;  %2793 = vst.msk [vmem:[#allocation4 + $0x18] sm:$0x3] %vm558_vm1, %v4478_v0  ;;  %v548_v3 = vld [vmem:[%s546_s18] sm:$0xff]  ;;  %v549_v4 = vld [vmem:[%s546_s18 + $0x8] sm:$0xff]  ;;  %v2069_v17 = vmul.f32 %v3880_v5, %v588_v11  ;;  %v2146_v19 = vmul.f32 %v3881_v15, %v588_v11 }
  0x1f   : > { %2794 = vst.msk [vmem:[#allocation4 + $0x20] sm:$0xff] %vm556_vm0, %v4478_v0  ;;  %2796 = vst.msk [vmem:[#allocation4 + $0x30] sm:$0xff] %vm556_vm0, %v4478_v0  ;;  %v550_v6 = vld [vmem:[%s546_s18 + $0x10] sm:$0xff]  ;;  %v551_v7 = vld [vmem:[%s546_s18 + $0x18] sm:$0xff]  ;;  %v629_v22 = vrot.slane %v588_v11, 1  ;;  %v2100_v23 = vrot.slane %v2068_v14, 1  ;;  %981 = vmatpush1.bf16.msra.mxu0 %v4150_v20 }
  0x20   : > { %2795 = vst.msk [vmem:[#allocation4 + $0x28] sm:$0x3] %vm558_vm1, %v4478_v0  ;;  %2797 = vst.msk [vmem:[#allocation4 + $0x38] sm:$0x3] %vm558_vm1, %v4478_v0  ;;  %v552_v8 = vld [vmem:[%s546_s18 + $0x20] sm:$0xff]  ;;  %v553_v9 = vld [vmem:[%s546_s18 + $0x28] sm:$0xff]  ;;  %982 = vmatprep.subr.bf16.mxu0 %v4479_v1 }
  0x21   : > { %2798 = vst.msk [vmem:[#allocation4 + $0x40] sm:$0xff] %vm556_vm0, %v4478_v0  ;;  %2800 = vst.msk [vmem:[#allocation4 + $0x50] sm:$0xff] %vm556_vm0, %v4478_v0  ;;  %v554_v12 = vld [vmem:[%s546_s18 + $0x30] sm:$0xff]  ;;  %v555_v16 = vld [vmem:[%s546_s18 + $0x38] sm:$0xff]  ;;  %v2101_v25 = vrot.slane %v2069_v17, 1  ;;  %v2177_v26 = vrot.slane %v2145_v18, 2  ;;  %v630_v35 = vsel %vm627_vm2, %v628_v21, %v629_v22 }
  0x22   : > { %2799 = vst.msk [vmem:[#allocation4 + $0x48] sm:$0x3] %vm558_vm1, %v4478_v0  ;;  %2801 = vst.msk [vmem:[#allocation4 + $0x58] sm:$0x3] %vm558_vm1, %v4478_v0  ;;  %v2178_v27 = vrot.slane %v2146_v19, 2  ;;  %v665_v40 = vrot.slane %v4725_v10, 2 }
  0x23   : > { %2802 = vst.msk [vmem:[#allocation4 + $0x60] sm:$0xff] %vm556_vm0, %v4478_v0  ;;  %2804 = vst.msk [vmem:[#allocation4 + $0x70] sm:$0xff] %vm556_vm0, %v4478_v0  ;;  %v2102_v32 = vsel %vm627_vm2, %v2100_v23, %v2101_v25  ;;  %v666_v41 = vrot.slane %v588_v11, 2  ;;  %983 = vmatpush1.bf16.msra.mxu0 %v4151_v28  ;;  %v4153_v51 = vld [vmem:[%s6459_s0 + $0x20] sm:$0xff]   ;;  %s4482_s21 = smov 96   ;;  %v4155_v17 = vld [vmem:[%s6459_s0 + $0x30] sm:$0xff]  }
  0x24   : > { %2803 = vst.msk [vmem:[#allocation4 + $0x68] sm:$0x3] %vm558_vm1, %v4478_v0  ;;  %2805 = vst.msk [vmem:[#allocation4 + $0x78] sm:$0x3] %vm558_vm1, %v4478_v0  ;;  %v2179_v33 = vsel %vm664_vm3, %v2177_v26, %v2178_v27  ;;  %v2132_v39 = vadd.f32 %v2102_v32, %v2047_v24  ;;  %984 = vmatprep.subr.bf16.mxu0 %v4479_v1  ;;  %v4799_v19 = vld [vmem:[#allocation2 + $0x90] sm:$0xff]  ;;  %s4486_s30 = smov 112  }
  0x25   : > { %2806 = vst.msk [vmem:[#allocation4 + $0x80] sm:$0xff] %vm556_vm0, %v4478_v0  ;;  %2808 = vst.msk [vmem:[#allocation4 + $0x90] sm:$0xff] %vm556_vm0, %v4478_v0  ;;  %v667_v53 = vsel %vm664_vm3, %v665_v40, %v666_v41  ;;  %v4801_v20 = vld [vmem:[#allocation2 + $0x98] sm:$0x3]  ;;  %v731_v27 = vrot.slane %v4799_v19, 2  ;;  %v4157_v41 = vld [vmem:[%s6459_s0 + $0x40] sm:$0xff]  }
  0x26   : > { %2807 = vst.msk [vmem:[#allocation4 + $0x88] sm:$0x3] %vm558_vm1, %v4478_v0  ;;  %2809 = vst.msk [vmem:[#allocation4 + $0x98] sm:$0x3] %vm558_vm1, %v4478_v0  ;;  %v4766_v49 = vadd.f32 %v2179_v33, %v2132_v39  ;;  %v732_v28 = vrot.slane %v4801_v20, 2  ;;  %s539_s18 = sand.u32 1, %s4468_s25  }
  0x27   : > { %579 = vst.msk [vmem:[#allocation2 + $0x11] sm:$0xff] %vm556_vm0, %v548_v3  ;;  %580 = vst.msk [vmem:[#allocation2 + $0x21] sm:$0xff] %vm556_vm0, %v549_v4  ;;  %985 = vmatpush1.bf16.msra.mxu0 %v4152_v42  ;;  %s4487_s22 = smov [#allocation5]  }
  0x28   : > { %581 = vst.msk [vmem:[#allocation2 + $0x31] sm:$0xff] %vm556_vm0, %v550_v6  ;;  %582 = vst.msk [vmem:[#allocation2 + $0x41] sm:$0xff] %vm556_vm0, %v551_v7  ;;  %986 = vmatprep.subr.bf16.mxu0 %v4479_v1  ;;  %v4154_v6 = vld [vmem:[%s6459_s0 + $0x28] sm:$0xff]  }
  0x29   : > { %583 = vst.msk [vmem:[#allocation2 + $0x51] sm:$0xff] %vm556_vm0, %v552_v8  ;;  %584 = vst.msk [vmem:[#allocation2 + $0x61] sm:$0xff] %vm556_vm0, %v553_v9 }
  0x2a   : > { %585 = vst.msk [vmem:[#allocation2 + $0x71] sm:$0xff] %vm556_vm0, %v554_v12  ;;  %586 = vst.msk [vmem:[#allocation2 + $0x81] sm:$0xff] %vm556_vm0, %v555_v16 }
  0x2b   : > { %987 = vmatpush1.bf16.msra.mxu0 %v4153_v51  ;;  %v726_v51 = vrot.slane %v4799_v19, 1  ;;  %1099 = vst.msk [vmem:[#allocation3] sm:$0xff] %vm847_vm4, %v4478_v0  ;;  %1102 = vst.msk [vmem:[#allocation3 + $0x10] sm:$0xff] %vm847_vm4, %v4478_v0 }
  0x2c   : > { %988 = vmatprep.subr.bf16.mxu0 %v4479_v1  ;;  %1104 = vst.msk [vmem:[#allocation3 + $0x20] sm:$0xff] %vm847_vm4, %v4478_v0  ;;  %1106 = vst.msk [vmem:[#allocation3 + $0x30] sm:$0xff] %vm847_vm4, %v4478_v0 }
  0x2d   : > { %1108 = vst.msk [vmem:[#allocation3 + $0x40] sm:$0xff] %vm847_vm4, %v4478_v0  ;;  %1110 = vst.msk [vmem:[#allocation3 + $0x50] sm:$0xff] %vm847_vm4, %v4478_v0 }
  0x2e   : > { %v4750_v29 = vld [vmem:[#allocation2 + $0x10] sm:$0xff]  ;;  %v591_v30 = vld [vmem:[#allocation2 + $0x20] sm:$0xff]  ;;  %v590_v31 = vld [vmem:[#allocation2 + $0x18] sm:$0x3]  ;;  %1112 = vst.msk [vmem:[#allocation3 + $0x60] sm:$0xff] %vm847_vm4, %v4478_v0 }
  0x2f   : > { %v701_v34 = vpack.c.bf16 %v591_v30, %v4750_v29  ;;  %v631_v36 = vrot.slane %v4750_v29, 1  ;;  %v632_v37 = vrot.slane %v590_v31, 1  ;;  %v592_v38 = vld [vmem:[#allocation2 + $0x28] sm:$0x3]  ;;  %v593_v44 = vld [vmem:[#allocation2 + $0x30] sm:$0xff]  ;;  %v4763_v46 = vld [vmem:[#allocation2 + $0x40] sm:$0xff]  ;;  %989 = vmatpush1.bf16.msra.mxu0 %v4154_v6 }
  0x30   : > { %v634_v47 = vrot.slane %v591_v30, 1  ;;  %v635_v48 = vrot.slane %v592_v38, 1  ;;  %v594_v50 = vld [vmem:[#allocation2 + $0x38] sm:$0x3]  ;;  %v4772_v52 = vpack.c.bf16 %v593_v44, %v591_v30  ;;  %v668_v54 = vrot.slane %v4750_v29, 2  ;;  %v4791_v13 = vld [vmem:[#allocation2 + $0x50] sm:$0xff]  ;;  %990 = vmatprep.subr.bf16.mxu0 %v4479_v1 }
  0x31   : > { %764 = vrot.lane.b32.xlu1 %v701_v34, %s4480_s24  ;;  %v633_v43 = vsel %vm627_vm2, %v631_v36, %v632_v37  ;;  %v669_v55 = vrot.slane %v590_v31, 2  ;;  %v702_v56 = vpack.c.bf16 %v4763_v46, %v593_v44  ;;  %v671_v57 = vrot.slane %v591_v30, 2  ;;  %v596_v4 = vld [vmem:[#allocation2 + $0x48] sm:$0x3]  ;;  %v598_v14 = vld [vmem:[#allocation2 + $0x58] sm:$0x3] }
  0x32   : > { %v660_v45 = vpack.c.bf16 %v633_v43, %v630_v35  ;;  %v672_v59 = vrot.slane %v592_v38, 2  ;;  %v637_v60 = vrot.slane %v593_v44, 1  ;;  %v638_v61 = vrot.slane %v594_v50, 1  ;;  %v4808_v26 = vld [vmem:[#allocation2 + $0x80] sm:$0xff]  ;;  %v4156_v30 = vld [vmem:[%s6459_s0 + $0x38] sm:$0xff]   ;;  %v4825_v39 = vld [vmem:[#allocation2 + $0x70] sm:$0xff] }
  0x33   : > { %v670_v58 = vsel %vm664_vm3, %v668_v54, %v669_v55  ;;  %v636_v62 = vsel %vm627_vm2, %v634_v47, %v635_v48  ;;  %v674_v2 = vrot.slane %v593_v44, 2  ;;  %v675_v3 = vrot.slane %v594_v50, 2  ;;  %991 = vmatpush1.bf16.msra.mxu0 %v4155_v17  ;;  %v4816_v31 = vld [vmem:[#allocation2 + $0x60] sm:$0xff]  ;;  %v4818_v32 = vld [vmem:[#allocation2 + $0x88] sm:$0x3]  ;;  %1114 = vst.msk [vmem:[#allocation3 + $0x70] sm:$0xff] %vm847_vm4, %v4478_v0 }
  0x34   : > { %740 = vrot.lane.b32.xlu0 %v660_v45, %s4481_s20  ;;  %v697_v63 = vpack.c.bf16 %v670_v58, %v667_v53  ;;  %v673_v5 = vsel %vm664_vm3, %v671_v57, %v672_v59  ;;  %v711_v9 = vpack.c.bf16 %v636_v62, %v633_v43  ;;  %v639_v11 = vsel %vm627_vm2, %v637_v60, %v638_v61  ;;  %v600_v37 = vld [vmem:[#allocation2 + $0x68] sm:$0x3]  ;;  %v602_v40 = vld [vmem:[#allocation2 + $0x78] sm:$0x3] }
  0x35   : > { %800 = vrot.lane.b32.xlu1 %v4772_v52, %s4482_s21  ;;  %v719_v7 = vpack.c.bf16 %v673_v5, %v670_v58  ;;  %v676_v8 = vsel %vm664_vm3, %v674_v2, %v675_v3  ;;  %v677_v15 = vrot.slane %v4763_v46, 2  ;;  %v678_v16 = vrot.slane %v596_v4, 2  ;;  %992 = vmatprep.subr.bf16.mxu0 %v4479_v1  ;;  %1116 = vst.msk [vmem:[#allocation3 + $0x80] sm:$0xff] %vm847_vm4, %v4478_v0 }
  0x36   : > { %v698_v12 = vpack.c.bf16 %v676_v8, %v673_v5  ;;  %v661_v18 = vpack.c.bf16 %v639_v11, %v636_v62  ;;  %v640_v21 = vrot.slane %v4763_v46, 1  ;;  %v641_v22 = vrot.slane %v596_v4, 1  ;;  %1118 = vst.msk [vmem:[#allocation3 + $0x90] sm:$0xff] %vm847_vm4, %v4478_v0 }
  0x37   : > { %v679_v23 = vsel %vm664_vm3, %v677_v15, %v678_v16  ;;  %v643_v24 = vrot.slane %v4791_v13, 1  ;;  %v644_v25 = vrot.slane %v598_v14, 1  ;;  %v680_v35 = vrot.slane %v4791_v13, 2  ;;  %993 = vmatpush1.bf16.msra.mxu0 %v4156_v30  ;;  %1103 = vst.msk [vmem:[#allocation3 + $0x18] sm:$0x3] %vm1100_vm10, %v4478_v0 }
  0x38   : > { %752 = vrot.lane.b32.xlu0 %v697_v63, %s4483_s29  ;;  %3825 = vmatprep.mubr.msk.bf16.mxu0 %vm556_vm0, %v698_v12  ;;  %v642_v33 = vsel %vm627_vm2, %v640_v21, %v641_v22  ;;  %v720_v34 = vpack.c.bf16 %v679_v23, %v676_v8  ;;  %v681_v36 = vrot.slane %v598_v14, 2  ;;  %v715_v43 = vrot.slane %v4808_v26, 2  ;;  %1101 = vst.msk [vmem:[#allocation3 + $0x8] sm:$0x3] %vm1100_vm10, %v4478_v0 }
  0x39   : > { %766 = vrot.lane.b32.xlu1 %v702_v56, %s4480_s24  ;;  %v645_v38 = vsel %vm627_vm2, %v643_v24, %v644_v25  ;;  %v712_v42 = vpack.c.bf16 %v642_v33, %v639_v11  ;;  %v716_v44 = vrot.slane %v4818_v32, 2  ;;  %v4834_v45 = vsel %vm664_vm3, %v731_v27, %v732_v28  ;;  %994 = vmatprep.subr.bf16.mxu0 %v4479_v1 }
  0x3a   : > { %v662_v47 = vpack.c.bf16 %v645_v38, %v642_v33  ;;  %v682_v48 = vsel %vm664_vm3, %v680_v35, %v681_v36  ;;  %v646_v50 = vrot.slane %v4816_v31, 1  ;;  %v647_v53 = vrot.slane %v600_v37, 1  ;;  %1105 = vst.msk [vmem:[#allocation3 + $0x28] sm:$0x3] %vm1100_vm10, %v4478_v0  ;;  %1107 = vst.msk [vmem:[#allocation3 + $0x38] sm:$0x3] %vm1100_vm10, %v4478_v0 }
  0x3b   : > { %v683_v54 = vrot.slane %v4816_v31, 2  ;;  %v684_v55 = vrot.slane %v600_v37, 2  ;;  %v4843_v56 = vsel %vm664_vm3, %v715_v43, %v716_v44  ;;  %v649_v57 = vrot.slane %v4825_v39, 1  ;;  %995 = vmatpush1.bf16.msra.mxu0 %v4157_v41  ;;  %1109 = vst.msk [vmem:[#allocation3 + $0x48] sm:$0x3] %vm1100_vm10, %v4478_v0 }
  0x3c   : > { %788 = vrot.lane.b32.xlu0 %v719_v7, %s4484_s26  ;;  %v650_v58 = vrot.slane %v602_v40, 1  ;;  %v735_v1 = vpack.c.bf16 %v4834_v45, %v4843_v56  ;;  %v4851_v59 = vpack.c.bf16 %v4791_v13, %v4763_v46  ;;  %v4853_v60 = vpack.c.bf16 %v682_v48, %v679_v23  ;;  %1111 = vst.msk [vmem:[#allocation3 + $0x58] sm:$0x3] %vm1100_vm10, %v4478_v0 }
  0x3d   : > { %776 = vrot.lane.b32.xlu1 %v711_v9, %s6446_s19  ;;  %v686_v61 = vrot.slane %v4825_v39, 2  ;;  %v687_v62 = vrot.slane %v602_v40, 2  ;;  %v707_v63 = vrot.slane %v4808_v26, 1  ;;  %v708_v2 = vrot.slane %v4818_v32, 1  ;;  %1113 = vst.msk [vmem:[#allocation3 + $0x68] sm:$0x3] %vm1100_vm10, %v4478_v0 }
  0x3e   : > { %v727_v3 = vrot.slane %v4801_v20, 1  ;;  %v648_v4 = vsel %vm627_vm2, %v646_v50, %v647_v53  ;;  %v703_v5 = vpack.c.bf16 %v4816_v31, %v4791_v13  ;;  %v685_v6 = vsel %vm664_vm3, %v683_v54, %v684_v55  ;;  %1115 = vst.msk [vmem:[#allocation3 + $0x78] sm:$0x3] %vm1100_vm10, %v4478_v0  ;;  %1117 = vst.msk [vmem:[#allocation3 + $0x88] sm:$0x3] %vm1100_vm10, %v4478_v0 }
  0x3f   : > { %v713_v46 = vpack.c.bf16 %v648_v4, %v645_v38  ;;  %v4892_v7 = vpack.c.bf16 %v4825_v39, %v4816_v31  ;;  %v651_v8 = vsel %vm627_vm2, %v649_v57, %v650_v58  ;;  %v721_v9 = vpack.c.bf16 %v685_v6, %v682_v48  ;;  %1119 = vst.msk [vmem:[#allocation3 + $0x98] sm:$0x3] %vm1100_vm10, %v4478_v0  ;;  %v4161_v0 = vld [vmem:[%s6425_s3 + $0x118] sm:$0xff]  }
  0x40   : > { %809 = vrot.lane.b32.xlu0 %v661_v18, %s4486_s30  ;;  %v663_v11 = vpack.c.bf16 %v651_v8, %v648_v4  ;;  %v704_v13 = vpack.c.bf16 %v4808_v26, %v4825_v39  ;;  %v709_v15 = vsel %vm627_vm2, %v707_v63, %v708_v2  ;;  %v728_v17 = vsel %vm627_vm2, %v726_v51, %v727_v3 }
  0x41   : > { %742 = vrot.lane.b32.xlu1 %v661_v18, %s4481_s20  ;;  %v714_v18 = vpack.c.bf16 %v709_v15, %v651_v8  ;;  %v730_v20 = vpack.c.bf16 %v728_v17, %v709_v15  ;;  %v723_v21 = vpack.c.bf16 %v4799_v19, %v4808_v26  ;;  %v607_v24 = vpack.c.bf16 %v4750_v29, %v4725_v10 }
  0x44   : > { %754 = vrot.lane.b32.xlu0 %v698_v12, %s4483_s29  ;;  %v688_v12 = vsel %vm664_vm3, %v686_v61, %v687_v62 }
  0x45   : > { %790 = vrot.lane.b32.xlu1 %v720_v34, %s4484_s26  ;;  %v700_v14 = vpack.c.bf16 %v688_v12, %v685_v6  ;;  %v722_v16 = vpack.c.bf16 %v4843_v56, %v688_v12 }
  0x48   : > { %778 = vrot.lane.b32.xlu0 %v712_v42, %s6446_s19 }
  0x49   : > { %811 = vrot.lane.b32.xlu1 %v662_v47, %s4486_s30 }
  0x4c   : > { %802 = vrot.lane.b32.xlu0 %v4851_v59, %s4482_s21 }
  0x4d   : > { %756 = vrot.lane.b32.xlu1 %v4853_v60, %s4483_s29 }
  0x50   : > { %744 = vrot.lane.b32.xlu0 %v662_v47, %s4481_s20 }
  0x51   : > { %780 = vrot.lane.b32.xlu1 %v713_v46, %s6446_s19 }
  0x54   : > { %768 = vrot.lane.b32.xlu0 %v703_v5, %s4480_s24 }
  0x55   : > { %804 = vrot.lane.b32.xlu1 %v4892_v7, %s4482_s21 }
  0x58   : > { %792 = vrot.lane.b32.xlu0 %v721_v9, %s4484_s26 }
  0x59   : > { %746 = vrot.lane.b32.xlu1 %v663_v11, %s4481_s20  ;;  %s3812_s20 = sshll.u32 %s539_s18, 6 }
  0x5c   : > { %813 = vrot.lane.b32.xlu0 %v663_v11, %s4486_s30 }
  0x5d   : > { %770 = vrot.lane.b32.xlu1 %v704_v13, %s4480_s24  ;;  %s4418_s24 = sshll.u32 %s4487_s22, 4  ;;  %s4419_s24 = int_to_ptr.vmem [resolvable:$false] %s4418_s24 }
  0x60   : > { %758 = vrot.lane.b32.xlu0 %v700_v14, %s4483_s29 }
  0x61   : > { %794 = vrot.lane.b32.xlu1 %v722_v16, %s4484_s26 }
  0x64   : > { %782 = vrot.lane.b32.xlu0 %v714_v18, %s6446_s19  ;;  %v4160_v18 = vld [vmem:[%s6425_s3 + $0x110] sm:$0xff]   ;;  %s6339_s19 = scalar_lea.vmem [#allocation5], %s3812_s20  ;;  %s4420_s20 = scalar_lea.vmem %s4419_s24, 2048 }
  0x65   : > { %815 = vrot.lane.b32.xlu1 %v730_v20, %s4486_s30  ;;  %v4162_v20 = vld [vmem:[%s6425_s3 + $0x40] sm:$0xff]   ;;  %s3746_s29 = sshll.u32 %s6339_s19, 4  ;;  %s6372_s29 = int_to_ptr.vmem [resolvable:$true] %s3746_s29 }
  0x66   : > { %3924 = vmatprep.subr.bf16.mxu1 %v4162_v20  ;;  %s4414_s30 = scalar_lea.vmem %s6372_s29, 1024  ;;  %p4421_p0 = scmp.lt.s32.totalorder %s6372_s29, %s4419_s24 }
  0x67   : > { %p4415_p11 = scmp.ne.s32.totalorder %s6372_s29, %s4414_s30  ;;  %p4422_p1 = scmp.lt.s32.totalorder %s4420_s20, %s4414_s30 }
  0x68   : > { %806 = vrot.lane.b32.xlu0 %v723_v21, %s4482_s21  ;;  %v4163_v21 = vld [vmem:[%s6425_s3] sm:$0xff]   ;;  %s6460_s21 = smov 64  }
  0x69   : > { %3925 = vmatpush3.bf16.msra.mxu1 %v4163_v21  ;;  %p4416_p12 = pnand %p4415_p11, %p4618_p5  ;;  %p4423_p2 = por %p4422_p1, %p4421_p0 }
  0x6b   : > { %p4417_p13 = pneg %p4416_p12 }
  0x6d   : > { %p4424_p3 = pnand %p4423_p2, %p4417_p13 }
  0xa3   : > { %v765_v22 = vpop.permute.xlu1 %764 }
  0xa6   : > { %v741_v23 = vpop.permute.xlu0 %740 }
  0xa7   : > { %v801_v25 = vpop.permute.xlu1 %800  ;;  %v819_v28 = vsel %vm556_vm0, %v607_v24, %v741_v23  ;;  %v4165_v23 = vld [vmem:[%s6425_s3 + $0x8] sm:$0xff]   ;;  %v4166_v24 = vld [vmem:[%s6425_s3 + $0x50] sm:$0xff]  }
  0xaa   : > { %v753_v27 = vpop.permute.xlu0 %752 }
  0xab   : > { %v767_v30 = vpop.permute.xlu1 %766  ;;  %v831_v31 = vsel %vm829_vm5, %v819_v28, %v753_v27  ;;  %v4168_v27 = vld [vmem:[%s6425_s3 + $0x58] sm:$0xff]  }
  0xac   : > { %v840_v26 = vsel %vm838_vm6, %v831_v31, %v765_v22  ;;  %v4164_v22 = vld [vmem:[%s6425_s3 + $0x48] sm:$0xff]   ;;  %v4169_v28 = vld [vmem:[%s6425_s3 + $0x18] sm:$0xff]   ;;  %v4171_v31 = vld [vmem:[%s6425_s3 + $0x20] sm:$0xff]  }
  0xad   : > { %3926 = vmatprep.subr.bf16.mxu1 %v4164_v22 }
  0xae   : > { %v789_v32 = vpop.permute.xlu0 %788  ;;  %3927 = vmatpush3.bf16.msra.mxu1 %v4165_v23 }
  0xaf   : > { %v777_v19 = vpop.permute.xlu1 %776  ;;  %3928 = vmatprep.subr.bf16.mxu1 %v4166_v24 }
  0xb0   : > { %v849_v33 = vsel %vm847_vm4, %v840_v26, %v777_v19  ;;  %v4173_v19 = vld [vmem:[%s6425_s3 + $0x28] sm:$0xff]   ;;  %v4174_v26 = vld [vmem:[%s6425_s3 + $0x70] sm:$0xff]  }
  0xb1   : > { %v858_v10 = vsel %vm856_vm7, %v849_v33, %v789_v32  ;;  %v4172_v32 = vld [vmem:[%s6425_s3 + $0x68] sm:$0xff]   ;;  %v4175_v33 = vld [vmem:[%s6425_s3 + $0x30] sm:$0xff]  }
  0xb2   : > { %v810_v29 = vpop.permute.xlu0 %809  ;;  %v867_v34 = vsel %vm865_vm8, %v858_v10, %v801_v25  ;;  %v4167_v25 = vld [vmem:[%s6425_s3 + $0x10] sm:$0xff]   ;;  %v4176_v10 = vld [vmem:[%s6425_s3 + $0x78] sm:$0xff]  }
  0xb3   : > { %v876_v35 = vsel %vm874_vm9, %v867_v34, %v810_v29  ;;  %v743_v36 = vpop.permute.xlu1 %742  ;;  %3929 = vmatpush3.bf16.msra.mxu1 %v4167_v25  ;;  %v5025_v29 = vld [vmem:[%s6424_s2] ss:$0 sm:$0xff]  ;;  %v4177_v34 = vld [vmem:[%s6425_s3 + $0x38] sm:$0xff]  }
  0xb4   : > { %1011 = vmatmul.mubr.bf16.vlgmr.msra.gmra.mrb[0].mxu0 %v876_v35  ;;  %v822_v37 = vsel %vm556_vm0, %v4772_v52, %v743_v36  ;;  %3930 = vmatprep.subr.bf16.mxu1 %v4168_v27 }
  0xb5   : > { %3826 = vmatprep.mubr.msk.bf16.mxu0 %vm556_vm0, %v4853_v60 }
  0xb6   : > { %v755_v38 = vpop.permute.xlu0 %754 }
  0xb7   : > { %v833_v39 = vsel %vm829_vm5, %v822_v37, %v755_v38  ;;  %v791_v40 = vpop.permute.xlu1 %790  ;;  %3931 = vmatpush3.bf16.msra.mxu1 %v4169_v28 }
  0xb8   : > { %v842_v41 = vsel %vm838_vm6, %v833_v39, %v767_v30  ;;  %v4170_v30 = vld [vmem:[%s6425_s3 + $0x60] sm:$0xff]  }
  0xb9   : > { %3932 = vmatprep.subr.bf16.mxu1 %v4170_v30 }
  0xba   : > { %v779_v42 = vpop.permute.xlu0 %778 }
  0xbb   : > { %v851_v43 = vsel %vm847_vm4, %v842_v41, %v779_v42  ;;  %v812_v44 = vpop.permute.xlu1 %811  ;;  %3933 = vmatpush3.bf16.msra.mxu1 %v4171_v31 }
  0xbc   : > { %v860_v47 = vsel %vm856_vm7, %v851_v43, %v791_v40  ;;  %3934 = vmatprep.subr.bf16.mxu1 %v4172_v32 }
  0xbe   : > { %v803_v48 = vpop.permute.xlu0 %802 }
  0xbf   : > { %v869_v50 = vsel %vm865_vm8, %v860_v47, %v803_v48  ;;  %v757_v51 = vpop.permute.xlu1 %756  ;;  %3935 = vmatpush3.bf16.msra.mxu1 %v4173_v19 }
  0xc0   : > { %v879_v52 = vsel %vm874_vm9, %v869_v50, %v812_v44  ;;  %3936 = vmatprep.subr.bf16.mxu1 %v4174_v26 }
  0xc1   : > { %1019 = vmatmul.mubr.bf16.gmra.mrb[4].mxu0 %v879_v52 }
  0xc2   : > { %v745_v53 = vpop.permute.xlu0 %744  ;;  %3827 = vmatprep.mubr.msk.bf16.mxu0 %vm556_vm0, %v700_v14 }
  0xc3   : > { %v825_v54 = vsel %vm556_vm0, %v4851_v59, %v745_v53  ;;  %v781_v55 = vpop.permute.xlu1 %780  ;;  %3937 = vmatpush3.bf16.msra.mxu1 %v4175_v33 }
  0xc4   : > { %v835_v57 = vsel %vm829_vm5, %v825_v54, %v757_v51  ;;  %3938 = vmatprep.subr.bf16.mxu1 %v4176_v10 }
  0xc6   : > { %v769_v58 = vpop.permute.xlu0 %768 }
  0xc7   : > { %v844_v60 = vsel %vm838_vm6, %v835_v57, %v769_v58  ;;  %v805_v61 = vpop.permute.xlu1 %804  ;;  %3939 = vmatpush3.bf16.msra.mxu1 %v4177_v34 }
  0xc8   : > { %v853_v62 = vsel %vm847_vm4, %v844_v60, %v781_v55 }
  0xca   : > { %v793_v63 = vpop.permute.xlu0 %792 }
  0xcb   : > { %v862_v2 = vsel %vm856_vm7, %v853_v62, %v793_v63  ;;  %v747_v3 = vpop.permute.xlu1 %746 }
  0xcc   : > { %v871_v4 = vsel %vm865_vm8, %v862_v2, %v805_v61  ;;  %v828_v59 = vsel %vm556_vm0, %v4892_v7, %v747_v3  ;;  %v4159_v7 = vld [vmem:[%s6425_s3 + $0x108] sm:$0xff]  }
  0xce   : > { %v814_v46 = vpop.permute.xlu0 %813 }
  0xcf   : > { %v882_v5 = vsel %vm874_vm9, %v871_v4, %v814_v46  ;;  %v771_v6 = vpop.permute.xlu1 %770 }
  0xd0   : > { %1027 = vmatmul.mubr.bf16.gmra.mrb[8].mxu0 %v882_v5 }
  0xd1   : > { %3828 = vmatprep.mubr.msk.bf16.mxu0 %vm556_vm0, %v735_v1  ;;  %v4158_v1 = vld [vmem:[%s6425_s3 + $0x100] sm:$0xff]  }
  0xd2   : > { %v759_v8 = vpop.permute.xlu0 %758  ;;  %4035 = vmatprep.subr.bf16.mxu0 %v4158_v1 }
  0xd3   : > { %v837_v9 = vsel %vm829_vm5, %v828_v59, %v759_v8  ;;  %v795_v11 = vpop.permute.xlu1 %794  ;;  %4036 = vmatpush3.bf16.msra.mxu0 %v4158_v1 }
  0xd4   : > { %v846_v12 = vsel %vm838_vm6, %v837_v9, %v771_v6  ;;  %4037 = vmatprep.subr.bf16.mxu0 %v4159_v7 }
  0xd6   : > { %v783_v13 = vpop.permute.xlu0 %782 }
  0xd7   : > { %v855_v14 = vsel %vm847_vm4, %v846_v12, %v783_v13  ;;  %v816_v15 = vpop.permute.xlu1 %815  ;;  %4038 = vmatpush3.bf16.msra.mxu0 %v4159_v7 }
  0xd8   : > { %v864_v16 = vsel %vm856_vm7, %v855_v14, %v795_v11  ;;  %4039 = vmatprep.subr.bf16.mxu0 %v4160_v18 }
  0xda   : > { %v807_v17 = vpop.permute.xlu0 %806 }
  0xdb   : > { %v873_v45 = vsel %vm865_vm8, %v864_v16, %v807_v17  ;;  %4040 = vmatpush3.bf16.msra.mxu0 %v4160_v18 }
  0xdc   : > { %v885_v56 = vsel %vm874_vm9, %v873_v45, %v816_v15  ;;  %4041 = vmatprep.subr.bf16.mxu0 %v4161_v0  ;;  %v5049_v45 = vld [vmem:[#allocation3] sm:$0xff] }
  0xdd   : > { %1035 = vmatmul.mubr.bf16.gmra.mrb[12].mxu0 %v885_v56  ;;  %v1130_v56 = vld [vmem:[#allocation3 + $0x8] sm:$0x3]  ;;  %v1169_v18 = vrot.slane %v5049_v45, 1  ;;  %v1205_v20 = vrot.slane %v5049_v45, 2 }
  0xde   : > { %v1206_v21 = vrot.slane %v1130_v56, 2 }
  0xdf   : > { %4042 = vmatpush3.bf16.msra.mxu0 %v4161_v0  ;;  %v1170_v0 = vrot.slane %v1130_v56, 1 }
  0xe1   : > { %v1171_v24 = vsel %vm627_vm2, %v1169_v18, %v1170_v0 }
 0x187   : > { %v1012_v35 = vpop.f32.mrb[0].mxu0 }
 0x188   : > { %v1013_v36 = vadd.f32 %v5025_v29, %v1012_v35  ;;  %v1014_v37 = vpop.f32.mrb[1].mxu0 }
 0x189   : > { %v1015_v38 = vpop.f32.mrb[2].mxu0 }
 0x18a   : > { %v1043_v39 = vsub.f32 0.0, %v1013_v36  ;;  %v1016_v40 = vadd.f32 %v5025_v29, %v1015_v38  ;;  %v1017_v41 = vpop.f32.mrb[3].mxu0 }
 0x18c   : > { %v1051_v42 = vmul.f32 1.442695, %v1043_v39  ;;  %v1044_v43 = vsub.f32 0.0, %v1016_v40 }
 0x18e   : > { %4201 = vpow2.f32 %v1051_v42  ;;  %v1053_v44 = vmul.f32 1.442695, %v1044_v43 }
 0x190   : > { %4203 = vpow2.f32 %v1053_v44 }
 0x194   : > { %v1020_v47 = vpop.f32.mrb[4].mxu0 }
 0x195   : > { %v5033_v48 = vadd.f32 %v5025_v29, %v1020_v47  ;;  %v1022_v50 = vpop.f32.mrb[5].mxu0 }
 0x196   : > { %v1023_v51 = vpop.f32.mrb[6].mxu0 }
 0x197   : > { %v1045_v52 = vsub.f32 0.0, %v5033_v48  ;;  %v5037_v53 = vadd.f32 %v5025_v29, %v1023_v51  ;;  %v1025_v54 = vpop.f32.mrb[7].mxu0 }
 0x198   : > { %v4202_v55 = vpop.eup %4201 }
 0x199   : > { %v1067_v57 = vadd.f32 1.0, %v4202_v55  ;;  %v1055_v58 = vmul.f32 1.442695, %v1045_v52  ;;  %v1046_v60 = vsub.f32 0.0, %v5037_v53 }
 0x19a   : > { %v4204_v61 = vpop.eup %4203 }
 0x19b   : > { %4205 = vrcp.f32 %v1067_v57  ;;  %v1068_v62 = vadd.f32 1.0, %v4204_v61  ;;  %v1057_v63 = vmul.f32 1.442695, %v1046_v60 }
 0x19c   : > { %4207 = vpow2.f32 %v1055_v58 }
 0x19d   : > { %4209 = vrcp.f32 %v1068_v62 }
 0x19e   : > { %4211 = vpow2.f32 %v1057_v63  ;;  %v4178_v63 = vld [vmem:[%s6425_s3 + $0xc0] sm:$0xff]  }
 0x19f   : > { %3964 = vmatprep.subr.bf16.mxu1 %v4178_v63 }
 0x1a3   : > { %v1028_v2 = vpop.f32.mrb[8].mxu0 }
 0x1a4   : > { %v5041_v3 = vadd.f32 %v5025_v29, %v1028_v2  ;;  %v1030_v4 = vpop.f32.mrb[9].mxu0 }
 0x1a5   : > { %v4206_v46 = vpop.eup %4205  ;;  %v1031_v5 = vpop.f32.mrb[10].mxu0 }
 0x1a6   : > { %v4208_v6 = vpop.eup %4207  ;;  %v1091_v59 = vmul.f32 %v4206_v46, %v1013_v36  ;;  %v1047_v8 = vsub.f32 0.0, %v5041_v3  ;;  %v5045_v9 = vadd.f32 %v5025_v29, %v1031_v5  ;;  %v1033_v11 = vpop.f32.mrb[11].mxu0  ;;  %v5070_v36 = vsel %vm664_vm3, %v1205_v20, %v1206_v21 }
 0x1a7   : > { %v4210_v12 = vpop.eup %4209  ;;  %v1069_v13 = vadd.f32 1.0, %v4208_v6 }
 0x1a8   : > { %v4212_v14 = vpop.eup %4211  ;;  %1121 = vst.msk [vmem:[#allocation3 + $0x11] sm:$0xff] %vm847_vm4, %v1091_v59  ;;  %v1092_v15 = vmul.f32 %v4210_v12, %v1016_v40  ;;  %v1059_v16 = vmul.f32 1.442695, %v1047_v8  ;;  %v1048_v17 = vsub.f32 0.0, %v5045_v9 }
 0x1a9   : > { %4213 = vrcp.f32 %v1069_v13  ;;  %v1070_v1 = vadd.f32 1.0, %v4212_v14 }
 0x1aa   : > { %1122 = vst.msk [vmem:[#allocation3 + $0x21] sm:$0xff] %vm847_vm4, %v1092_v15  ;;  %4215 = vpow2.f32 %v1059_v16  ;;  %v1061_v7 = vmul.f32 1.442695, %v1048_v17 }
 0x1ab   : > { %4217 = vrcp.f32 %v1070_v1 }
 0x1ac   : > { %4219 = vpow2.f32 %v1061_v7 }
 0x1af   : > { %v5054_v22 = vld [vmem:[#allocation3 + $0x10] sm:$0xff]  ;;  %v1132_v23 = vld [vmem:[#allocation3 + $0x18] sm:$0x3] }
 0x1b0   : > { %v1036_v25 = vpop.f32.mrb[12].mxu0  ;;  %v1172_v27 = vrot.slane %v5054_v22, 1  ;;  %v1173_v28 = vrot.slane %v1132_v23, 1  ;;  %v1208_v30 = vrot.slane %v5054_v22, 2  ;;  %v1209_v31 = vrot.slane %v1132_v23, 2 }
 0x1b1   : > { %v5060_v32 = vadd.f32 %v5025_v29, %v1036_v25  ;;  %v1038_v19 = vpop.f32.mrb[13].mxu0  ;;  %v5062_v26 = vld [vmem:[#allocation3 + $0x20] sm:$0xff]  ;;  %v1134_v33 = vld [vmem:[#allocation3 + $0x28] sm:$0x3] }
 0x1b2   : > { %v1039_v10 = vpop.f32.mrb[14].mxu0  ;;  %v1241_v34 = vpack.c.bf16 %v5062_v26, %v5054_v22  ;;  %v5067_v35 = vsel %vm627_vm2, %v1172_v27, %v1173_v28  ;;  %v1175_v42 = vrot.slane %v5062_v26, 1  ;;  %v1176_v47 = vrot.slane %v1134_v33, 1 }
 0x1b3   : > { %v4214_v37 = vpop.eup %4213  ;;  %v1049_v38 = vsub.f32 0.0, %v5060_v32  ;;  %v5074_v39 = vadd.f32 %v5025_v29, %v1039_v10  ;;  %v1041_v40 = vpop.f32.mrb[15].mxu0  ;;  %v1201_v41 = vpack.c.bf16 %v5067_v35, %v1171_v24  ;;  %v5081_v50 = vsel %vm664_vm3, %v1208_v30, %v1209_v31 }
 0x1b4   : > { %v4216_v43 = vpop.eup %4215  ;;  %v1093_v44 = vmul.f32 %v4214_v37, %v5033_v48  ;;  %1292 = vrot.lane.b32.xlu0 %v1241_v34, %s6460_s21  ;;  %v5088_v48 = vsel %vm627_vm2, %v1175_v42, %v1176_v47  ;;  %v1237_v58 = vpack.c.bf16 %v5081_v50, %v5070_v36  ;;  %v1212_v2 = vrot.slane %v1134_v33, 2  ;;  %v4183_v36 = vld [vmem:[%s6425_s3 + $0x90] sm:$0xff]  }
 0x1b5   : > { %v4218_v51 = vpop.eup %4217  ;;  %v1071_v52 = vadd.f32 1.0, %v4216_v43  ;;  %v1063_v54 = vmul.f32 1.442695, %v1049_v38  ;;  %v1050_v29 = vsub.f32 0.0, %v5074_v39  ;;  %1280 = vrot.lane.b32.xlu1 %v1201_v41, %s6460_s21  ;;  %v1251_v62 = vpack.c.bf16 %v5088_v48, %v5067_v35 }
 0x1b6   : > { %v4220_v55 = vpop.eup %4219  ;;  %1123 = vst.msk [vmem:[#allocation3 + $0x31] sm:$0xff] %vm847_vm4, %v1093_v44  ;;  %v1094_v57 = vmul.f32 %v4218_v51, %v5037_v53  ;;  %v1211_v53 = vrot.slane %v5062_v26, 2 }
 0x1b7   : > { %4221 = vrcp.f32 %v1071_v52  ;;  %v1072_v60 = vadd.f32 1.0, %v4220_v55  ;;  %v1065_v61 = vmul.f32 1.442695, %v1050_v29 }
 0x1b8   : > { %1124 = vst.msk [vmem:[#allocation3 + $0x41] sm:$0xff] %vm847_vm4, %v1094_v57  ;;  %4223 = vpow2.f32 %v1063_v54  ;;  %v5110_v15 = vsel %vm664_vm3, %v1211_v53, %v1212_v2 }
 0x1b9   : > { %4225 = vrcp.f32 %v1072_v60 }
 0x1ba   : > { %4227 = vpow2.f32 %v1065_v61 }
 0x1bd   : > { %v5099_v4 = vld [vmem:[#allocation3 + $0x30] sm:$0xff]  ;;  %v1136_v46 = vld [vmem:[#allocation3 + $0x38] sm:$0x3] }
 0x1be   : > { %v1214_v5 = vrot.slane %v5099_v4, 2  ;;  %v1215_v6 = vrot.slane %v1136_v46, 2  ;;  %v1178_v59 = vrot.slane %v5099_v4, 1  ;;  %v1179_v8 = vrot.slane %v1136_v46, 1  ;;  %v1148_v46 = vld [vmem:[#allocation3 + $0x98] sm:$0x3] }
 0x1bf   : > { %v5103_v11 = vld [vmem:[#allocation3 + $0x40] sm:$0xff]  ;;  %v1138_v12 = vld [vmem:[#allocation3 + $0x48] sm:$0x3]  ;;  %v1150_v13 = vpack.c.bf16 %v5099_v4, %v5062_v26  ;;  %v4191_v26 = vld [vmem:[%s6425_s3 + $0xb0] sm:$0xff]  }
 0x1c0   : > { %v1242_v14 = vpack.c.bf16 %v5103_v11, %v5099_v4  ;;  %v5113_v16 = vsel %vm664_vm3, %v1214_v5, %v1215_v6  ;;  %v5120_v1 = vsel %vm627_vm2, %v1178_v59, %v1179_v8  ;;  %v1181_v7 = vrot.slane %v5103_v11, 1  ;;  %v4192_v4 = vld [vmem:[%s6425_s3 + $0xf8] sm:$0xff]  }
 0x1c1   : > { %v4222_v17 = vpop.eup %4221  ;;  %v5117_v56 = vpack.c.bf16 %v5113_v16, %v5110_v15  ;;  %v1182_v18 = vrot.slane %v1138_v12, 1  ;;  %v1202_v21 = vpack.c.bf16 %v5120_v1, %v5088_v48  ;;  %v1217_v31 = vrot.slane %v5103_v11, 2 }
 0x1c2   : > { %v4224_v0 = vpop.eup %4223  ;;  %v1095_v20 = vmul.f32 %v4222_v17, %v5041_v3  ;;  %1294 = vrot.lane.b32.xlu0 %v1242_v14, %s6460_s21  ;;  %v1218_v19 = vrot.slane %v1138_v12, 2  ;;  %v1272_v8 = vrot.slane %v1148_v46, 2 }
 0x1c3   : > { %v4226_v23 = vpop.eup %4225  ;;  %v1073_v24 = vadd.f32 1.0, %v4224_v0  ;;  %4043 = vmatprep.mubr.msk.bf16.mxu0 %vm847_vm4, %v5117_v56  ;;  %v5130_v25 = vsel %vm627_vm2, %v1181_v7, %v1182_v18  ;;  %1282 = vrot.lane.b32.xlu1 %v1202_v21, %s6460_s21 }
 0x1c4   : > { %v4228_v27 = vpop.eup %4227  ;;  %1125 = vst.msk [vmem:[#allocation3 + $0x51] sm:$0xff] %vm847_vm4, %v1095_v20  ;;  %v1096_v28 = vmul.f32 %v4226_v23, %v5045_v9  ;;  %v1252_v3 = vpack.c.bf16 %v5130_v25, %v5120_v1  ;;  %v1219_v43 = vsel %vm664_vm3, %v1217_v31, %v1218_v19 }
 0x1c5   : > { %4229 = vrcp.f32 %v1073_v24  ;;  %v1074_v30 = vadd.f32 1.0, %v4228_v27 }
 0x1c6   : > { %1126 = vst.msk [vmem:[#allocation3 + $0x61] sm:$0xff] %vm847_vm4, %v1096_v28 }
 0x1c7   : > { %4231 = vrcp.f32 %v1074_v30 }
 0x1cb   : > { %v5139_v33 = vld [vmem:[#allocation3 + $0x50] sm:$0xff]  ;;  %v1140_v10 = vld [vmem:[#allocation3 + $0x58] sm:$0x3] }
 0x1cc   : > { %v1220_v34 = vrot.slane %v5139_v33, 2  ;;  %v1221_v37 = vrot.slane %v1140_v10, 2  ;;  %v1184_v9 = vrot.slane %v5139_v33, 1  ;;  %v1185_v38 = vrot.slane %v1140_v10, 1 }
 0x1cd   : > { %v5143_v40 = vld [vmem:[#allocation3 + $0x60] sm:$0xff]  ;;  %v1142_v41 = vld [vmem:[#allocation3 + $0x68] sm:$0x3]  ;;  %v1151_v42 = vpack.c.bf16 %v5139_v33, %v5103_v11 }
 0x1ce   : > { %v1222_v44 = vsel %vm664_vm3, %v1220_v34, %v1221_v37  ;;  %v1243_v47 = vpack.c.bf16 %v5143_v40, %v5139_v33  ;;  %v5152_v51 = vsel %vm627_vm2, %v1184_v9, %v1185_v38  ;;  %v1187_v55 = vrot.slane %v5143_v40, 1 }
 0x1cf   : > { %v4230_v52 = vpop.eup %4229  ;;  %v5154_v54 = vpack.c.bf16 %v1222_v44, %v1219_v43  ;;  %v1203_v29 = vpack.c.bf16 %v5152_v51, %v5130_v25  ;;  %v1188_v60 = vrot.slane %v1142_v41, 1  ;;  %v1223_v5 = vrot.slane %v5143_v40, 2  ;;  %v5312_v25 = vld [vmem:[%s6429_s7 + $0x4] ss:$0 sm:$0xff] }
 0x1d0   : > { %v1097_v57 = vmul.f32 %v4230_v52, %v5060_v32  ;;  %1296 = vrot.lane.b32.xlu0 %v1243_v47, %s6460_s21  ;;  %v5172_v32 = vld [vmem:[#allocation3 + $0x90] sm:$0xff]  ;;  %v1224_v6 = vrot.slane %v1142_v41, 2  ;;  %v1267_v41 = vrot.slane %v1148_v46, 1 }
 0x1d1   : > { %v4232_v61 = vpop.eup %4231  ;;  %4044 = vmatmul.mubr.msk.bf16.vlgmr.msra.gmra.mrb[16].mxu0 %vm847_vm4, %v5154_v54  ;;  %1284 = vrot.lane.b32.xlu1 %v1203_v29, %s6460_s21  ;;  %v5167_v53 = vsel %vm627_vm2, %v1187_v55, %v1188_v60  ;;  %v1271_v59 = vrot.slane %v5172_v32, 2  ;;  %v1266_v38 = vrot.slane %v5172_v32, 1  ;;  %v1259_v29 = vpack.c.bf16 %v5110_v15, %v5081_v50  ;;  %v4184_v50 = vld [vmem:[%s6425_s3 + $0xd8] sm:$0xff]  }
 0x1d2   : > { %1127 = vst.msk [vmem:[#allocation3 + $0x71] sm:$0xff] %vm847_vm4, %v1097_v57  ;;  %v1098_v63 = vmul.f32 %v4232_v61, %v5074_v39  ;;  %v1253_v2 = vpack.c.bf16 %v5167_v53, %v5152_v51  ;;  %v1225_v20 = vsel %vm664_vm3, %v1223_v5, %v1224_v6  ;;  %v1260_v57 = vpack.c.bf16 %v1219_v43, %v5113_v16  ;;  %v4179_v5 = vld [vmem:[%s6425_s3 + $0x80] sm:$0xff]  }
 0x1d3   : > { %v1273_v23 = vsel %vm664_vm3, %v1271_v59, %v1272_v8  ;;  %v1268_v61 = vsel %vm627_vm2, %v1266_v38, %v1267_v41  ;;  %v1149_v43 = vpack.c.bf16 %v5054_v22, %v5049_v45  ;;  %v4180_v59 = vld [vmem:[%s6425_s3 + $0xc8] sm:$0xff]   ;;  %v4182_v22 = vld [vmem:[%s6425_s3 + $0xd0] sm:$0xff]   ;;  %v5322_v51 = vld [vmem:[%s6429_s7 + $0x1] ss:$0 sm:$0xff] }
 0x1d4   : > { %1128 = vst.msk [vmem:[#allocation3 + $0x81] sm:$0xff] %vm847_vm4, %v1098_v63  ;;  %v1261_v63 = vpack.c.bf16 %v1225_v20, %v1222_v44  ;;  %v4181_v45 = vld [vmem:[%s6425_s3 + $0x88] sm:$0xff]  }
 0x1d9   : > { %v5176_v12 = vld [vmem:[#allocation3 + $0x70] sm:$0xff]  ;;  %v1144_v39 = vld [vmem:[#allocation3 + $0x78] sm:$0x3] }
 0x1da   : > { %v1226_v14 = vrot.slane %v5176_v12, 2  ;;  %v1227_v17 = vrot.slane %v1144_v39, 2  ;;  %v1190_v7 = vrot.slane %v5176_v12, 1  ;;  %v1191_v18 = vrot.slane %v1144_v39, 1  ;;  %v4186_v39 = vld [vmem:[%s6425_s3 + $0xe0] sm:$0xff]  }
 0x1db   : > { %v5180_v0 = vld [vmem:[#allocation3 + $0x80] sm:$0xff]  ;;  %v1146_v21 = vld [vmem:[#allocation3 + $0x88] sm:$0x3]  ;;  %v1152_v24 = vpack.c.bf16 %v5176_v12, %v5143_v40 }
 0x1dc   : > { %v1244_v27 = vpack.c.bf16 %v5180_v0, %v5176_v12  ;;  %v1255_v28 = vrot.slane %v5180_v0, 2  ;;  %v1228_v30 = vsel %vm664_vm3, %v1226_v14, %v1227_v17  ;;  %v5191_v31 = vsel %vm627_vm2, %v1190_v7, %v1191_v18  ;;  %v4187_v18 = vld [vmem:[%s6425_s3 + $0xa0] sm:$0xff]  }
 0x1dd   : > { %v5193_v19 = vpack.c.bf16 %v1228_v30, %v1225_v20  ;;  %v1204_v10 = vpack.c.bf16 %v5191_v31, %v5167_v53  ;;  %v1256_v34 = vrot.slane %v1146_v21, 2  ;;  %v1247_v37 = vrot.slane %v5180_v0, 1  ;;  %v5324_v53 = vld [vmem:[#allocation2 + $0x68] sm:$0x3] }
 0x1de   : > { %1298 = vrot.lane.b32.xlu0 %v1244_v27, %s6460_s21  ;;  %v1248_v9 = vrot.slane %v1146_v21, 1  ;;  %v4188_v21 = vld [vmem:[%s6425_s3 + $0xe8] sm:$0xff]   ;;  %v4193_v27 = vld [vmem:[%s6425_s3 + $0xb8] sm:$0xff]  }
 0x1df   : > { %4047 = vmatprep.mubr.msk.bf16.mxu0 %vm847_vm4, %v5193_v19  ;;  %1286 = vrot.lane.b32.xlu1 %v1204_v10, %s6460_s21  ;;  %v1257_v47 = vsel %vm664_vm3, %v1255_v28, %v1256_v34 }
 0x1e0   : > { %v1275_v52 = vpack.c.bf16 %v1273_v23, %v1257_v47  ;;  %v5207_v55 = vsel %vm627_vm2, %v1247_v37, %v1248_v9  ;;  %v1262_v15 = vpack.c.bf16 %v1257_v47, %v1228_v30  ;;  %v4190_v23 = vld [vmem:[%s6425_s3 + $0xf0] sm:$0xff]  }
 0x1e1   : > { %v1254_v60 = vpack.c.bf16 %v5207_v55, %v5191_v31  ;;  %v1270_v46 = vpack.c.bf16 %v1268_v61, %v5207_v55  ;;  %v5355_v55 = vld [vmem:[#allocation2 + $0x90] sm:$0xff]  ;;  %v4398_v61 = vld [vmem:[#allocation2 + $0x98] sm:$0x3] }
 0x1e2   : > { %4048 = vmatmul.mubr.msk.bf16.gmra.mrb[20].mxu0 %vm847_vm4, %v1275_v52  ;;  %1304 = vrot.lane.b32.xlu0 %v1259_v29, %s6460_s21  ;;  %v5350_v52 = vld [vmem:[%s6429_s7 + $0x8] ss:$0 sm:$0xff] }
 0x1e3   : > { %1306 = vrot.lane.b32.xlu1 %v1260_v57, %s6460_s21 }
 0x1e6   : > { %1308 = vrot.lane.b32.xlu0 %v1261_v63, %s6460_s21 }
 0x1e7   : > { %1313 = vrot.lane.b32.xlu1 %v1270_v46, %s6460_s21  ;;  %v5366_v46 = vmul.f32 %v4398_v61, %v5350_v52 }
 0x1ea   : > { %1310 = vrot.lane.b32.xlu0 %v1262_v15, %s6460_s21 }
 0x226   : > { %v1293_v16 = vpop.permute.xlu0 %1292 }
 0x227   : > { %v1281_v6 = vpop.permute.xlu1 %1280  ;;  %v1333_v44 = vsel %vm847_vm4, %v1237_v58, %v1293_v16  ;;  %v4185_v58 = vld [vmem:[%s6425_s3 + $0x98] sm:$0xff]  }
 0x228   : > { %1703 = vmatprep.mubr.bf16.mxu1 %v1333_v44  ;;  %v1317_v8 = vsel %vm847_vm4, %v1149_v43, %v1281_v6  ;;  %v5374_v6 = vld [vmem:[#allocation2 + $0x40] sm:$0xff] }
 0x229   : > { %1704 = vmatmul.mubr.bf16.vlgmr.msra.gmra.mrb[0].mxu1 %v1317_v8  ;;  %v2076_v44 = vmul.f32 %v5374_v6, %v5322_v51 }
 0x22a   : > { %3965 = vmatpush3.bf16.msra.mxu1 %v4179_v5 }
 0x22b   : > { %3966 = vmatprep.subr.bf16.mxu1 %v4180_v59  ;;  %v5378_v59 = vld [vmem:[#allocation2 + $0x48] sm:$0x3] }
 0x22c   : > { %v2077_v8 = vmul.f32 %v5378_v59, %v5322_v51 }
 0x22e   : > { %3967 = vmatpush3.bf16.msra.mxu1 %v4181_v45  ;;  %v5382_v45 = vld [vmem:[#allocation2 + $0x50] sm:$0xff] }
 0x22f   : > { %3968 = vmatprep.subr.bf16.mxu1 %v4182_v22  ;;  %v2078_v22 = vmul.f32 %v5382_v45, %v5322_v51 }
 0x232   : > { %3969 = vmatpush3.bf16.msra.mxu1 %v4183_v36  ;;  %v5386_v36 = vld [vmem:[#allocation2 + $0x58] sm:$0x3] }
 0x233   : > { %3970 = vmatprep.subr.bf16.mxu1 %v4184_v50  ;;  %v2079_v50 = vmul.f32 %v5386_v36, %v5322_v51 }
 0x234   : > { %v1295_v14 = vpop.permute.xlu0 %1294 }
 0x235   : > { %v1337_v17 = vsel %vm847_vm4, %v5117_v56, %v1295_v14  ;;  %v1283_v7 = vpop.permute.xlu1 %1282  ;;  %v4189_v56 = vld [vmem:[%s6425_s3 + $0xa8] sm:$0xff]   ;;  %v5392_v14 = vld [vmem:[#allocation2 + $0x60] sm:$0xff] }
 0x236   : > { %1711 = vmatprep.mubr.bf16.mxu1 %v1337_v17  ;;  %3971 = vmatpush3.bf16.msra.mxu1 %v4185_v58  ;;  %v1321_v20 = vsel %vm847_vm4, %v1150_v13, %v1283_v7  ;;  %v5396_v17 = vmul.f32 %v5392_v14, %v5322_v51  ;;  %v5398_v7 = vld [vmem:[#allocation2 + $0x70] sm:$0xff] }
 0x237   : > { %3972 = vmatprep.subr.bf16.mxu1 %v4186_v39  ;;  %1712 = vmatmul.mubr.bf16.gmra.mrb[4].mxu1 %v1321_v20 }
 0x23a   : > { %3973 = vmatpush3.bf16.msra.mxu1 %v4187_v18  ;;  %v5402_v18 = vmul.f32 %v5398_v7, %v5322_v51 }
 0x23b   : > { %3974 = vmatprep.subr.bf16.mxu1 %v4188_v21  ;;  %v2113_v21 = vrot.slane %v2077_v8, 1  ;;  %v2254_v8 = vmul.f32 %v5324_v53, %v5312_v25 }
 0x23e   : > { %3975 = vmatpush3.bf16.msra.mxu1 %v4189_v56  ;;  %v2115_v56 = vrot.slane %v2078_v22, 1 }
 0x23f   : > { %3976 = vmatprep.subr.bf16.mxu1 %v4190_v23  ;;  %v2116_v23 = vrot.slane %v2079_v50, 1 }
 0x242   : > { %v1297_v13 = vpop.permute.xlu0 %1296  ;;  %3977 = vmatpush3.bf16.msra.mxu1 %v4191_v26  ;;  %v5407_v26 = vld [vmem:[%s6429_s7] ss:$0 sm:$0xff] }
 0x243   : > { %v1285_v28 = vpop.permute.xlu1 %1284  ;;  %v1341_v30 = vsel %vm847_vm4, %v5154_v54, %v1297_v13  ;;  %3978 = vmatprep.subr.bf16.mxu1 %v4192_v4  ;;  %v2051_v4 = vmul.f32 %v5407_v26, %v5374_v6  ;;  %v2052_v13 = vmul.f32 %v5407_v26, %v5382_v45 }
 0x244   : > { %1719 = vmatprep.mubr.bf16.mxu1 %v1341_v30  ;;  %v1325_v10 = vsel %vm847_vm4, %v1151_v42, %v1285_v28 }
 0x245   : > { %1720 = vmatmul.mubr.bf16.gmra.mrb[8].mxu1 %v1325_v10 }
 0x246   : > { %3979 = vmatpush3.bf16.msra.mxu1 %v4193_v27  ;;  %v5416_v27 = vld [vmem:[%s6429_s7 + $0x2] ss:$0 sm:$0xff] }
 0x247   : > { %v2153_v28 = vmul.f32 %v5416_v27, %v5374_v6  ;;  %v2154_v30 = vmul.f32 %v5416_v27, %v5378_v59 }
 0x250   : > { %v1299_v34 = vpop.permute.xlu0 %1298 }
 0x251   : > { %v1287_v37 = vpop.permute.xlu1 %1286  ;;  %v1345_v9 = vsel %vm847_vm4, %v5193_v19, %v1299_v34  ;;  %v4396_v19 = vld [vmem:[#allocation2 + $0x88] sm:$0x3] }
 0x252   : > { %1727 = vmatprep.mubr.bf16.mxu1 %v1345_v9  ;;  %v1329_v54 = vsel %vm847_vm4, %v1152_v24, %v1287_v37  ;;  %v1263_v24 = vpack.c.bf16 %v5172_v32, %v5180_v0  ;;  %v5333_v32 = vld [vmem:[%s6429_s7 + $0x7] ss:$0 sm:$0xff]  ;;  %v5335_v0 = vld [vmem:[#allocation2 + $0x78] sm:$0x3]  ;;  %v5342_v41 = vmul.f32 %v4396_v19, %v5312_v25  ;;  %v5372_v5 = vmul.f32 %v4396_v19, %v5350_v52 }
 0x253   : > { %1728 = vmatmul.mubr.bf16.gmra.mrb[12].mxu1 %v1329_v54  ;;  %v5339_v31 = vmul.f32 %v5335_v0, %v5322_v51  ;;  %v5353_v29 = vmul.f32 %v4396_v19, %v5333_v32  ;;  %v5359_v57 = vmul.f32 %v5355_v55, %v5333_v32  ;;  %v5363_v63 = vmul.f32 %v4398_v61, %v5333_v32 }
 0x254   : > { %1768 = vmatprep.mubr.bf16.mxu1 %v1321_v20  ;;  %v1305_v38 = vpop.permute.xlu0 %1304  ;;  %v2297_v16 = vrot.slane %v5342_v41, 1  ;;  %v2112_v20 = vrot.slane %v2076_v44, 1  ;;  %v2117_v37 = vsel %vm627_vm2, %v2115_v56, %v2116_v23  ;;  %v2155_v9 = vmul.f32 %v5416_v27, %v5382_v45 }
 0x255   : > { %v1349_v11 = vsel %vm847_vm4, %v1251_v62, %v1305_v38  ;;  %v1307_v33 = vpop.permute.xlu1 %1306  ;;  %v2122_v15 = vrot.slane %v5339_v31, 1  ;;  %v2469_v58 = vrot.slane %v5353_v29, 1  ;;  %v2471_v39 = vrot.slane %v5359_v57, 1 }
 0x256   : > { %v1353_v42 = vsel %vm847_vm4, %v1252_v3, %v1307_v33  ;;  %v5317_v3 = vld [vmem:[%s6429_s7 + $0x5] ss:$0 sm:$0xff]  ;;  %v2114_v34 = vsel %vm627_vm2, %v2112_v20, %v2113_v21  ;;  %v2189_v33 = vrot.slane %v2153_v28, 2  ;;  %v2546_v41 = vrot.slane %v5372_v5, 2 }
 0x257   : > { %v5345_v47 = vmul.f32 %v4396_v19, %v5317_v3  ;;  %v2136_v38 = vadd.f32 %v2114_v34, %v2051_v4  ;;  %v2253_v19 = vmul.f32 %v5392_v14, %v5312_v25  ;;  %v2328_v56 = vmul.f32 %v5382_v45, %v5317_v3 }
 0x258   : > { %v1309_v40 = vpop.permute.xlu0 %1308  ;;  %v2291_v4 = vrot.slane %v2254_v8, 1  ;;  %v2330_v28 = vmul.f32 %v5392_v14, %v5317_v3  ;;  %v2429_v8 = vmul.f32 %v5335_v0, %v5333_v32 }
 0x259   : > { %v1314_v12 = vpop.permute.xlu1 %1313  ;;  %v1357_v35 = vsel %vm847_vm4, %v1253_v2, %v1309_v40  ;;  %v5328_v2 = vmul.f32 %v5324_v53, %v5322_v51  ;;  %v2374_v43 = vrot.slane %v5345_v47, 2  ;;  %v2192_v40 = vrot.slane %v2155_v9, 2 }
 0x25a   : > { %v1365_v48 = vsel %vm847_vm4, %v1263_v24, %v1314_v12  ;;  %v2251_v24 = vmul.f32 %v5382_v45, %v5312_v25  ;;  %v2290_v21 = vrot.slane %v2253_v19, 1  ;;  %v2364_v9 = vrot.slane %v2328_v56, 2 }
 0x25b   : > { %1769 = vmatmul.mubr.bf16.vlgmr.msra.gmra.mrb[16].mxu1 %v1349_v11  ;;  %v2137_v11 = vadd.f32 %v2117_v37, %v2052_v13  ;;  %v2329_v13 = vmul.f32 %v5386_v36, %v5317_v3  ;;  %v2331_v37 = vmul.f32 %v5324_v53, %v5317_v3  ;;  %v2428_v19 = vmul.f32 %v5398_v7, %v5333_v32 }
 0x25c   : > { %1776 = vmatprep.mubr.bf16.mxu1 %v1325_v10  ;;  %v1311_v62 = vpop.permute.xlu0 %1310  ;;  %v5425_v10 = vld [vmem:[%s6429_s7 + $0x3] ss:$0 sm:$0xff]  ;;  %v2287_v22 = vrot.slane %v2251_v24, 1 }
 0x25d   : > { %v1361_v1 = vsel %vm847_vm4, %v1254_v60, %v1311_v62  ;;  %v2119_v60 = vrot.slane %v5328_v2, 1  ;;  %v2226_v62 = vmul.f32 %v5382_v45, %v5425_v10  ;;  %v2465_v56 = vrot.slane %v2428_v19, 1 }
 0x25e   : > { %v2121_v19 = vrot.slane %v5402_v18, 1  ;;  %v2228_v31 = vmul.f32 %v5398_v7, %v5425_v10 }
 0x263   : > { %1777 = vmatmul.mubr.bf16.gmra.mrb[20].mxu1 %v1353_v42  ;;  %v2190_v42 = vrot.slane %v2154_v30, 2 }
 0x264   : > { %1784 = vmatprep.mubr.bf16.mxu1 %v1329_v54  ;;  %v2156_v54 = vmul.f32 %v5416_v27, %v5386_v36 }
 0x266   : > { %v2193_v12 = vrot.slane %v2156_v54, 2  ;;  %v2292_v54 = vsel %vm627_vm2, %v2290_v21, %v2291_v4  ;;  %v2466_v4 = vrot.slane %v2429_v8, 1 }
 0x268   : > { %v2194_v61 = vsel %vm664_vm3, %v2192_v40, %v2193_v12  ;;  %v2368_v12 = vrot.slane %v2331_v37, 2  ;;  %v2506_v37 = vmul.f32 %v5335_v0, %v5350_v52 }
 0x269   : > { %v2214_v50 = vadd.f32 %v2194_v61, %v2137_v11  ;;  %v2365_v11 = vrot.slane %v2329_v13, 2  ;;  %v2504_v13 = vmul.f32 %v5324_v53, %v5350_v52 }
 0x26b   : > { %1785 = vmatmul.mubr.bf16.gmra.mrb[24].mxu1 %v1357_v35  ;;  %v2252_v35 = vmul.f32 %v5386_v36, %v5312_v25 }
 0x26c   : > { %1792 = vmatprep.mubr.bf16.mxu1 %v1365_v48  ;;  %v2191_v48 = vsel %vm664_vm3, %v2189_v33, %v2190_v42  ;;  %v2367_v33 = vrot.slane %v2330_v28, 2  ;;  %v5460_v42 = vld [vmem:[%s6429_s7 + $0x6] ss:$0 sm:$0xff]  ;;  %v2505_v28 = vmul.f32 %v5398_v7, %v5350_v52 }
 0x26d   : > { %v2213_v44 = vadd.f32 %v2191_v48, %v2136_v38  ;;  %v2288_v20 = vrot.slane %v2252_v35, 1  ;;  %v2401_v24 = vmul.f32 %v5392_v14, %v5460_v42  ;;  %v2402_v35 = vmul.f32 %v5398_v7, %v5460_v42 }
 0x26e   : > { %v2366_v48 = vsel %vm664_vm3, %v2364_v9, %v2365_v11  ;;  %v2369_v61 = vsel %vm664_vm3, %v2367_v33, %v2368_v12  ;;  %v2540_v11 = vrot.slane %v2504_v13, 2  ;;  %v2542_v33 = vrot.slane %v2505_v28, 2 }
 0x26f   : > { %v2234_v23 = vadd.f32 %v2226_v62, %v2213_v44  ;;  %v2289_v34 = vsel %vm627_vm2, %v2287_v22, %v2288_v20  ;;  %v2426_v62 = vmul.f32 %v5392_v14, %v5333_v32  ;;  %v2503_v22 = vmul.f32 %v5392_v14, %v5350_v52 }
 0x270   : > { %v2543_v12 = vrot.slane %v2506_v37, 2 }
 0x271   : > { %v2311_v38 = vadd.f32 %v2289_v34, %v2234_v23  ;;  %v2462_v20 = vrot.slane %v2426_v62, 1  ;;  %v2539_v9 = vrot.slane %v2503_v22, 2  ;;  %v5494_v62 = vld [vmem:[%s6430_s8] ss:$0 sm:$0xff]  ;;  %v2158_v22 = vmul.f32 %v5416_v27, %v5324_v53 }
 0x273   : > { %1793 = vmatmul.mubr.bf16.gmra.mrb[28].mxu1 %v1361_v1  ;;  %v2227_v1 = vmul.f32 %v5392_v14, %v5425_v10  ;;  %v2388_v44 = vadd.f32 %v2366_v48, %v2311_v38  ;;  %v2054_v48 = vmul.f32 %v5407_v26, %v5398_v7  ;;  %v2196_v13 = vrot.slane %v2158_v22, 2 }
 0x274   : > { %v2333_v22 = vmul.f32 %v5335_v0, %v5317_v3 }
 0x275   : > { %v2235_v30 = vadd.f32 %v2227_v1, %v2214_v50  ;;  %v2427_v1 = vmul.f32 %v5324_v53, %v5333_v32  ;;  %v2409_v23 = vadd.f32 %v2401_v24, %v2388_v44  ;;  %v2053_v24 = vmul.f32 %v5407_v26, %v5392_v14 }
 0x276   : > { %v2544_v44 = vsel %vm664_vm3, %v2542_v33, %v2543_v12 }
 0x277   : > { %v2312_v40 = vadd.f32 %v2292_v54, %v2235_v30  ;;  %v2463_v21 = vrot.slane %v2427_v1, 1  ;;  %v2467_v54 = vsel %vm627_vm2, %v2465_v56, %v2466_v4  ;;  %v2118_v1 = vrot.slane %v5396_v17, 1 }
 0x278   : > { %v2123_v17 = vsel %vm627_vm2, %v2121_v19, %v2122_v15  ;;  %v4407_v15 = vld [vmem:[#allocation2 + $0x80] sm:$0xff] }
 0x279   : > { %v2389_v50 = vadd.f32 %v2369_v61, %v2312_v40  ;;  %v2464_v34 = vsel %vm627_vm2, %v2462_v20, %v2463_v21  ;;  %v2157_v61 = vmul.f32 %v5416_v27, %v5392_v14  ;;  %v2120_v21 = vsel %vm627_vm2, %v2118_v1, %v2119_v60 }
 0x27a   : > { %v2486_v38 = vadd.f32 %v2464_v34, %v2409_v23  ;;  %v2160_v14 = vmul.f32 %v5416_v27, %v5335_v0  ;;  %v2138_v56 = vadd.f32 %v2120_v21, %v2053_v24  ;;  %v2139_v53 = vadd.f32 %v2123_v17, %v2054_v48 }
 0x27b   : > { %v2410_v30 = vadd.f32 %v2402_v35, %v2389_v50  ;;  %v2541_v35 = vsel %vm664_vm3, %v2539_v9, %v2540_v11  ;;  %v2159_v50 = vmul.f32 %v5416_v27, %v5398_v7  ;;  %v2195_v23 = vrot.slane %v2157_v61, 2 }
 0x27c   : > { %v2563_v8 = vadd.f32 %v2541_v35, %v2486_v38  ;;  %v2199_v28 = vrot.slane %v2160_v14, 2  ;;  %v2255_v34 = vmul.f32 %v5398_v7, %v5312_v25  ;;  %v2256_v38 = vmul.f32 %v5335_v0, %v5312_v25 }
 0x27d   : > { %v2487_v40 = vadd.f32 %v2467_v54, %v2410_v30  ;;  %v2198_v2 = vrot.slane %v2159_v50, 2  ;;  %v2229_v30 = vmul.f32 %v4407_v15, %v5425_v10  ;;  %v2197_v9 = vsel %vm664_vm3, %v2195_v23, %v2196_v13 }
 0x27e   : > { %v5514_v18 = vadd.f32 %v5494_v62, %v2563_v8  ;;  %v2215_v33 = vadd.f32 %v2197_v9, %v2138_v56  ;;  %v2257_v12 = vmul.f32 %v4407_v15, %v5312_v25  ;;  %v2293_v48 = vrot.slane %v2255_v34, 1 }
 0x27f   : > { %v2564_v20 = vadd.f32 %v2544_v44, %v2487_v40  ;;  %v2200_v54 = vsel %vm664_vm3, %v2198_v2, %v2199_v28  ;;  %v2294_v35 = vrot.slane %v2256_v38, 1  ;;  %v2332_v1 = vmul.f32 %v5398_v7, %v5317_v3 }
 0x280   : > { %v2586_v60 = vsub.f32 0.0, %v5514_v18  ;;  %v2216_v40 = vadd.f32 %v2200_v54, %v2139_v53  ;;  %v2236_v19 = vadd.f32 %v2228_v31, %v2215_v33  ;;  %v2296_v44 = vrot.slane %v2257_v12, 1 }
 0x281   : > { %v5517_v4 = vadd.f32 %v5494_v62, %v2564_v20  ;;  %v2295_v8 = vsel %vm627_vm2, %v2293_v48, %v2294_v35  ;;  %v2334_v50 = vmul.f32 %v4407_v15, %v5317_v3  ;;  %v2472_v20 = vrot.slane %v5363_v63, 1 }
 0x282   : > { %v2598_v11 = vmul.f32 1.442695, %v2586_v60  ;;  %v2237_v61 = vadd.f32 %v2229_v30, %v2216_v40  ;;  %v2298_v21 = vsel %vm627_vm2, %v2296_v44, %v2297_v16  ;;  %v2313_v17 = vadd.f32 %v2295_v8, %v2236_v19 }
 0x283   : > { %v2587_v37 = vsub.f32 0.0, %v5517_v4  ;;  %v2370_v7 = vrot.slane %v2332_v1, 2  ;;  %v2371_v56 = vrot.slane %v2333_v22, 2  ;;  %v2373_v53 = vrot.slane %v2334_v50, 2  ;;  %v5575_v22 = vld [vmem:[%s6431_s9] sm:$0xff]  }
 0x284   : > { %4233 = vpow2.f32 %v2598_v11  ;;  %v2314_v14 = vadd.f32 %v2298_v21, %v2237_v61  ;;  %v2403_v23 = vmul.f32 %v4407_v15, %v5460_v42  ;;  %v2404_v13 = vmul.f32 %v5355_v55, %v5460_v42  ;;  %4097 = vmatprep.subr.bf16.mxu1 %v5575_v22 }
 0x285   : > { %v2600_v24 = vmul.f32 1.442695, %v2587_v37  ;;  %v2430_v0 = vmul.f32 %v4407_v15, %v5333_v32  ;;  %v2507_v2 = vmul.f32 %v4407_v15, %v5350_v52  ;;  %v2509_v63 = vmul.f32 %v5355_v55, %v5350_v52  ;;  %4098 = vmatpush3.bf16.msra.mxu1 %v5575_v22 }
 0x286   : > { %v2549_v16 = vrot.slane %v5366_v46, 2  ;;  %v2372_v60 = vsel %vm664_vm3, %v2370_v7, %v2371_v56  ;;  %v2375_v31 = vsel %vm664_vm3, %v2373_v53, %v2374_v43  ;;  %v2473_v55 = vsel %vm627_vm2, %v2471_v39, %v2472_v20 }
 0x287   : > { %4235 = vpow2.f32 %v2600_v24  ;;  %v2390_v34 = vadd.f32 %v2372_v60, %v2313_v17  ;;  %v2391_v37 = vadd.f32 %v2375_v31, %v2314_v14  ;;  %v2468_v15 = vrot.slane %v2430_v0, 1 }
 0x288   : > { %v2545_v9 = vrot.slane %v2507_v2, 2  ;;  %v2548_v46 = vrot.slane %v2509_v63, 2  ;;  %v4408_v2 = vld [vmem:[#allocation2 + $0x18] sm:$0x3] }
 0x289   : > { %v2411_v38 = vadd.f32 %v2403_v23, %v2390_v34  ;;  %v2412_v11 = vadd.f32 %v2404_v13, %v2391_v37  ;;  %v2470_v47 = vsel %vm627_vm2, %v2468_v15, %v2469_v58  ;;  %v2071_v63 = vmul.f32 %v4408_v2, %v5322_v51 }
 0x28a   : > { %v2547_v43 = vsel %vm664_vm3, %v2545_v9, %v2546_v41  ;;  %v2550_v33 = vsel %vm664_vm3, %v2548_v46, %v2549_v16  ;;  %v2148_v60 = vmul.f32 %v4408_v2, %v5416_v27 }
 0x28b   : > { %v2488_v12 = vadd.f32 %v2470_v47, %v2411_v38  ;;  %v2489_v57 = vadd.f32 %v2473_v55, %v2412_v11  ;;  %v2104_v31 = vrot.slane %v2071_v63, 1 }
 0x28c   : > { %v2181_v37 = vrot.slane %v2148_v60, 2 }
 0x28d   : > { %v2565_v35 = vadd.f32 %v2547_v43, %v2488_v12  ;;  %v2566_v1 = vadd.f32 %v2550_v33, %v2489_v57  ;;  %v5600_v12 = vld [vmem:[#allocation2 + $0x20] sm:$0xff] }
 0x28e   : > { %v4234_v40 = vpop.eup %4233  ;;  %v2245_v57 = vmul.f32 %v5600_v12, %v5312_v25 }
 0x28f   : > { %v2610_v39 = vadd.f32 1.0, %v4234_v40  ;;  %v2580_v19 = vadd.f32 %v5494_v62, %v2565_v35  ;;  %v2581_v29 = vadd.f32 %v5494_v62, %v2566_v1  ;;  %v2321_v35 = vmul.f32 %v4408_v2, %v5317_v3 }
 0x291   : > { %v4236_v24 = vpop.eup %4235  ;;  %4237 = vrcp.f32 %v2610_v39  ;;  %v2588_v61 = vsub.f32 0.0, %v2580_v19  ;;  %v2589_v58 = vsub.f32 0.0, %v2581_v29 }
 0x292   : > { %v2611_v48 = vadd.f32 1.0, %v4236_v24  ;;  %v5604_v24 = vld [vmem:[#allocation2 + $0x28] sm:$0x3] }
 0x293   : > { %v2602_v44 = vmul.f32 1.442695, %v2588_v61  ;;  %v2604_v8 = vmul.f32 1.442695, %v2589_v58  ;;  %v2246_v39 = vmul.f32 %v5604_v24, %v5312_v25  ;;  %v2223_v61 = vmul.f32 %v5600_v12, %v5425_v10 }
 0x294   : > { %4239 = vrcp.f32 %v2611_v48 }
 0x295   : > { %4241 = vpow2.f32 %v2602_v44 }
 0x296   : > { %4243 = vpow2.f32 %v2604_v8  ;;  %v2278_v8 = vrot.slane %v2245_v57, 1 }
 0x29b   : > { %v4238_v20 = vpop.eup %4237 }
 0x29c   : > { %v2634_v14 = vmul.f32 %v4238_v20, %v5514_v18  ;;  %v4409_v18 = vld [vmem:[#allocation2 + $0x10] sm:$0xff]  ;;  %v2279_v20 = vrot.slane %v2246_v39, 1 }
 0x29d   : > { %v2070_v34 = vmul.f32 %v4409_v18, %v5322_v51  ;;  %v2147_v9 = vmul.f32 %v4409_v18, %v5416_v27  ;;  %v2222_v55 = vmul.f32 %v4409_v18, %v5425_v10  ;;  %v2048_v46 = vmul.f32 %v4409_v18, %v5407_v26 }
 0x29e   : > { %v4240_v17 = vpop.eup %4239  ;;  %v2243_v40 = vmul.f32 %v4409_v18, %v5312_v25  ;;  %v2280_v63 = vsel %vm627_vm2, %v2278_v8, %v2279_v20 }
 0x29f   : > { %v2635_v53 = vmul.f32 %v4240_v17, %v5517_v4  ;;  %v4242_v13 = vpop.eup %4241  ;;  %v2244_v4 = vmul.f32 %v4408_v2, %v5312_v25  ;;  %v2103_v15 = vrot.slane %v2070_v34, 1  ;;  %v2180_v11 = vrot.slane %v2147_v9, 2  ;;  %v5626_v9 = vld [vmem:[#allocation2 + $0x30] sm:$0xff] }
 0x2a0   : > { %v4244_v0 = vpop.eup %4243  ;;  %v2612_v41 = vadd.f32 1.0, %v4242_v13  ;;  %v2230_v48 = vadd.f32 %v2222_v55, %v4766_v49  ;;  %v2275_v44 = vrot.slane %v2243_v40, 1  ;;  %v2320_v17 = vmul.f32 %v4409_v18, %v5317_v3 }
 0x2a1   : > { %v2640_v23 = vpack.c.bf16 %v2635_v53, %v2634_v14  ;;  %v2613_v16 = vadd.f32 1.0, %v4244_v0  ;;  %v2105_v38 = vsel %vm627_vm2, %v2103_v15, %v2104_v31  ;;  %v2276_v47 = vrot.slane %v2244_v4, 1 }
 0x2a2   : > { %4245 = vrcp.f32 %v2612_v41  ;;  %v2133_v43 = vadd.f32 %v2105_v38, %v2048_v46  ;;  %v2182_v33 = vsel %vm664_vm3, %v2180_v11, %v2181_v37  ;;  %v2322_v13 = vmul.f32 %v5600_v12, %v5317_v3  ;;  %v4195_v38 = vld [vmem:[%s6427_s5] sm:$0xff]  }
 0x2a3   : > { %4073 = vmatprep.mubr.msk.bf16.mxu1 %vm556_vm0, %v2640_v23  ;;  %4247 = vrcp.f32 %v2613_v16  ;;  %v2323_v49 = vmul.f32 %v5604_v24, %v5317_v3  ;;  %v2277_v2 = vsel %vm627_vm2, %v2275_v44, %v2276_v47  ;;  %v2352_v41 = vrot.slane %v2320_v17, 2  ;;  %4051 = vmatprep.subr.bf16.mxu0 %v4195_v38 }
 0x2a4   : > { %v5550_v28 = vpop.f32.mrb[16].mxu0  ;;  %v2210_v1 = vadd.f32 %v2182_v33, %v2133_v43  ;;  %v2307_v16 = vadd.f32 %v2277_v2, %v2230_v48  ;;  %v2353_v31 = vrot.slane %v2321_v35, 2  ;;  %v2355_v34 = vrot.slane %v2322_v13, 2  ;;  %v5637_v43 = vld [vmem:[#allocation2 + $0x38] sm:$0x3]  ;;  %4052 = vmatpush3.bf16.msra.mxu0 %v4195_v38 }
 0x2a5   : > { %v5556_v30 = vpop.f32.mrb[17].mxu0  ;;  %v2356_v4 = vrot.slane %v2323_v49, 2  ;;  %v2419_v37 = vmul.f32 %v5604_v24, %v5333_v32  ;;  %v2398_v55 = vmul.f32 %v5626_v9, %v5460_v42  ;;  %v2420_v46 = vmul.f32 %v5626_v9, %v5333_v32 }
 0x2a6   : > { %v5561_v5 = vpop.f32.mrb[18].mxu0  ;;  %v2231_v23 = vadd.f32 %v2223_v61, %v2210_v1  ;;  %v2354_v15 = vsel %vm664_vm3, %v2352_v41, %v2353_v31  ;;  %v2421_v33 = vmul.f32 %v5637_v43, %v5333_v32  ;;  %v2495_v35 = vmul.f32 %v5600_v12, %v5350_v52  ;;  %v4197_v31 = vld [vmem:[%s6427_s5 + $0x10] sm:$0xff]  }
 0x2a7   : > { %v5563_v54 = vpop.f32.mrb[19].mxu0  ;;  %v2357_v11 = vsel %vm664_vm3, %v2355_v34, %v2356_v4  ;;  %v2384_v47 = vadd.f32 %v2354_v15, %v2307_v16  ;;  %v2451_v39 = vrot.slane %v2419_v37, 1  ;;  %v2453_v48 = vrot.slane %v2420_v46, 1  ;;  %v4198_v37 = vld [vmem:[%s6427_s5 + $0x18] sm:$0xff]  }
 0x2a8   : > { %v2308_v60 = vadd.f32 %v2280_v63, %v2231_v23  ;;  %v2454_v61 = vrot.slane %v2421_v33, 1  ;;  %v2497_v44 = vmul.f32 %v5626_v9, %v5350_v52  ;;  %v2498_v17 = vmul.f32 %v5637_v43, %v5350_v52 }
 0x2aa   : > { %v2385_v57 = vadd.f32 %v2357_v11, %v2308_v60  ;;  %v2455_v23 = vsel %vm627_vm2, %v2453_v48, %v2454_v61  ;;  %v2531_v63 = vrot.slane %v2498_v17, 2 }
 0x2ac   : > { %v4246_v58 = vpop.eup %4245  ;;  %v2406_v8 = vadd.f32 %v2398_v55, %v2385_v57 }
 0x2ad   : > { %v4248_v14 = vpop.eup %4247  ;;  %v2636_v53 = vmul.f32 %v4246_v58, %v2580_v19  ;;  %v2418_v19 = vmul.f32 %v5600_v12, %v5333_v32  ;;  %v2496_v58 = vmul.f32 %v5604_v24, %v5350_v52 }
 0x2ae   : > { %v2637_v0 = vmul.f32 %v4248_v14, %v2581_v29  ;;  %v2397_v29 = vmul.f32 %v5600_v12, %v5460_v42  ;;  %v2527_v14 = vrot.slane %v2495_v35, 2  ;;  %v2483_v2 = vadd.f32 %v2455_v23, %v2406_v8 }
 0x2af   : > { %v2450_v40 = vrot.slane %v2418_v19, 1  ;;  %v2528_v49 = vrot.slane %v2496_v58, 2 }
 0x2b0   : > { %v2641_v18 = vpack.c.bf16 %v2637_v0, %v2636_v53  ;;  %v2405_v1 = vadd.f32 %v2397_v29, %v2384_v47  ;;  %v4196_v53 = vld [vmem:[%s6427_s5 + $0x8] sm:$0xff]   ;;  %v2530_v0 = vrot.slane %v2497_v44, 2 }
 0x2b1   : > { %v2452_v20 = vsel %vm627_vm2, %v2450_v40, %v2451_v39  ;;  %4053 = vmatprep.subr.bf16.mxu0 %v4196_v53  ;;  %v2529_v41 = vsel %vm664_vm3, %v2527_v14, %v2528_v49  ;;  %v2073_v49 = vmul.f32 %v5604_v24, %v5322_v51 }
 0x2b2   : > { %4074 = vmatmul.mubr.msk.bf16.vlgmr.msra.gmra.mrb[32].mxu1 %vm556_vm0, %v2641_v18  ;;  %v2482_v13 = vadd.f32 %v2452_v20, %v2405_v1  ;;  %4054 = vmatpush3.bf16.msra.mxu0 %v4196_v53  ;;  %v2532_v16 = vsel %vm664_vm3, %v2530_v0, %v2531_v63  ;;  %v2075_v0 = vmul.f32 %v5637_v43, %v5322_v51 }
 0x2b3   : > { %v2560_v34 = vadd.f32 %v2532_v16, %v2483_v2  ;;  %4055 = vmatprep.subr.bf16.mxu0 %v4197_v31  ;;  %v2072_v2 = vmul.f32 %v5600_v12, %v5322_v51  ;;  %v2074_v63 = vmul.f32 %v5626_v9, %v5322_v51 }
 0x2b4   : > { %v2559_v60 = vadd.f32 %v2529_v41, %v2482_v13  ;;  %v2107_v41 = vrot.slane %v2073_v49, 1  ;;  %v2110_v16 = vrot.slane %v2075_v0, 1  ;;  %v2224_v0 = vmul.f32 %v5626_v9, %v5425_v10 }
 0x2b5   : > { %v5577_v50 = vpop.f32.mrb[20].mxu0  ;;  %v2575_v4 = vadd.f32 %v5494_v62, %v2560_v34  ;;  %v2109_v34 = vrot.slane %v2074_v63, 1 }
 0x2b6   : > { %v5580_v21 = vpop.f32.mrb[21].mxu0  ;;  %v2574_v18 = vadd.f32 %v5494_v62, %v2559_v60  ;;  %4056 = vmatpush3.bf16.msra.mxu0 %v4197_v31  ;;  %v2106_v31 = vrot.slane %v2072_v2, 1  ;;  %v2225_v2 = vmul.f32 %v5374_v6, %v5425_v10 }
 0x2b7   : > { %v5583_v7 = vpop.f32.mrb[22].mxu0  ;;  %v2583_v15 = vsub.f32 0.0, %v2575_v4  ;;  %4057 = vmatprep.subr.bf16.mxu0 %v4198_v37 }
 0x2b8   : > { %v5586_v56 = vpop.f32.mrb[23].mxu0  ;;  %v2582_v19 = vsub.f32 0.0, %v2574_v18 }
 0x2b9   : > { %v2592_v55 = vmul.f32 1.442695, %v2583_v15  ;;  %v2152_v15 = vmul.f32 %v5637_v43, %v5416_v27 }
 0x2ba   : > { %v2590_v29 = vmul.f32 1.442695, %v2582_v19  ;;  %4058 = vmatpush3.bf16.msra.mxu0 %v4198_v37  ;;  %v2149_v19 = vmul.f32 %v5600_v12, %v5416_v27  ;;  %v2151_v37 = vmul.f32 %v5626_v9, %v5416_v27 }
 0x2bb   : > { %4067 = vmatprep.subr.bf16.mxu0 %v5575_v22 }
 0x2bc   : > { %4249 = vpow2.f32 %v2590_v29 }
 0x2bd   : > { %4251 = vpow2.f32 %v2592_v55 }
 0x2c6   : > { %v4250_v46 = vpop.eup %4249 }
 0x2c7   : > { %v4252_v38 = vpop.eup %4251  ;;  %v2606_v11 = vadd.f32 1.0, %v4250_v46  ;;  %v2049_v46 = vmul.f32 %v5600_v12, %v5407_v26  ;;  %v2247_v12 = vmul.f32 %v5626_v9, %v5312_v25 }
 0x2c8   : > { %v2607_v47 = vadd.f32 1.0, %v4252_v38 }
 0x2c9   : > { %4253 = vrcp.f32 %v2606_v11  ;;  %v2108_v11 = vsel %vm627_vm2, %v2106_v31, %v2107_v41  ;;  %v2281_v63 = vrot.slane %v2247_v12, 1 }
 0x2ca   : > { %4255 = vrcp.f32 %v2607_v47  ;;  %v2111_v47 = vsel %vm627_vm2, %v2109_v34, %v2110_v16  ;;  %v2324_v16 = vmul.f32 %v5626_v9, %v5317_v3 }
 0x2d3   : > { %v4254_v33 = vpop.eup %4253 }
 0x2d4   : > { %v4256_v40 = vpop.eup %4255  ;;  %v5665_v57 = vmul.f32 %v4254_v33, %v2574_v18  ;;  %v2150_v18 = vmul.f32 %v5604_v24, %v5416_v27  ;;  %v2050_v24 = vmul.f32 %v5626_v9, %v5407_v26  ;;  %v2183_v33 = vrot.slane %v2149_v19, 2 }
 0x2d5   : > { %v5667_v39 = vmul.f32 %v4256_v40, %v2575_v4  ;;  %v2187_v27 = vrot.slane %v2152_v15, 2  ;;  %v2248_v26 = vmul.f32 %v5637_v43, %v5312_v25 }
 0x2d6   : > { %v2184_v40 = vrot.slane %v2150_v18, 2 }
 0x2d7   : > { %v2638_v48 = vpack.c.bf16 %v5667_v39, %v5665_v57  ;;  %v2282_v41 = vrot.slane %v2248_v26, 1  ;;  %v2399_v26 = vmul.f32 %v5374_v6, %v5460_v42 }
 0x2d9   : > { %v2283_v9 = vsel %vm627_vm2, %v2281_v63, %v2282_v41  ;;  %v2400_v63 = vmul.f32 %v5382_v45, %v5460_v42  ;;  %v2501_v42 = vmul.f32 %v5382_v45, %v5350_v52 }
 0x2fc   : > { %v3940_v35 = vpop.f32.mrb[0].mxu1 }
 0x2fd   : > { %v3941_v1 = vpop.f32.mrb[1].mxu1 }
 0x2fe   : > { %v5671_v61 = vadd.f32 %v3941_v1, %v3940_v35  ;;  %v3943_v58 = vpop.f32.mrb[2].mxu1  ;;  %v2186_v35 = vrot.slane %v2151_v37, 2  ;;  %v2134_v1 = vadd.f32 %v2108_v11, %v2049_v46  ;;  %v2358_v46 = vrot.slane %v2324_v16, 2 }
 0x2ff   : > { %v3944_v44 = vpop.f32.mrb[3].mxu1 }
 0x300   : > { %v5673_v8 = vadd.f32 %v3944_v44, %v3943_v58  ;;  %v2135_v58 = vadd.f32 %v2111_v47, %v2050_v24  ;;  %v2185_v44 = vsel %vm664_vm3, %v2183_v33, %v2184_v40 }
 0x30a   : > { %v3946_v20 = vpop.f32.mrb[4].mxu1 }
 0x30b   : > { %v3947_v17 = vpop.f32.mrb[5].mxu1 }
 0x30c   : > { %v5675_v14 = vadd.f32 %v3947_v17, %v3946_v20  ;;  %v3949_v53 = vpop.f32.mrb[6].mxu1  ;;  %v2188_v20 = vsel %vm664_vm3, %v2186_v35, %v2187_v27  ;;  %v2249_v17 = vmul.f32 %v5374_v6, %v5312_v25 }
 0x30d   : > { %v3950_v23 = vpop.f32.mrb[7].mxu1  ;;  %v2212_v49 = vadd.f32 %v2188_v20, %v2135_v58  ;;  %v2423_v20 = vmul.f32 %v5378_v59, %v5333_v32 }
 0x30e   : > { %v5677_v13 = vadd.f32 %v3950_v23, %v3949_v53  ;;  %v2250_v53 = vmul.f32 %v5378_v59, %v5312_v25  ;;  %v2211_v23 = vadd.f32 %v2185_v44, %v2134_v1  ;;  %v2284_v34 = vrot.slane %v2249_v17, 1 }
 0x30f   : > { %v2326_v25 = vmul.f32 %v5374_v6, %v5317_v3  ;;  %v2422_v1 = vmul.f32 %v5374_v6, %v5333_v32  ;;  %v2424_v17 = vmul.f32 %v5382_v45, %v5333_v32 }
 0x310   : > { %v2285_v18 = vrot.slane %v2250_v53, 1  ;;  %v2232_v15 = vadd.f32 %v2224_v0, %v2211_v23  ;;  %v2425_v53 = vmul.f32 %v5386_v36, %v5333_v32 }
 0x311   : > { %v2361_v47 = vrot.slane %v2326_v25, 2  ;;  %v2457_v25 = vrot.slane %v2423_v20, 1 }
 0x312   : > { %v2286_v11 = vsel %vm627_vm2, %v2284_v34, %v2285_v18  ;;  %v2309_v40 = vadd.f32 %v2283_v9, %v2232_v15  ;;  %v2500_v34 = vmul.f32 %v5378_v59, %v5350_v52 }
 0x318   : > { %v3952_v60 = vpop.f32.mrb[8].mxu1 }
 0x319   : > { %v3953_v4 = vpop.f32.mrb[9].mxu1 }
 0x31a   : > { %v5695_v29 = vadd.f32 %v3953_v4, %v3952_v60  ;;  %v3955_v51 = vpop.f32.mrb[10].mxu1  ;;  %v2325_v60 = vmul.f32 %v5637_v43, %v5317_v3  ;;  %v2327_v4 = vmul.f32 %v5378_v59, %v5317_v3  ;;  %v5736_v3 = vld [vmem:[%s6426_s4] ss:$0 sm:$0xff] }
 0x31b   : > { %v3956_v55 = vpop.f32.mrb[11].mxu1  ;;  %v1706_v23 = vadd.f32 %v5671_v61, %v5736_v3  ;;  %v1709_v32 = vadd.f32 %v5673_v8, %v5736_v3 }
 0x31c   : > { %v5699_v38 = vadd.f32 %v3956_v55, %v3955_v51  ;;  %v2233_v55 = vadd.f32 %v2225_v2, %v2212_v49  ;;  %v2359_v43 = vrot.slane %v2325_v60, 2  ;;  %v2362_v33 = vrot.slane %v2327_v4, 2 }
 0x31d   : > { %v2456_v60 = vrot.slane %v2422_v1, 1  ;;  %v2459_v4 = vrot.slane %v2424_v17, 1 }
 0x31e   : > { %v2310_v35 = vadd.f32 %v2286_v11, %v2233_v55  ;;  %v2360_v27 = vsel %vm664_vm3, %v2358_v46, %v2359_v43  ;;  %v2363_v44 = vsel %vm664_vm3, %v2361_v47, %v2362_v33  ;;  %v2534_v55 = vrot.slane %v2500_v34, 2 }
 0x31f   : > { %v2386_v2 = vadd.f32 %v2360_v27, %v2309_v40  ;;  %v2458_v43 = vsel %vm627_vm2, %v2456_v60, %v2457_v25 }
 0x320   : > { %v2387_v16 = vadd.f32 %v2363_v44, %v2310_v35 }
 0x322   : > { %v2408_v45 = vadd.f32 %v2400_v63, %v2387_v16  ;;  %v1722_v16 = vadd.f32 %v5695_v29, %v5736_v3 }
 0x326   : > { %v3958_v31 = vpop.f32.mrb[12].mxu1 }
 0x327   : > { %v3959_v19 = vpop.f32.mrb[13].mxu1 }
 0x328   : > { %v5727_v37 = vadd.f32 %v3959_v19, %v3958_v31  ;;  %v3961_v10 = vpop.f32.mrb[14].mxu1  ;;  %v2499_v31 = vmul.f32 %v5374_v6, %v5350_v52  ;;  %v2460_v19 = vrot.slane %v2425_v53, 1 }
 0x329   : > { %v3962_v51 = vpop.f32.mrb[15].mxu1 }
 0x32a   : > { %v5730_v24 = vadd.f32 %v3962_v51, %v3961_v10  ;;  %v2502_v10 = vmul.f32 %v5386_v36, %v5350_v52  ;;  %v2407_v51 = vadd.f32 %v2399_v26, %v2386_v2  ;;  %v2533_v59 = vrot.slane %v2499_v31, 2 }
 0x32b   : > { %v2461_v47 = vsel %vm627_vm2, %v2459_v4, %v2460_v19  ;;  %v2536_v52 = vrot.slane %v2501_v42, 2 }
 0x32c   : > { %v2537_v36 = vrot.slane %v2502_v10, 2  ;;  %v2535_v44 = vsel %vm664_vm3, %v2533_v59, %v2534_v55  ;;  %v2485_v17 = vadd.f32 %v2461_v47, %v2408_v45 }
 0x32e   : > { %v3980_v58 = vpop.f32.mrb[16].mxu1 }
 0x32f   : > { %v3981_v12 = vpop.f32.mrb[17].mxu1 }
 0x330   : > { %v3982_v49 = vadd.f32 %v3981_v12, %v3980_v58  ;;  %v3983_v0 = vpop.f32.mrb[18].mxu1  ;;  %v2484_v58 = vadd.f32 %v2458_v43, %v2407_v51 }
 0x331   : > { %v3984_v41 = vpop.f32.mrb[19].mxu1 }
 0x332   : > { %v1771_v18 = vadd.f32 %v3982_v49, %v1706_v23  ;;  %v3985_v61 = vadd.f32 %v3984_v41, %v3983_v0  ;;  %v2538_v23 = vsel %vm664_vm3, %v2536_v52, %v2537_v36  ;;  %v2561_v49 = vadd.f32 %v2535_v44, %v2484_v58 }
 0x333   : > { %v2562_v41 = vadd.f32 %v2538_v23, %v2485_v17  ;;  %v1733_v36 = vadd.f32 %v5730_v24, %v5736_v3 }
 0x334   : > { %v5765_v15 = vadd.f32 %v5556_v30, %v1771_v18  ;;  %v1774_v6 = vadd.f32 %v3985_v61, %v1709_v32  ;;  %v1714_v30 = vadd.f32 %v5675_v14, %v5736_v3  ;;  %v1725_v32 = vadd.f32 %v5699_v38, %v5736_v3 }
 0x335   : > { %v5793_v61 = vadd.f32 %v5494_v62, %v2561_v49  ;;  %v5796_v19 = vadd.f32 %v5494_v62, %v2562_v41 }
 0x336   : > { %v1866_v8 = vsub.f32 0.0, %v5765_v15  ;;  %v5769_v9 = vadd.f32 %v5563_v54, %v1774_v6  ;;  %v3986_v46 = vpop.f32.mrb[20].mxu1  ;;  %v1717_v54 = vadd.f32 %v5677_v13, %v5736_v3 }
 0x337   : > { %v3987_v11 = vpop.f32.mrb[21].mxu1  ;;  %v2584_v38 = vsub.f32 0.0, %v5793_v61  ;;  %v2585_v43 = vsub.f32 0.0, %v5796_v19 }
 0x338   : > { %v1874_v33 = vmul.f32 1.442695, %v1866_v8  ;;  %v1867_v40 = vsub.f32 0.0, %v5769_v9  ;;  %v3988_v35 = vadd.f32 %v3987_v11, %v3986_v46  ;;  %v3989_v27 = vpop.f32.mrb[22].mxu1 }
 0x339   : > { %v3990_v1 = vpop.f32.mrb[23].mxu1 }
 0x33a   : > { %4257 = vpow2.f32 %v1874_v33  ;;  %v1876_v20 = vmul.f32 1.442695, %v1867_v40  ;;  %v1779_v12 = vadd.f32 %v3988_v35, %v1714_v30  ;;  %v3991_v26 = vadd.f32 %v3990_v1, %v3989_v27 }
 0x33b   : > { %v2594_v30 = vmul.f32 1.442695, %v2584_v38  ;;  %v2596_v1 = vmul.f32 1.442695, %v2585_v43 }
 0x33c   : > { %4259 = vpow2.f32 %v1876_v20  ;;  %v5780_v14 = vadd.f32 %v5550_v28, %v1779_v12  ;;  %v1782_v53 = vadd.f32 %v3991_v26, %v1717_v54 }
 0x33e   : > { %v1868_v0 = vsub.f32 0.0, %v5780_v14  ;;  %v5785_v13 = vadd.f32 %v5561_v5, %v1782_v53  ;;  %v3992_v2 = vpop.f32.mrb[24].mxu1 }
 0x33f   : > { %v3993_v63 = vpop.f32.mrb[25].mxu1 }
 0x340   : > { %v1878_v60 = vmul.f32 1.442695, %v1868_v0  ;;  %v1869_v31 = vsub.f32 0.0, %v5785_v13  ;;  %v3994_v28 = vadd.f32 %v3993_v63, %v3992_v2  ;;  %v3995_v34 = vpop.f32.mrb[26].mxu1 }
 0x341   : > { %v3996_v18 = vpop.f32.mrb[27].mxu1 }
 0x342   : > { %4261 = vpow2.f32 %v1878_v60  ;;  %v1880_v5 = vmul.f32 1.442695, %v1869_v31  ;;  %v1787_v25 = vadd.f32 %v3994_v28, %v1722_v16  ;;  %v3997_v4 = vadd.f32 %v3996_v18, %v3995_v34 }
 0x344   : > { %v4258_v29 = vpop.eup %4257  ;;  %4263 = vpow2.f32 %v1880_v5  ;;  %v5799_v42 = vadd.f32 %v5580_v21, %v1787_v25  ;;  %v1790_v10 = vadd.f32 %v3997_v4, %v1725_v32  ;;  %v1730_v21 = vadd.f32 %v5727_v37, %v5736_v3 }
 0x345   : > { %v1890_v6 = vadd.f32 1.0, %v4258_v29 }
 0x346   : > { %v4260_v51 = vpop.eup %4259  ;;  %v1870_v59 = vsub.f32 0.0, %v5799_v42  ;;  %v5804_v55 = vadd.f32 %v5586_v56, %v1790_v10  ;;  %v3998_v8 = vpop.f32.mrb[28].mxu1 }
 0x347   : > { %4265 = vrcp.f32 %v1890_v6  ;;  %v1891_v46 = vadd.f32 1.0, %v4260_v51  ;;  %v3999_v62 = vpop.f32.mrb[29].mxu1 }
 0x348   : > { %v1882_v11 = vmul.f32 1.442695, %v1870_v59  ;;  %v1871_v45 = vsub.f32 0.0, %v5804_v55  ;;  %v4000_v47 = vadd.f32 %v3999_v62, %v3998_v8  ;;  %v4001_v52 = vpop.f32.mrb[30].mxu1 }
 0x349   : > { %4267 = vrcp.f32 %v1891_v46  ;;  %v4002_v56 = vpop.f32.mrb[31].mxu1 }
 0x34a   : > { %4269 = vpow2.f32 %v1882_v11  ;;  %v1884_v33 = vmul.f32 1.442695, %v1871_v45  ;;  %v1795_v40 = vadd.f32 %v4000_v47, %v1730_v21  ;;  %v4003_v35 = vadd.f32 %v4002_v56, %v4001_v52 }
 0x34c   : > { %v4262_v27 = vpop.eup %4261  ;;  %4271 = vpow2.f32 %v1884_v33  ;;  %v1860_v54 = vadd.f32 %v5577_v50, %v1795_v40  ;;  %v1798_v37 = vadd.f32 %v4003_v35, %v1733_v36 }
 0x34d   : > { %v1892_v58 = vadd.f32 1.0, %v4262_v27  ;;  %4273 = vpow2.f32 %v2594_v30 }
 0x34e   : > { %v4264_v44 = vpop.eup %4263  ;;  %v1872_v20 = vsub.f32 0.0, %v1860_v54  ;;  %v1863_v12 = vadd.f32 %v5583_v7, %v1798_v37 }
 0x34f   : > { %4275 = vrcp.f32 %v1892_v58  ;;  %v1893_v24 = vadd.f32 1.0, %v4264_v44 }
 0x350   : > { %v1886_v3 = vmul.f32 1.442695, %v1872_v20  ;;  %v1873_v26 = vsub.f32 0.0, %v1863_v12  ;;  %4277 = vpow2.f32 %v2596_v1 }
 0x351   : > { %v4266_v17 = vpop.eup %4265  ;;  %4279 = vrcp.f32 %v1893_v24 }
 0x352   : > { %4281 = vpow2.f32 %v1886_v3  ;;  %v1888_v53 = vmul.f32 1.442695, %v1873_v26  ;;  %v1914_v50 = vmul.f32 %v4266_v17, %v5765_v15 }
 0x353   : > { %v4268_v23 = vpop.eup %4267 }
 0x354   : > { %v4270_v49 = vpop.eup %4269  ;;  %v1915_v0 = vmul.f32 %v4268_v23, %v5769_v9  ;;  %4283 = vpow2.f32 %v1888_v53 }
 0x355   : > { %v1894_v2 = vadd.f32 1.0, %v4270_v49 }
 0x356   : > { %v4272_v63 = vpop.eup %4271  ;;  %v1922_v7 = vpack.c.bf16 %v1915_v0, %v1914_v50 }
 0x357   : > { %4285 = vrcp.f32 %v1894_v2  ;;  %v1895_v41 = vadd.f32 1.0, %v4272_v63  ;;  %v4274_v16 = vpop.eup %4273  ;;  %v4199_v63 = vld [vmem:[%s6435_s13] sm:$0xff]  }
 0x358   : > { %4059 = vmatprep.mubr.msk.bf16.mxu0 %vm847_vm4, %v1922_v7  ;;  %v2608_v25 = vadd.f32 1.0, %v4274_v16 }
 0x359   : > { %v4276_v60 = vpop.eup %4275  ;;  %4287 = vrcp.f32 %v1895_v41 }
 0x35a   : > { %v4278_v31 = vpop.eup %4277  ;;  %v1916_v32 = vmul.f32 %v4276_v60, %v5780_v14 }
 0x35b   : > { %v4280_v28 = vpop.eup %4279  ;;  %v2609_v29 = vadd.f32 1.0, %v4278_v31 }
 0x35c   : > { %v4282_v34 = vpop.eup %4281  ;;  %v1917_v15 = vmul.f32 %v4280_v28, %v5785_v13  ;;  %v5861_v28 = vld [vmem:[%s6433_s11 + $0x1] ss:$0 sm:$0xff] }
 0x35d   : > { %v1896_v18 = vadd.f32 1.0, %v4282_v34 }
 0x35e   : > { %v4284_v9 = vpop.eup %4283  ;;  %v1923_v5 = vpack.c.bf16 %v1917_v15, %v1916_v32 }
 0x35f   : > { %4289 = vrcp.f32 %v1896_v18  ;;  %v1897_v4 = vadd.f32 1.0, %v4284_v9  ;;  %v5872_v18 = vld [vmem:[%s6433_s11 + $0x2] ss:$0 sm:$0xff]  ;;  %v5877_v9 = vld [vmem:[%s6433_s11] ss:$0 sm:$0xff] }
 0x360   : > { %4060 = vmatmul.mubr.msk.bf16.vlgmr.msra.gmra.mrb[24].mxu0 %vm847_vm4, %v1923_v5 }
 0x361   : > { %v4286_v10 = vpop.eup %4285  ;;  %4291 = vrcp.f32 %v1897_v4  ;;  %4068 = vmatpush3.bf16.msra.mxu0 %v5575_v22 }
 0x362   : > { %4293 = vrcp.f32 %v2608_v25  ;;  %v1918_v14 = vmul.f32 %v4286_v10, %v5799_v42  ;;  %4077 = vmatprep.subr.bf16.mxu0 %v4199_v63 }
 0x363   : > { %v4288_v6 = vpop.eup %4287  ;;  %4295 = vrcp.f32 %v2609_v29 }
 0x364   : > { %v1919_v13 = vmul.f32 %v4288_v6, %v5804_v55  ;;  %v5835_v55 = vld [vmem:[%s6432_s10] ss:$0 sm:$0xff] }
 0x366   : > { %v1924_v38 = vpack.c.bf16 %v1919_v13, %v1918_v14 }
 0x368   : > { %4063 = vmatprep.mubr.msk.bf16.mxu0 %vm847_vm4, %v1924_v38 }
 0x369   : > { %v4290_v51 = vpop.eup %4289 }
 0x36a   : > { %v1920_v46 = vmul.f32 %v4290_v51, %v1860_v54 }
 0x36b   : > { %v4292_v59 = vpop.eup %4291 }
 0x36c   : > { %v4294_v8 = vpop.eup %4293  ;;  %v1921_v62 = vmul.f32 %v4292_v59, %v1863_v12 }
 0x36d   : > { %v4296_v43 = vpop.eup %4295  ;;  %v2632_v22 = vmul.f32 %v4294_v8, %v5793_v61 }
 0x36e   : > { %v1925_v21 = vpack.c.bf16 %v1921_v62, %v1920_v46  ;;  %v2633_v11 = vmul.f32 %v4296_v43, %v5796_v19 }
 0x370   : > { %4064 = vmatmul.mubr.msk.bf16.gmra.mrb[28].mxu0 %vm847_vm4, %v1925_v21  ;;  %v2639_v42 = vpack.c.bf16 %v2633_v11, %v2632_v22 }
 0x371   : > { %4069 = vmatprep.mubr.msk.bf16.mxu0 %vm556_vm0, %v2638_v48 }
 0x378   : > { %4070 = vmatmul.mubr.msk.bf16.vlgmr.msra.gmra.mrb[32].mxu0 %vm556_vm0, %v2639_v42 }
 0x379   : > { %4078 = vmatpush3.bf16.msra.mxu0 %v4199_v63 }
 0x385   : > { %v4075_v45 = vpop.f32.mrb[32].mxu1 }
 0x386   : > { %v2728_v47 = vadd.f32 %v4075_v45, %v5835_v55  ;;  %v2719_v52 = vpop.f32.mrb[33].mxu1  ;;  %v5911_v45 = vld [vmem:[%s6433_s11 + $0x4] ss:$0 sm:$0xff] }
 0x387   : > { %v2720_v61 = vadd.f32 %v5835_v55, %v2719_v52  ;;  %v4076_v19 = vpop.f32.mrb[34].mxu1 }
 0x388   : > { %v2740_v36 = vsub.f32 0.0, %v2728_v47  ;;  %v2731_v57 = vadd.f32 %v4076_v19, %v5835_v55  ;;  %v2722_v39 = vpop.f32.mrb[35].mxu1 }
 0x389   : > { %v2738_v48 = vsub.f32 0.0, %v2720_v61  ;;  %v2723_v56 = vadd.f32 %v5835_v55, %v2722_v39  ;;  %v5918_v39 = vld [vmem:[%s6433_s11 + $0x3] ss:$0 sm:$0xff] }
 0x38a   : > { %v2754_v30 = vmul.f32 1.442695, %v2740_v36  ;;  %v2741_v33 = vsub.f32 0.0, %v2731_v57 }
 0x38b   : > { %v2750_v40 = vmul.f32 1.442695, %v2738_v48  ;;  %v2739_v35 = vsub.f32 0.0, %v2723_v56 }
 0x38c   : > { %4297 = vpow2.f32 %v2754_v30  ;;  %v2756_v27 = vmul.f32 1.442695, %v2741_v33 }
 0x38d   : > { %4299 = vpow2.f32 %v2750_v40  ;;  %v2752_v54 = vmul.f32 1.442695, %v2739_v35 }
 0x38e   : > { %4301 = vpow2.f32 %v2756_v27 }
 0x38f   : > { %4303 = vpow2.f32 %v2752_v54 }
 0x396   : > { %v4298_v37 = vpop.eup %4297 }
 0x397   : > { %v4300_v1 = vpop.eup %4299  ;;  %v2764_v58 = vadd.f32 1.0, %v4298_v37 }
 0x398   : > { %v4302_v44 = vpop.eup %4301  ;;  %v2762_v20 = vadd.f32 1.0, %v4300_v1 }
 0x399   : > { %v4304_v12 = vpop.eup %4303  ;;  %4305 = vrcp.f32 %v2764_v58  ;;  %v2765_v24 = vadd.f32 1.0, %v4302_v44  ;;  %v5940_v58 = vld [vmem:[%s6433_s11 + $0x5] ss:$0 sm:$0xff] }
 0x39a   : > { %4307 = vrcp.f32 %v2762_v20  ;;  %v2763_v3 = vadd.f32 1.0, %v4304_v12 }
 0x39b   : > { %4309 = vrcp.f32 %v2765_v24 }
 0x39c   : > { %4311 = vrcp.f32 %v2763_v3 }
 0x3a3   : > { %v4306_v26 = vpop.eup %4305 }
 0x3a4   : > { %v4308_v17 = vpop.eup %4307  ;;  %v2788_v53 = vmul.f32 %v4306_v26, %v2728_v47 }
 0x3a5   : > { %v4310_v23 = vpop.eup %4309  ;;  %v2786_v49 = vmul.f32 %v4308_v17, %v2720_v61 }
 0x3a6   : > { %v4312_v50 = vpop.eup %4311  ;;  %2817 = vst.msk [vmem:[#allocation4 + $0x71] sm:$0xff] %vm556_vm0, %v2788_v53  ;;  %v2789_v0 = vmul.f32 %v4310_v23, %v2731_v57 }
 0x3a7   : > { %2815 = vst.msk [vmem:[#allocation4 + $0x51] sm:$0xff] %vm556_vm0, %v2786_v49  ;;  %v2787_v2 = vmul.f32 %v4312_v50, %v2723_v56 }
 0x3a8   : > { %2818 = vst.msk [vmem:[#allocation4 + $0x81] sm:$0xff] %vm556_vm0, %v2789_v0 }
 0x3a9   : > { %2816 = vst.msk [vmem:[#allocation4 + $0x61] sm:$0xff] %vm556_vm0, %v2787_v2 }
 0x3ad   : > { %v5883_v4 = vld [vmem:[#allocation4 + $0x70] sm:$0xff]  ;;  %v5885_v29 = vld [vmem:[#allocation4 + $0x78] sm:$0x3] }
 0x3ae   : > { %v5856_v31 = vld [vmem:[#allocation4 + $0x50] sm:$0xff]  ;;  %v5863_v34 = vld [vmem:[#allocation4 + $0x58] sm:$0x3]  ;;  %v2879_v46 = vmul.f32 %v5861_v28, %v5883_v4  ;;  %v2880_v62 = vmul.f32 %v5861_v28, %v5885_v29  ;;  %v2956_v35 = vmul.f32 %v5872_v18, %v5883_v4  ;;  %v2957_v27 = vmul.f32 %v5872_v18, %v5885_v29 }
 0x3af   : > { %v2875_v32 = vmul.f32 %v5861_v28, %v5856_v31  ;;  %v2876_v15 = vmul.f32 %v5861_v28, %v5863_v34  ;;  %v2952_v14 = vmul.f32 %v5872_v18, %v5856_v31  ;;  %v2953_v13 = vmul.f32 %v5872_v18, %v5863_v34 }
 0x3b0   : > { %v5879_v5 = vld [vmem:[#allocation4 + $0x60] sm:$0xff]  ;;  %v5881_v25 = vld [vmem:[#allocation4 + $0x68] sm:$0x3]  ;;  %v2849_v59 = vmul.f32 %v5877_v9, %v5856_v31  ;;  %v2918_v36 = vrot.slane %v2879_v46, 1  ;;  %v2919_v57 = vrot.slane %v2880_v62, 1  ;;  %v2851_v37 = vmul.f32 %v5877_v9, %v5883_v4 }
 0x3b1   : > { %v2912_v10 = vrot.slane %v2875_v32, 1  ;;  %v2913_v6 = vrot.slane %v2876_v15, 1  ;;  %v2877_v38 = vmul.f32 %v5861_v28, %v5879_v5  ;;  %v2878_v8 = vmul.f32 %v5861_v28, %v5881_v25 }
 0x3b2   : > { %v2989_v22 = vrot.slane %v2952_v14, 2  ;;  %v2990_v11 = vrot.slane %v2953_v13, 2  ;;  %v3050_v56 = vmul.f32 %v5911_v45, %v5879_v5  ;;  %v3051_v30 = vmul.f32 %v5911_v45, %v5881_v25 }
 0x3b3   : > { %v2914_v21 = vsel %vm627_vm2, %v2912_v10, %v2913_v6  ;;  %v2915_v52 = vrot.slane %v2877_v38, 1  ;;  %v2916_v19 = vrot.slane %v2878_v8, 1  ;;  %v2954_v33 = vmul.f32 %v5872_v18, %v5879_v5 }
 0x3b4   : > { %v2934_v61 = vadd.f32 %v2914_v21, %v2849_v59  ;;  %v2991_v48 = vsel %vm664_vm3, %v2989_v22, %v2990_v11  ;;  %v2955_v40 = vmul.f32 %v5872_v18, %v5881_v25  ;;  %v2850_v54 = vmul.f32 %v5877_v9, %v5879_v5  ;;  %v5966_v22 = vld [vmem:[#allocation4 + $0x80] sm:$0xff]  ;;  %v5968_v11 = vld [vmem:[#allocation4 + $0x88] sm:$0x3] }
 0x3b5   : > { %v3024_v20 = vmul.f32 %v5918_v39, %v5879_v5  ;;  %v2917_v12 = vsel %vm627_vm2, %v2915_v52, %v2916_v19  ;;  %v2920_v24 = vsel %vm627_vm2, %v2918_v36, %v2919_v57  ;;  %v3087_v17 = vrot.slane %v3050_v56, 1 }
 0x3b6   : > { %v3011_v44 = vadd.f32 %v2991_v48, %v2934_v61  ;;  %v3088_v53 = vrot.slane %v3051_v30, 1  ;;  %v2992_v23 = vrot.slane %v2954_v33, 2  ;;  %v2993_v0 = vrot.slane %v2955_v40, 2 }
 0x3b7   : > { %v2995_v2 = vrot.slane %v2956_v35, 2  ;;  %v2996_v63 = vrot.slane %v2957_v27, 2  ;;  %v3127_v6 = vmul.f32 %v5940_v58, %v5879_v5  ;;  %v2935_v14 = vadd.f32 %v2917_v12, %v2850_v54 }
 0x3b8   : > { %v3032_v59 = vadd.f32 %v3024_v20, %v3011_v44  ;;  %v3128_v8 = vmul.f32 %v5940_v58, %v5881_v25  ;;  %v3089_v21 = vsel %vm627_vm2, %v3087_v17, %v3088_v53  ;;  %v2936_v52 = vadd.f32 %v2920_v24, %v2851_v37  ;;  %v5986_v37 = vld [vmem:[%s6433_s11 + $0x7] ss:$0 sm:$0xff] }
 0x3b9   : > { %v2997_v36 = vsel %vm664_vm3, %v2995_v2, %v2996_v63  ;;  %v3052_v48 = vmul.f32 %v5911_v45, %v5883_v4  ;;  %v3053_v56 = vmul.f32 %v5911_v45, %v5885_v29  ;;  %v3054_v33 = vmul.f32 %v5911_v45, %v5966_v22  ;;  %v6005_v63 = vld [vmem:[%s6433_s11 + $0x6] ss:$0 sm:$0xff] }
 0x3ba   : > { %v3055_v40 = vmul.f32 %v5911_v45, %v5968_v11  ;;  %v3164_v35 = vrot.slane %v3127_v6, 2  ;;  %v3165_v27 = vrot.slane %v3128_v8, 2  ;;  %v3025_v54 = vmul.f32 %v5918_v39, %v5883_v4 }
 0x3bb   : > { %v3013_v44 = vadd.f32 %v2997_v36, %v2936_v52  ;;  %v3026_v20 = vmul.f32 %v5918_v39, %v5966_v22  ;;  %v3090_v12 = vrot.slane %v3052_v48, 1  ;;  %v3091_v24 = vrot.slane %v3053_v56, 1  ;;  %v2819_v48 = vld [vmem:[#allocation4] sm:$0xff]  ;;  %v2820_v56 = vld [vmem:[#allocation4 + $0x8] sm:$0x3] }
 0x3bc   : > { %v3130_v17 = vmul.f32 %v5940_v58, %v5885_v29  ;;  %v3093_v53 = vrot.slane %v3054_v33, 1  ;;  %v6000_v2 = vmul.f32 %v5986_v37, %v5885_v29  ;;  %v3131_v6 = vmul.f32 %v5940_v58, %v5966_v22 }
 0x3be   : > { %v3170_v33 = vrot.slane %v3131_v6, 2 }
 0x433   : > { %v5848_v7 = vpop.f32.mrb[24].mxu0 }
 0x434   : > { %v5850_v41 = vpop.f32.mrb[25].mxu0 }
 0x435   : > { %v5852_v16 = vpop.f32.mrb[26].mxu0 }
 0x436   : > { %v5854_v60 = vpop.f32.mrb[27].mxu0 }
 0x443   : > { %v5893_v51 = vpop.f32.mrb[28].mxu0 }
 0x444   : > { %v5903_v43 = vpop.f32.mrb[29].mxu0 }
 0x445   : > { %v5906_v42 = vpop.f32.mrb[30].mxu0 }
 0x446   : > { %v5913_v47 = vpop.f32.mrb[31].mxu0 }
 0x44b   : > { %v4071_v1 = vpop.f32.mrb[32].mxu0 }
 0x44c   : > { %v5947_v3 = vadd.f32 %v4071_v1, %v5835_v55  ;;  %v2703_v26 = vpop.f32.mrb[33].mxu0 }
 0x44d   : > { %v5950_v49 = vadd.f32 %v5835_v55, %v2703_v26  ;;  %v4072_v50 = vpop.f32.mrb[34].mxu0  ;;  %v3129_v26 = vmul.f32 %v5940_v58, %v5883_v4 }
 0x44e   : > { %v2736_v32 = vsub.f32 0.0, %v5947_v3  ;;  %v5954_v15 = vadd.f32 %v4072_v50, %v5835_v55  ;;  %v2706_v10 = vpop.f32.mrb[35].mxu0  ;;  %v3109_v50 = vadd.f32 %v3089_v21, %v3032_v59  ;;  %v3092_v59 = vsel %vm627_vm2, %v3090_v12, %v3091_v24 }
 0x44f   : > { %v2734_v13 = vsub.f32 0.0, %v5950_v49  ;;  %v5960_v38 = vadd.f32 %v5835_v55, %v2706_v10  ;;  %v2994_v55 = vsel %vm664_vm3, %v2992_v23, %v2993_v0  ;;  %v3094_v23 = vrot.slane %v3055_v40, 1 }
 0x450   : > { %v2746_v46 = vmul.f32 1.442695, %v2736_v32  ;;  %v2737_v62 = vsub.f32 0.0, %v5954_v15  ;;  %v3012_v1 = vadd.f32 %v2994_v55, %v2935_v14  ;;  %v5996_v0 = vmul.f32 %v5986_v37, %v5883_v4 }
 0x451   : > { %v2742_v61 = vmul.f32 1.442695, %v2734_v13  ;;  %v2735_v19 = vsub.f32 0.0, %v5960_v38  ;;  %v3166_v32 = vsel %vm664_vm3, %v3164_v35, %v3165_v27  ;;  %v3132_v14 = vmul.f32 %v5940_v58, %v5968_v11 }
 0x452   : > { %4313 = vpow2.f32 %v2746_v46  ;;  %v2748_v57 = vmul.f32 1.442695, %v2737_v62  ;;  %v3033_v10 = vadd.f32 %v3025_v54, %v3012_v1  ;;  %v3034_v13 = vadd.f32 %v3026_v20, %v3013_v44  ;;  %v2837_v54 = vld [vmem:[#allocation4 + $0x90] sm:$0xff]  ;;  %v2838_v1 = vld [vmem:[#allocation4 + $0x98] sm:$0x3] }
 0x453   : > { %4315 = vpow2.f32 %v2742_v61  ;;  %v2744_v30 = vmul.f32 1.442695, %v2735_v19  ;;  %v3167_v8 = vrot.slane %v3129_v26, 2  ;;  %v3168_v46 = vrot.slane %v3130_v17, 2  ;;  %v6024_v17 = vld [vmem:[%s6433_s11 + $0x8] ss:$0 sm:$0xff] }
 0x454   : > { %4317 = vpow2.f32 %v2748_v57  ;;  %v3095_v62 = vsel %vm627_vm2, %v3093_v53, %v3094_v23  ;;  %v3186_v52 = vadd.f32 %v3166_v32, %v3109_v50  ;;  %v3199_v61 = vmul.f32 %v6005_v63, %v5883_v4 }
 0x455   : > { %4319 = vpow2.f32 %v2744_v30  ;;  %v3262_v19 = vrot.slane %v5996_v0, 1  ;;  %v3263_v55 = vrot.slane %v6000_v2, 1  ;;  %v3110_v30 = vadd.f32 %v3092_v59, %v3033_v10 }
 0x456   : > { %v3171_v40 = vrot.slane %v3132_v14, 2  ;;  %v3111_v44 = vadd.f32 %v3095_v62, %v3034_v13  ;;  %v3169_v20 = vsel %vm664_vm3, %v3167_v8, %v3168_v46  ;;  %v3200_v12 = vmul.f32 %v6005_v63, %v5966_v22 }
 0x457   : > { %v3227_v53 = vmul.f32 %v5986_v37, %v5966_v22  ;;  %v3228_v23 = vmul.f32 %v5986_v37, %v5968_v11  ;;  %v2865_v0 = vmul.f32 %v5861_v28, %v2819_v48  ;;  %v2866_v2 = vmul.f32 %v5861_v28, %v2820_v56 }
 0x458   : > { %v3172_v32 = vsel %vm664_vm3, %v3170_v33, %v3171_v40  ;;  %v3229_v10 = vmul.f32 %v5986_v37, %v2837_v54  ;;  %v3230_v6 = vmul.f32 %v5986_v37, %v2838_v1  ;;  %v3187_v14 = vadd.f32 %v3169_v20, %v3110_v30 }
 0x459   : > { %v3304_v13 = vmul.f32 %v6024_v17, %v5966_v22  ;;  %v3305_v59 = vmul.f32 %v6024_v17, %v5968_v11  ;;  %v3302_v8 = vmul.f32 %v6024_v17, %v5883_v4  ;;  %v3303_v46 = vmul.f32 %v6024_v17, %v5885_v29 }
 0x45a   : > { %v3265_v62 = vrot.slane %v3227_v53, 1  ;;  %v3188_v33 = vadd.f32 %v3172_v32, %v3111_v44  ;;  %v3201_v40 = vmul.f32 %v6005_v63, %v2837_v54  ;;  %v2942_v30 = vmul.f32 %v5872_v18, %v2819_v48 }
 0x45b   : > { %v2943_v22 = vmul.f32 %v5872_v18, %v2820_v56  ;;  %v3208_v11 = vadd.f32 %v3200_v12, %v3187_v14  ;;  %v3306_v20 = vmul.f32 %v6024_v17, %v2837_v54  ;;  %v3342_v4 = vrot.slane %v3304_v13, 2 }
 0x45c   : > { %v4314_v21 = vpop.eup %4313  ;;  %v3264_v29 = vsel %vm627_vm2, %v3262_v19, %v3263_v55  ;;  %v3307_v44 = vmul.f32 %v6024_v17, %v2838_v1  ;;  %v2974_v12 = vrot.slane %v2942_v30, 2  ;;  %v3221_v14 = vmul.f32 %v5986_v37, %v5856_v31 }
 0x45d   : > { %v4316_v36 = vpop.eup %4315  ;;  %v2760_v57 = vadd.f32 1.0, %v4314_v21  ;;  %v3266_v21 = vrot.slane %v3228_v23, 1  ;;  %v2844_v23 = vmul.f32 %v5877_v9, %v2819_v48  ;;  %v3345_v55 = vrot.slane %v3306_v20, 2 }
 0x45e   : > { %v4318_v35 = vpop.eup %4317  ;;  %v2758_v27 = vadd.f32 1.0, %v4316_v36  ;;  %v2897_v36 = vrot.slane %v2865_v0, 1  ;;  %v3340_v0 = vrot.slane %v3303_v46, 2  ;;  %v3222_v13 = vmul.f32 %v5986_v37, %v5863_v34 }
 0x45f   : > { %v4320_v24 = vpop.eup %4319  ;;  %4321 = vrcp.f32 %v2760_v57  ;;  %v2761_v26 = vadd.f32 1.0, %v4318_v35  ;;  %v2898_v57 = vrot.slane %v2866_v2, 1  ;;  %v3268_v35 = vrot.slane %v3229_v10, 1 }
 0x460   : > { %4323 = vrcp.f32 %v2758_v27  ;;  %v2759_v50 = vadd.f32 1.0, %v4320_v24  ;;  %v3269_v27 = vrot.slane %v3230_v6, 1  ;;  %v3343_v24 = vrot.slane %v3305_v59, 2 }
 0x461   : > { %4325 = vrcp.f32 %v2761_v26  ;;  %v3207_v26 = vadd.f32 %v3199_v61, %v3186_v52  ;;  %v3267_v53 = vsel %vm627_vm2, %v3265_v62, %v3266_v21  ;;  %v3209_v2 = vadd.f32 %v3201_v40, %v3188_v33 }
 0x462   : > { %4327 = vrcp.f32 %v2759_v50  ;;  %v3339_v50 = vrot.slane %v3302_v8, 2  ;;  %v2899_v32 = vsel %vm627_vm2, %v2897_v36, %v2898_v57  ;;  %v2975_v10 = vrot.slane %v2943_v22, 2 }
 0x463   : > { %v3270_v54 = vsel %vm627_vm2, %v3268_v35, %v3269_v27  ;;  %v3285_v61 = vadd.f32 %v3267_v53, %v3208_v11  ;;  %v3344_v19 = vsel %vm664_vm3, %v3342_v4, %v3343_v24  ;;  %v3346_v59 = vrot.slane %v3307_v44, 2 }
 0x464   : > { %v2929_v62 = vadd.f32 %v2899_v32, %v2844_v23  ;;  %v3284_v21 = vadd.f32 %v3264_v29, %v3207_v26  ;;  %v2976_v36 = vsel %vm664_vm3, %v2974_v12, %v2975_v10  ;;  %v6069_v57 = vmul.f32 %v6024_v17, %v5856_v31 }
 0x465   : > { %v3286_v33 = vadd.f32 %v3270_v54, %v3209_v2  ;;  %v3362_v40 = vadd.f32 %v3344_v19, %v3285_v61  ;;  %v3257_v30 = vrot.slane %v3222_v13, 1  ;;  %v6079_v22 = vmul.f32 %v6024_v17, %v5863_v34 }
 0x466   : > { %v3347_v35 = vsel %vm664_vm3, %v3345_v55, %v3346_v59  ;;  %v3006_v27 = vadd.f32 %v2976_v36, %v2929_v62  ;;  %v6086_v20 = vmul.f32 %v6005_v63, %v5856_v31 }
 0x467   : > { %v6089_v24 = vadd.f32 %v3347_v35, %v3286_v33 }
 0x469   : > { %v4322_v56 = vpop.eup %4321 }
 0x46a   : > { %v4324_v6 = vpop.eup %4323  ;;  %v2784_v52 = vmul.f32 %v4322_v56, %v5947_v3 }
 0x46b   : > { %v4326_v1 = vpop.eup %4325  ;;  %v2782_v48 = vmul.f32 %v4324_v6, %v5950_v49  ;;  %v3341_v49 = vsel %vm664_vm3, %v3339_v50, %v3340_v0  ;;  %v6104_v50 = vmul.f32 %v5911_v45, %v5856_v31  ;;  %v6108_v0 = vmul.f32 %v5911_v45, %v5863_v34 }
 0x46c   : > { %v4328_v8 = vpop.eup %4327  ;;  %2813 = vst.msk [vmem:[#allocation4 + $0x31] sm:$0xff] %vm556_vm0, %v2784_v52  ;;  %v2785_v46 = vmul.f32 %v4326_v1, %v5954_v15  ;;  %v6075_v15 = vld [vmem:[%s6434_s12] ss:$0 sm:$0xff]  ;;  %v6082_v11 = vadd.f32 %v3341_v49, %v3284_v21 }
 0x46d   : > { %2811 = vst.msk [vmem:[#allocation4 + $0x11] sm:$0xff] %vm556_vm0, %v2782_v48  ;;  %v2783_v3 = vmul.f32 %v4328_v8, %v5960_v38  ;;  %v3256_v38 = vrot.slane %v3221_v14, 1  ;;  %v6092_v26 = vadd.f32 %v6075_v15, %v3362_v40 }
 0x46e   : > { %2814 = vst.msk [vmem:[#allocation4 + $0x41] sm:$0xff] %vm556_vm0, %v2785_v46 }
 0x46f   : > { %2812 = vst.msk [vmem:[#allocation4 + $0x21] sm:$0xff] %vm556_vm0, %v2783_v3  ;;  %v6099_v44 = vsel %vm627_vm2, %v3256_v38, %v3257_v30 }
 0x473   : > { %v6094_v29 = vld [vmem:[#allocation4 + $0x30] sm:$0xff]  ;;  %v6096_v53 = vld [vmem:[#allocation4 + $0x38] sm:$0x3] }
 0x474   : > { %v2821_v2 = vld [vmem:[#allocation4 + $0x10] sm:$0xff]  ;;  %v2822_v56 = vld [vmem:[#allocation4 + $0x18] sm:$0x3]  ;;  %v6112_v32 = vmul.f32 %v5861_v28, %v6096_v53  ;;  %v6116_v12 = vmul.f32 %v6005_v63, %v6094_v29  ;;  %v3217_v10 = vmul.f32 %v5986_v37, %v6094_v29  ;;  %v3218_v54 = vmul.f32 %v5986_v37, %v6096_v53 }
 0x475   : > { %v2845_v6 = vmul.f32 %v5877_v9, %v2821_v2  ;;  %v2867_v52 = vmul.f32 %v5861_v28, %v2821_v2  ;;  %v2868_v61 = vmul.f32 %v5861_v28, %v2822_v56  ;;  %v2944_v19 = vmul.f32 %v5872_v18, %v2821_v2 }
 0x476   : > { %v6126_v55 = vld [vmem:[#allocation4 + $0x20] sm:$0xff]  ;;  %v6128_v1 = vld [vmem:[#allocation4 + $0x28] sm:$0x3]  ;;  %v2945_v48 = vmul.f32 %v5872_v18, %v2822_v56  ;;  %v3019_v14 = vmul.f32 %v5918_v39, %v2821_v2  ;;  %v3040_v13 = vmul.f32 %v5911_v45, %v2821_v2  ;;  %v3041_v59 = vmul.f32 %v5911_v45, %v2822_v56 }
 0x477   : > { %v6136_v8 = vmul.f32 %v5861_v28, %v6128_v1  ;;  %v2900_v46 = vrot.slane %v2867_v52, 1  ;;  %v2901_v3 = vrot.slane %v2868_v61, 1  ;;  %v2977_v62 = vrot.slane %v2944_v19, 2 }
 0x478   : > { %v2978_v21 = vrot.slane %v2945_v48, 2  ;;  %v3020_v49 = vmul.f32 %v5918_v39, %v6126_v55  ;;  %v3027_v36 = vadd.f32 %v3019_v14, %v3006_v27  ;;  %v3042_v33 = vmul.f32 %v5911_v45, %v6126_v55 }
 0x479   : > { %v2902_v40 = vsel %vm627_vm2, %v2900_v46, %v2901_v3  ;;  %v3043_v38 = vmul.f32 %v5911_v45, %v6128_v1  ;;  %v3072_v30 = vrot.slane %v3040_v13, 1  ;;  %v3073_v35 = vrot.slane %v3041_v59, 1 }
 0x47a   : > { %v2930_v4 = vadd.f32 %v2902_v40, %v2845_v6  ;;  %v2979_v52 = vsel %vm664_vm3, %v2977_v62, %v2978_v21  ;;  %v3075_v61 = vrot.slane %v3042_v33, 1  ;;  %v3117_v19 = vmul.f32 %v5940_v58, %v2821_v2 }
 0x47b   : > { %v3074_v48 = vsel %vm627_vm2, %v3072_v30, %v3073_v35  ;;  %v3076_v23 = vrot.slane %v3043_v38, 1  ;;  %v3118_v27 = vmul.f32 %v5940_v58, %v2822_v56  ;;  %v3119_v14 = vmul.f32 %v5940_v58, %v6126_v55 }
 0x47c   : > { %v3007_v46 = vadd.f32 %v2979_v52, %v2930_v4  ;;  %v3104_v3 = vadd.f32 %v3074_v48, %v3027_v36  ;;  %v3120_v13 = vmul.f32 %v5940_v58, %v6128_v1  ;;  %v3149_v59 = vrot.slane %v3117_v19, 2 }
 0x47d   : > { %v3077_v6 = vsel %vm627_vm2, %v3075_v61, %v3076_v23  ;;  %v3150_v62 = vrot.slane %v3118_v27, 2  ;;  %v3152_v21 = vrot.slane %v3119_v14, 2  ;;  %v3194_v2 = vmul.f32 %v6005_v63, %v6126_v55 }
 0x47e   : > { %v3028_v33 = vadd.f32 %v3020_v49, %v3007_v46  ;;  %v3153_v40 = vrot.slane %v3120_v13, 2  ;;  %v3215_v56 = vmul.f32 %v5986_v37, %v6126_v55  ;;  %v3216_v4 = vmul.f32 %v5986_v37, %v6128_v1 }
 0x47f   : > { %v3151_v36 = vsel %vm664_vm3, %v3149_v59, %v3150_v62  ;;  %v3250_v38 = vrot.slane %v3217_v10, 1  ;;  %v3251_v30 = vrot.slane %v3218_v54, 1  ;;  %v3292_v23 = vmul.f32 %v6024_v17, %v6126_v55 }
 0x480   : > { %v3105_v35 = vadd.f32 %v3077_v6, %v3028_v33  ;;  %v3154_v52 = vsel %vm664_vm3, %v3152_v21, %v3153_v40  ;;  %v3181_v61 = vadd.f32 %v3151_v36, %v3104_v3  ;;  %v3247_v19 = vrot.slane %v3215_v56, 1 }
 0x481   : > { %v3248_v49 = vrot.slane %v3216_v4, 1  ;;  %v3252_v48 = vsel %vm627_vm2, %v3250_v38, %v3251_v30  ;;  %v3293_v27 = vmul.f32 %v6024_v17, %v6128_v1  ;;  %v3294_v14 = vmul.f32 %v6024_v17, %v6094_v29 }
 0x482   : > { %v3182_v46 = vadd.f32 %v3154_v52, %v3105_v35  ;;  %v3202_v10 = vadd.f32 %v3194_v2, %v3181_v61  ;;  %v3295_v54 = vmul.f32 %v6024_v17, %v6096_v53  ;;  %v3324_v13 = vrot.slane %v3292_v23, 2 }
 0x483   : > { %v3249_v59 = vsel %vm627_vm2, %v3247_v19, %v3248_v49  ;;  %v3325_v6 = vrot.slane %v3293_v27, 2  ;;  %v3327_v3 = vrot.slane %v3294_v14, 2  ;;  %v2846_v62 = vmul.f32 %v5877_v9, %v6126_v55 }
 0x484   : > { %v3203_v21 = vadd.f32 %v6116_v12, %v3182_v46  ;;  %v3279_v33 = vadd.f32 %v3249_v59, %v3202_v10  ;;  %v3328_v40 = vrot.slane %v3295_v54, 2  ;;  %v2847_v56 = vmul.f32 %v5877_v9, %v6094_v29  ;;  %v6196_v46 = vld [vmem:[#allocation4 + $0x40] sm:$0xff] }
 0x485   : > { %v3326_v2 = vsel %vm664_vm3, %v3324_v13, %v3325_v6  ;;  %v2869_v4 = vmul.f32 %v5861_v28, %v6126_v55  ;;  %v2871_v36 = vmul.f32 %v5861_v28, %v6094_v29  ;;  %v2904_v38 = vrot.slane %v6136_v8, 1 }
 0x486   : > { %v3280_v30 = vadd.f32 %v3252_v48, %v3203_v21  ;;  %v3329_v23 = vsel %vm664_vm3, %v3327_v3, %v3328_v40  ;;  %v3356_v35 = vadd.f32 %v3326_v2, %v3279_v33  ;;  %v2907_v12 = vrot.slane %v6112_v32, 1 }
 0x487   : > { %v2903_v52 = vrot.slane %v2869_v4, 1  ;;  %v2906_v61 = vrot.slane %v2871_v36, 1  ;;  %v2946_v19 = vmul.f32 %v5872_v18, %v6126_v55  ;;  %v2947_v49 = vmul.f32 %v5872_v18, %v6128_v1  ;;  %v2828_v36 = vld [vmem:[#allocation4 + $0x48] sm:$0x3] }
 0x488   : > { %v3357_v27 = vadd.f32 %v3329_v23, %v3280_v30  ;;  %v6190_v14 = vadd.f32 %v6075_v15, %v3356_v35  ;;  %v2948_v8 = vmul.f32 %v5872_v18, %v6094_v29  ;;  %v2949_v48 = vmul.f32 %v5872_v18, %v6096_v53 }
 0x489   : > { %v2905_v32 = vsel %vm627_vm2, %v2903_v52, %v2904_v38  ;;  %v2908_v10 = vsel %vm627_vm2, %v2906_v61, %v2907_v12  ;;  %v2980_v55 = vrot.slane %v2946_v19, 2  ;;  %v2981_v54 = vrot.slane %v2947_v49, 2 }
 0x48a   : > { %v6201_v1 = vadd.f32 %v6075_v15, %v3357_v27  ;;  %v3379_v13 = vsub.f32 0.0, %v6190_v14  ;;  %v2931_v59 = vadd.f32 %v2905_v32, %v2846_v62  ;;  %v2932_v6 = vadd.f32 %v2908_v10, %v2847_v56 }
 0x48b   : > { %v2982_v3 = vsel %vm664_vm3, %v2980_v55, %v2981_v54  ;;  %v2983_v21 = vrot.slane %v2948_v8, 2  ;;  %v2984_v33 = vrot.slane %v2949_v48, 2  ;;  %v3021_v40 = vmul.f32 %v5918_v39, %v6094_v29 }
 0x48c   : > { %v3380_v2 = vsub.f32 0.0, %v6201_v1  ;;  %v3387_v4 = vmul.f32 1.442695, %v3379_v13  ;;  %v3008_v38 = vadd.f32 %v2982_v3, %v2931_v59  ;;  %v3022_v30 = vmul.f32 %v5918_v39, %v6196_v46 }
 0x48d   : > { %v2985_v23 = vsel %vm664_vm3, %v2983_v21, %v2984_v33  ;;  %v3044_v62 = vmul.f32 %v5911_v45, %v6094_v29  ;;  %v3045_v56 = vmul.f32 %v5911_v45, %v6096_v53  ;;  %v3046_v35 = vmul.f32 %v5911_v45, %v6196_v46 }
 0x48e   : > { %4329 = vpow2.f32 %v3387_v4  ;;  %v3389_v12 = vmul.f32 1.442695, %v3380_v2  ;;  %v3009_v52 = vadd.f32 %v2985_v23, %v2932_v6  ;;  %v3029_v61 = vadd.f32 %v3021_v40, %v3008_v38 }
 0x48f   : > { %v3047_v19 = vmul.f32 %v5911_v45, %v2828_v36  ;;  %v3078_v49 = vrot.slane %v3044_v62, 1  ;;  %v3079_v27 = vrot.slane %v3045_v56, 1  ;;  %v3081_v8 = vrot.slane %v3046_v35, 1 }
 0x490   : > { %4331 = vpow2.f32 %v3389_v12  ;;  %v3030_v48 = vadd.f32 %v3022_v30, %v3009_v52  ;;  %v3121_v32 = vmul.f32 %v5940_v58, %v6094_v29  ;;  %v3122_v10 = vmul.f32 %v5940_v58, %v6096_v53 }
 0x491   : > { %v3080_v55 = vsel %vm627_vm2, %v3078_v49, %v3079_v27  ;;  %v3082_v54 = vrot.slane %v3047_v19, 1  ;;  %v3123_v13 = vmul.f32 %v5940_v58, %v6196_v46  ;;  %v3124_v59 = vmul.f32 %v5940_v58, %v2828_v36 }
 0x492   : > { %v3106_v45 = vadd.f32 %v3080_v55, %v3029_v61  ;;  %v3155_v6 = vrot.slane %v3121_v32, 2  ;;  %v3156_v3 = vrot.slane %v3122_v10, 2  ;;  %v3196_v21 = vmul.f32 %v6005_v63, %v6196_v46 }
 0x493   : > { %v3083_v33 = vsel %vm627_vm2, %v3081_v8, %v3082_v54  ;;  %v3158_v29 = vrot.slane %v3123_v13, 2  ;;  %v3159_v40 = vrot.slane %v3124_v59, 2  ;;  %v3219_v53 = vmul.f32 %v5986_v37, %v6196_v46 }
 0x494   : > { %v3107_v2 = vadd.f32 %v3083_v33, %v3030_v48  ;;  %v3157_v4 = vsel %vm664_vm3, %v3155_v6, %v3156_v3  ;;  %v3220_v38 = vmul.f32 %v5986_v37, %v2828_v36  ;;  %v3296_v30 = vmul.f32 %v6024_v17, %v6196_v46 }
 0x495   : > { %v3160_v23 = vsel %vm664_vm3, %v3158_v29, %v3159_v40  ;;  %v3183_v62 = vadd.f32 %v3157_v4, %v3106_v45  ;;  %v3253_v56 = vrot.slane %v3219_v53, 1  ;;  %v3297_v35 = vmul.f32 %v6024_v17, %v2828_v36 }
 0x496   : > { %v3184_v12 = vadd.f32 %v3160_v23, %v3107_v2  ;;  %v3254_v52 = vrot.slane %v3220_v38, 1  ;;  %v3330_v61 = vrot.slane %v3296_v30, 2  ;;  %v6461_v19 = vrot.slane %v6079_v22, 2 }
 0x497   : > { %v6462_v49 = vrot.slane %v6069_v57, 2  ;;  %v3204_v8 = vadd.f32 %v3196_v21, %v3183_v62  ;;  %v3331_v48 = vrot.slane %v3297_v35, 2  ;;  %v2873_v32 = vmul.f32 %v5861_v28, %v6196_v46 }
 0x498   : > { %v2874_v10 = vmul.f32 %v5861_v28, %v2828_v36  ;;  %v4330_v55 = vpop.eup %4329  ;;  %v3205_v54 = vadd.f32 %v6086_v20, %v3184_v12  ;;  %v3255_v13 = vsel %vm627_vm2, %v3253_v56, %v3254_v52  ;;  %v2950_v59 = vmul.f32 %v5872_v18, %v6196_v46 }
 0x499   : > { %v3335_v27 = vsel %vm664_vm3, %v6462_v49, %v6461_v19  ;;  %v2951_v22 = vmul.f32 %v5872_v18, %v2828_v36  ;;  %v3403_v57 = vadd.f32 1.0, %v4330_v55  ;;  %v3281_v45 = vadd.f32 %v3255_v13, %v3204_v8 }
 0x49a   : > { %v3332_v6 = vsel %vm664_vm3, %v3330_v61, %v3331_v48  ;;  %v2909_v3 = vrot.slane %v2873_v32, 1  ;;  %v4332_v21 = vpop.eup %4331  ;;  %v3282_v33 = vadd.f32 %v6099_v44, %v3205_v54  ;;  %v2910_v29 = vrot.slane %v2874_v10, 1 }
 0x49b   : > { %v2986_v28 = vrot.slane %v2950_v59, 2  ;;  %v2987_v40 = vrot.slane %v2951_v22, 2  ;;  %v3404_v53 = vadd.f32 1.0, %v4332_v21  ;;  %4333 = vrcp.f32 %v3403_v57 }
 0x49c   : > { %v3358_v20 = vadd.f32 %v3332_v6, %v3281_v45  ;;  %v2848_v2 = vmul.f32 %v5877_v9, %v6196_v46  ;;  %v3359_v4 = vadd.f32 %v3335_v27, %v3282_v33  ;;  %v2911_v18 = vsel %vm627_vm2, %v2909_v3, %v2910_v29 }
 0x49d   : > { %v3125_v36 = vmul.f32 %v5940_v58, %v5856_v31  ;;  %v3126_v38 = vmul.f32 %v5940_v58, %v5863_v34  ;;  %4335 = vrcp.f32 %v3404_v53  ;;  %v6264_v23 = vadd.f32 %v6075_v15, %v6089_v24 }
 0x49e   : > { %v6260_v44 = vadd.f32 %v6075_v15, %v3358_v20  ;;  %v2933_v30 = vadd.f32 %v2911_v18, %v2848_v2  ;;  %v6267_v9 = vadd.f32 %v6075_v15, %v3359_v4  ;;  %v2988_v46 = vsel %vm664_vm3, %v2986_v28, %v2987_v40 }
 0x49f   : > { %v3084_v62 = vrot.slane %v6104_v50, 1  ;;  %v3085_v56 = vrot.slane %v6108_v0, 1  ;;  %v3023_v35 = vmul.f32 %v5918_v39, %v5856_v31  ;;  %v3223_v12 = vmul.f32 %v5986_v37, %v5879_v5 }
 0x4a0   : > { %v3381_v34 = vsub.f32 0.0, %v6260_v44  ;;  %v3010_v58 = vadd.f32 %v2988_v46, %v2933_v30  ;;  %v3382_v24 = vsub.f32 0.0, %v6267_v9  ;;  %v3161_v52 = vrot.slane %v3125_v36, 2 }
 0x4a1   : > { %v3162_v61 = vrot.slane %v3126_v38, 2  ;;  %v3224_v19 = vmul.f32 %v5986_v37, %v5881_v25  ;;  %v6282_v0 = vadd.f32 %v6075_v15, %v6082_v11  ;;  %v3086_v8 = vsel %vm627_vm2, %v3084_v62, %v3085_v56 }
 0x4a2   : > { %v3391_v49 = vmul.f32 1.442695, %v3381_v34  ;;  %v3031_v50 = vadd.f32 %v3023_v35, %v3010_v58  ;;  %v3393_v27 = vmul.f32 1.442695, %v3382_v24  ;;  %v3300_v31 = vmul.f32 %v6024_v17, %v5879_v5 }
 0x4a3   : > { %v3301_v39 = vmul.f32 %v6024_v17, %v5881_v25  ;;  %v3385_v32 = vsub.f32 0.0, %v6092_v26  ;;  %v3386_v37 = vsub.f32 0.0, %v6264_v23  ;;  %v3163_v10 = vsel %vm664_vm3, %v3161_v52, %v3162_v61 }
 0x4a4   : > { %4337 = vpow2.f32 %v3391_v49  ;;  %v3108_v48 = vadd.f32 %v3086_v8, %v3031_v50  ;;  %v3259_v11 = vrot.slane %v3223_v12, 1  ;;  %v3260_v55 = vrot.slane %v3224_v19, 1 }
 0x4a5   : > { %4339 = vpow2.f32 %v3393_v27  ;;  %v4334_v54 = vpop.eup %4333  ;;  %v3198_v59 = vmul.f32 %v6005_v63, %v5879_v5  ;;  %v3384_v22 = vsub.f32 0.0, %v6282_v0  ;;  %v3336_v57 = vrot.slane %v3300_v31, 2 }
 0x4a6   : > { %v3185_v13 = vadd.f32 %v3163_v10, %v3108_v48  ;;  %v3337_v25 = vrot.slane %v3301_v39, 2  ;;  %v3399_v6 = vmul.f32 1.442695, %v3385_v32  ;;  %v3427_v3 = vmul.f32 %v4334_v54, %v6190_v14  ;;  %v4200_v32 = vld [vmem:[%s6437_s15] sm:$0xff]  }
 0x4a7   : > { %v4336_v17 = vpop.eup %4335  ;;  %v3261_v33 = vsel %vm627_vm2, %v3259_v11, %v3260_v55  ;;  %v3401_v29 = vmul.f32 1.442695, %v3386_v37  ;;  %v3397_v40 = vmul.f32 1.442695, %v3384_v22  ;;  %4087 = vmatprep.subr.bf16.mxu1 %v4200_v32 }
 0x4a8   : > { %v3206_v45 = vadd.f32 %v3198_v59, %v3185_v13  ;;  %v3428_v21 = vmul.f32 %v4336_v17, %v6201_v1  ;;  %v3338_v20 = vsel %vm664_vm3, %v3336_v57, %v3337_v25  ;;  %4341 = vpow2.f32 %v3399_v6  ;;  %4088 = vmatpush3.bf16.msra.mxu1 %v4200_v32 }
 0x4a9   : > { %4343 = vpow2.f32 %v3401_v29 }
 0x4aa   : > { %v3283_v28 = vadd.f32 %v3261_v33, %v3206_v45  ;;  %v3435_v53 = vpack.c.bf16 %v3428_v21, %v3427_v3  ;;  %4345 = vpow2.f32 %v3397_v40 }
 0x4ac   : > { %v3360_v5 = vadd.f32 %v3338_v20, %v3283_v28  ;;  %4079 = vmatprep.mubr.msk.bf16.mxu0 %vm556_vm0, %v3435_v53 }
 0x4ae   : > { %v4338_v63 = vpop.eup %4337  ;;  %v3375_v2 = vadd.f32 %v6075_v15, %v3360_v5 }
 0x4af   : > { %v4340_v14 = vpop.eup %4339  ;;  %v3405_v4 = vadd.f32 1.0, %v4338_v63 }
 0x4b0   : > { %v3406_v1 = vadd.f32 1.0, %v4340_v14  ;;  %v3383_v18 = vsub.f32 0.0, %v3375_v2 }
 0x4b1   : > { %4347 = vrcp.f32 %v3405_v4 }
 0x4b2   : > { %4349 = vrcp.f32 %v3406_v1  ;;  %v3395_v36 = vmul.f32 1.442695, %v3383_v18  ;;  %v4342_v38 = vpop.eup %4341 }
 0x4b3   : > { %v4344_v30 = vpop.eup %4343  ;;  %v3409_v62 = vadd.f32 1.0, %v4342_v38 }
 0x4b4   : > { %4351 = vpow2.f32 %v3395_v36  ;;  %v4346_v46 = vpop.eup %4345  ;;  %v3410_v56 = vadd.f32 1.0, %v4344_v30 }
 0x4b5   : > { %v3408_v58 = vadd.f32 1.0, %v4346_v46  ;;  %4353 = vrcp.f32 %v3409_v62 }
 0x4b6   : > { %4355 = vrcp.f32 %v3410_v56 }
 0x4b7   : > { %4357 = vrcp.f32 %v3408_v58 }
 0x4bb   : > { %v4348_v34 = vpop.eup %4347 }
 0x4bc   : > { %v4350_v35 = vpop.eup %4349  ;;  %v3429_v12 = vmul.f32 %v4348_v34, %v6260_v44 }
 0x4bd   : > { %v3430_v15 = vmul.f32 %v4350_v35, %v6267_v9 }
 0x4be   : > { %v4352_v24 = vpop.eup %4351 }
 0x4bf   : > { %v3436_v52 = vpack.c.bf16 %v3430_v15, %v3429_v12  ;;  %v3407_v61 = vadd.f32 1.0, %v4352_v24  ;;  %v4354_v19 = vpop.eup %4353 }
 0x4c0   : > { %v4356_v49 = vpop.eup %4355  ;;  %v3433_v8 = vmul.f32 %v4354_v19, %v6092_v26  ;;  %v3905_v26 = vld [vmem:[%s6436_s14] ss:$0 sm:$0xff] }
 0x4c1   : > { %4080 = vmatmul.mubr.msk.bf16.vlgmr.msra.gmra.mrb[36].mxu0 %vm556_vm0, %v3436_v52  ;;  %4359 = vrcp.f32 %v3407_v61  ;;  %v4358_v50 = vpop.eup %4357  ;;  %v3434_v31 = vmul.f32 %v4356_v49, %v6264_v23 }
 0x4c2   : > { %v3432_v9 = vmul.f32 %v4358_v50, %v6282_v0 }
 0x4c3   : > { %v3438_v48 = vpack.c.bf16 %v3434_v31, %v3433_v8 }
 0x4cb   : > { %v4360_v27 = vpop.eup %4359 }
 0x4cc   : > { %v3431_v44 = vmul.f32 %v4360_v27, %v3375_v2 }
 0x4ce   : > { %v3437_v39 = vpack.c.bf16 %v3432_v9, %v3431_v44 }
 0x4d0   : > { %4083 = vmatprep.mubr.msk.bf16.mxu0 %vm556_vm0, %v3437_v39 }
 0x4d1   : > { %4084 = vmatmul.mubr.msk.bf16.gmra.mrb[40].mxu0 %vm556_vm0, %v3438_v48 }
 0x594   : > { %v4081_v23 = vpop.f32.mrb[36].mxu0 }
 0x595   : > { %v3509_v37 = vadd.f32 %v4081_v23, %v3905_v26  ;;  %v3500_v10 = vpop.f32.mrb[37].mxu0 }
 0x596   : > { %v3501_v0 = vadd.f32 %v3905_v26, %v3500_v10  ;;  %v4082_v11 = vpop.f32.mrb[38].mxu0 }
 0x597   : > { %v3533_v55 = vsub.f32 0.0, %v3509_v37  ;;  %v3512_v54 = vadd.f32 %v4082_v11, %v3905_v26  ;;  %v3503_v13 = vpop.f32.mrb[39].mxu0 }
 0x598   : > { %v3531_v59 = vsub.f32 0.0, %v3501_v0  ;;  %v3504_v22 = vadd.f32 %v3905_v26, %v3503_v13 }
 0x599   : > { %v3543_v57 = vmul.f32 1.442695, %v3533_v55  ;;  %v3534_v25 = vsub.f32 0.0, %v3512_v54 }
 0x59a   : > { %v3539_v17 = vmul.f32 1.442695, %v3531_v59  ;;  %v3532_v45 = vsub.f32 0.0, %v3504_v22 }
 0x59b   : > { %4361 = vpow2.f32 %v3543_v57  ;;  %v3545_v6 = vmul.f32 1.442695, %v3534_v25 }
 0x59c   : > { %4363 = vpow2.f32 %v3539_v17  ;;  %v3541_v3 = vmul.f32 1.442695, %v3532_v45  ;;  %v3911_v17 = vld [vmem:[%s6438_s16] ss:$0 sm:$0xff] }
 0x59d   : > { %4365 = vpow2.f32 %v3545_v6 }
 0x59e   : > { %4367 = vpow2.f32 %v3541_v3 }
 0x5a4   : > { %v4085_v21 = vpop.f32.mrb[40].mxu0 }
 0x5a5   : > { %v4362_v33 = vpop.eup %4361  ;;  %v3525_v29 = vadd.f32 %v4085_v21, %v3905_v26  ;;  %v3516_v28 = vpop.f32.mrb[41].mxu0 }
 0x5a6   : > { %v4364_v40 = vpop.eup %4363  ;;  %v3557_v53 = vadd.f32 1.0, %v4362_v33  ;;  %v3517_v20 = vadd.f32 %v3905_v26, %v3516_v28  ;;  %v4086_v5 = vpop.f32.mrb[42].mxu0 }
 0x5a7   : > { %v4366_v63 = vpop.eup %4365  ;;  %v3555_v2 = vadd.f32 1.0, %v4364_v40  ;;  %v3537_v14 = vsub.f32 0.0, %v3525_v29  ;;  %v3528_v4 = vadd.f32 %v4086_v5, %v3905_v26  ;;  %v3519_v1 = vpop.f32.mrb[43].mxu0 }
 0x5a8   : > { %v4368_v18 = vpop.eup %4367  ;;  %4369 = vrcp.f32 %v3557_v53  ;;  %v3558_v36 = vadd.f32 1.0, %v4366_v63  ;;  %v3535_v38 = vsub.f32 0.0, %v3517_v20  ;;  %v3520_v30 = vadd.f32 %v3905_v26, %v3519_v1 }
 0x5a9   : > { %4371 = vrcp.f32 %v3555_v2  ;;  %v3556_v46 = vadd.f32 1.0, %v4368_v18  ;;  %v3551_v62 = vmul.f32 1.442695, %v3537_v14  ;;  %v3538_v56 = vsub.f32 0.0, %v3528_v4  ;;  %v3870_v18 = vld [vmem:[%s6428_s6] ss:$0 sm:$0xff] }
 0x5aa   : > { %4373 = vrcp.f32 %v3558_v36  ;;  %v3547_v34 = vmul.f32 1.442695, %v3535_v38  ;;  %v3536_v58 = vsub.f32 0.0, %v3520_v30  ;;  %v2020_v36 = vadd.f32 %v5848_v7, %v3870_v18 }
 0x5ab   : > { %4375 = vrcp.f32 %v3556_v46  ;;  %v3553_v35 = vmul.f32 1.442695, %v3538_v56  ;;  %v2012_v56 = vadd.f32 %v3870_v18, %v5850_v41  ;;  %v2028_v41 = vadd.f32 %v3870_v18, %v5903_v43 }
 0x5ac   : > { %4377 = vpow2.f32 %v3551_v62  ;;  %v3549_v12 = vmul.f32 1.442695, %v3536_v58 }
 0x5ad   : > { %4379 = vpow2.f32 %v3547_v34  ;;  %v2015_v34 = vadd.f32 %v3870_v18, %v5854_v60 }
 0x5ae   : > { %4381 = vpow2.f32 %v3553_v35 }
 0x5af   : > { %4383 = vpow2.f32 %v3549_v12 }
 0x5b2   : > { %v4370_v15 = vpop.eup %4369 }
 0x5b3   : > { %v4372_v24 = vpop.eup %4371  ;;  %v3581_v19 = vmul.f32 %v4370_v15, %v3509_v37 }
 0x5b4   : > { %v4374_v52 = vpop.eup %4373  ;;  %v3579_v27 = vmul.f32 %v4372_v24, %v3501_v0  ;;  %v2031_v24 = vadd.f32 %v3870_v18, %v5913_v47 }
 0x5b5   : > { %v4376_v61 = vpop.eup %4375  ;;  %v3582_v49 = vmul.f32 %v4374_v52, %v3512_v54 }
 0x5b6   : > { %v4378_v50 = vpop.eup %4377  ;;  %v3580_v8 = vmul.f32 %v4376_v61, %v3504_v22  ;;  %v2036_v61 = vadd.f32 %v5893_v51, %v3870_v18 }
 0x5b7   : > { %v4380_v31 = vpop.eup %4379  ;;  %v3588_v44 = vpack.c.bf16 %v3582_v49, %v3581_v19  ;;  %v3561_v9 = vadd.f32 1.0, %v4378_v50  ;;  %v2039_v49 = vadd.f32 %v5906_v42, %v3870_v18 }
 0x5b8   : > { %v4382_v39 = vpop.eup %4381  ;;  %v3587_v48 = vpack.c.bf16 %v3580_v8, %v3579_v27  ;;  %v3559_v32 = vadd.f32 1.0, %v4380_v31 }
 0x5b9   : > { %v4384_v26 = vpop.eup %4383  ;;  %4385 = vrcp.f32 %v3561_v9  ;;  %v3562_v23 = vadd.f32 1.0, %v4382_v39 }
 0x5ba   : > { %4387 = vrcp.f32 %v3559_v32  ;;  %v3560_v10 = vadd.f32 1.0, %v4384_v26  ;;  %4089 = vmatprep.mubr.msk.bf16.mxu1 %vm556_vm0, %v3587_v48 }
 0x5bb   : > { %4389 = vrcp.f32 %v3562_v23  ;;  %4090 = vmatmul.mubr.msk.bf16.vlgmr.msra.gmra.mrb[36].mxu1 %vm556_vm0, %v3588_v44 }
 0x5bc   : > { %4391 = vrcp.f32 %v3560_v10 }
 0x5c3   : > { %v4386_v37 = vpop.eup %4385 }
 0x5c4   : > { %v4388_v0 = vpop.eup %4387  ;;  %v3585_v54 = vmul.f32 %v4386_v37, %v3525_v29 }
 0x5c5   : > { %v4390_v11 = vpop.eup %4389  ;;  %v3583_v59 = vmul.f32 %v4388_v0, %v3517_v20 }
 0x5c6   : > { %v4392_v55 = vpop.eup %4391  ;;  %v3586_v13 = vmul.f32 %v4390_v11, %v3528_v4 }
 0x5c7   : > { %v3584_v22 = vmul.f32 %v4392_v55, %v3520_v30  ;;  %v2023_v30 = vadd.f32 %v5852_v16, %v3870_v18 }
 0x5c8   : > { %v3590_v57 = vpack.c.bf16 %v3586_v13, %v3585_v54 }
 0x5c9   : > { %v3589_v25 = vpack.c.bf16 %v3584_v22, %v3583_v59 }
 0x5cb   : > { %4093 = vmatprep.mubr.msk.bf16.mxu1 %vm556_vm0, %v3589_v25 }
 0x5cc   : > { %4094 = vmatmul.mubr.msk.bf16.gmra.mrb[40].mxu1 %vm556_vm0, %v3590_v57 }
 0x68e   : > { %v4091_v45 = vpop.f32.mrb[36].mxu1 }
 0x68f   : > { %v3661_v6 = vadd.f32 %v4091_v45, %v3911_v17  ;;  %v3652_v3 = vpop.f32.mrb[37].mxu1 }
 0x690   : > { %v4092_v21 = vpop.f32.mrb[38].mxu1  ;;  %v3653_v28 = vadd.f32 %v3911_v17, %v3652_v3 }
 0x691   : > { %v3664_v33 = vadd.f32 %v4092_v21, %v3911_v17  ;;  %3695 = vrot.lane.b32.xlu1 %v3661_v6, %s6460_s21  ;;  %v3655_v29 = vpop.f32.mrb[39].mxu1 }
 0x692   : > { %v3656_v40 = vadd.f32 %v3911_v17, %v3655_v29 }
 0x693   : > { %3697 = vrot.lane.b32.xlu0 %v3664_v33, %s6460_s21 }
 0x695   : > { %3691 = vrot.lane.b32.xlu1 %v3653_v28, %s6460_s21 }
 0x697   : > { %3693 = vrot.lane.b32.xlu0 %v3656_v40, %s6460_s21 }
 0x69f   : > { %v4095_v53 = vpop.f32.mrb[40].mxu1 }
 0x6a0   : > { %v3668_v20 = vpop.f32.mrb[41].mxu1  ;;  %v3677_v4 = vadd.f32 %v4095_v53, %v3911_v17 }
 0x6a1   : > { %v3669_v5 = vadd.f32 %v3911_v17, %v3668_v20  ;;  %v4096_v63 = vpop.f32.mrb[42].mxu1 }
 0x6a2   : > { %v3671_v2 = vpop.f32.mrb[43].mxu1  ;;  %v3680_v1 = vadd.f32 %v4096_v63, %v3911_v17 }
 0x6a3   : > { %v3672_v14 = vadd.f32 %v3911_v17, %v3671_v2  ;;  %3699 = vrot.lane.b32.xlu1 %v3669_v5, %s6460_s21 }
 0x6a5   : > { %3701 = vrot.lane.b32.xlu0 %v3672_v14, %s6460_s21 }
 0x6a7   : > { %3703 = vrot.lane.b32.xlu1 %v3677_v4, %s6460_s21 }
 0x6a9   : > { %3705 = vrot.lane.b32.xlu0 %v3680_v1, %s6460_s21  ;;  %s3923_s21 = sshll.u32 %s4601_s28, 10  ;;  %s6381_s28 = scalar_lea.sflag [#allocation6], %s539_s18 }
 0x6aa   : > { %s6370_s23 = scalar_lea.hbm %s6439_s17, %s3923_s21 }
 0x703   : > { %v3696_v38 = vpop.permute.xlu1 %3695 }
 0x704   : > { %v3717_v46 = vsel %vm847_vm4, %v2020_v36, %v3696_v38 }
 0x705   : > { %3726 = vst.msk [vmem:[%s6339_s19 + $0x10] sm:$0xff] %vm3723_vm11, %v3717_v46  ;;  %v3698_v62 = vpop.permute.xlu0 %3697 }
 0x706   : > { %v3718_v7 = vsel %vm847_vm4, %v2023_v30, %v3698_v62 }
 0x707   : > { %3727 = vst.msk [vmem:[%s6339_s19 + $0x18] sm:$0xff] %vm3723_vm11, %v3718_v7  ;;  %v3692_v16 = vpop.permute.xlu1 %3691 }
 0x708   : > { %v3715_v58 = vsel %vm847_vm4, %v2012_v56, %v3692_v16 }
 0x709   : > { %3724 = vst.msk [vmem:[%s6339_s19] sm:$0xff] %vm3723_vm11, %v3715_v58  ;;  %v3694_v35 = vpop.permute.xlu0 %3693 }
 0x70a   : > { %v3716_v12 = vsel %vm847_vm4, %v2015_v34, %v3694_v35 }
 0x70b   : > { %3725 = vst.msk [vmem:[%s6339_s19 + $0x8] sm:$0xff] %vm3723_vm11, %v3716_v12 }
 0x715   : > { %v3700_v15 = vpop.permute.xlu1 %3699 }
 0x716   : > { %v3719_v52 = vsel %vm847_vm4, %v2028_v41, %v3700_v15 }
 0x717   : > { %3728 = vst.msk [vmem:[%s6339_s19 + $0x20] sm:$0xff] %vm3723_vm11, %v3719_v52  ;;  %v3702_v60 = vpop.permute.xlu0 %3701 }
 0x718   : > { %v3720_v19 = vsel %vm847_vm4, %v2031_v24, %v3702_v60 }
 0x719   : > { %3729 = vst.msk [vmem:[%s6339_s19 + $0x28] sm:$0xff] %vm3723_vm11, %v3720_v19  ;;  %v3704_v43 = vpop.permute.xlu1 %3703 }
 0x71a   : > { %v3721_v47 = vsel %vm847_vm4, %v2036_v61, %v3704_v43 }
 0x71b   : > { %3730 = vst.msk [vmem:[%s6339_s19 + $0x30] sm:$0xff] %vm3723_vm11, %v3721_v47  ;;  %v3706_v51 = vpop.permute.xlu0 %3705 }
 0x71c   : > { %v3722_v50 = vsel %vm847_vm4, %v2039_v49, %v3706_v51 }
 0x71d   : > { %3731 = vst.msk [vmem:[%s6339_s19 + $0x38] sm:$0xff] %vm3723_vm11, %v3722_v50 }
 0x71e   : > { %4427 = shalt.err (!%p4424_p3)
}
 0x71f   : > { %s4428_s18 = scalar_lea.hbm %s6370_s23, 1024  ;;  %s4432_s0 = scalar_lea.hbm %s6439_s17, 2048 }
 0x720   : > { %p4429_p4 = scmp.ne.s32.totalorder %s6370_s23, %s4428_s18  ;;  %p4433_p9 = scmp.lt.u32.totalorder %s6370_s23, %s6439_s17 }
 0x721   : > { %p4434_p10 = scmp.lt.u32.totalorder %s4432_s0, %s4428_s18  ;;  %p4436_p12 = scmp.lt.u32.totalorder %s4428_s18, %s6370_s23 }
 0x722   : > { %p4430_p7 = pnand %p4429_p4, %p4618_p5 }
 0x723   : > { %p4435_p11 = por %p4434_p10, %p4433_p9 }
 0x724   : > { %p4431_p8 = pneg %p4430_p7 }
 0x725   : > { %p4437_p13 = por %p4436_p12, %p4435_p11 }
 0x727   : > { %p4438_p0 = pnand %p4437_p13, %p4431_p8 }
 0x729   : > { %4441 = shalt.err (!%p4438_p0)
}
 0x72a   : > { %s4488_s30 = smov 128   ;;  %s4489_s24 = smov 8  }
 0x72b   : > { %4099 = dma.vmem_to_hbm [thread:$0]  (%p4618_p5), %s6372_s29, 1024, %s6370_s23, %s6381_s28, %s4488_s30, %s4488_s30, %s4489_s24  }
 0x72c PF: > { %s6463_s20 = sld [smem:[#allocation8_spill]]  ;;  %p4105_p1 = scmp.ge.s32.totalorder %s4476_s27, 2 }
 0x72e   : > { %p4102_p2 = pnand %p4105_p1, %p4622_p6 }
 0x732   : > { %s3761_s21 = sand.u32 1, %s6463_s20  }
 0x733   : > { %s3762_s18 = scalar_lea.sflag [#allocation6], %s3761_s21 }
 0x734   : > { %4459 = dma.done.wait (!%p4102_p2), %s3762_s18, 1024  }
 0x735   : > { %4461 = vsyncadd (!%p4102_p2), %s3762_s18, 4294966272  ;;  %s6465_s27 = sld [smem:[#allocation10_spill]]  ;;  %s6466_s0 = sld [smem:[#allocation9_spill]] }
 0x736   : > { %s6467_s26 = sld [smem:[#allocation11_spill]]  ;;  %s6468_s24 = smov %s4468_s25 }
 0x73b   : > { %p27_p3 = scmp.ge.s32.totalorder %s6465_s27, 4   ;;  %s6469_s25 = smov %s6466_s0 }
 0x73d   :  { %29 = sbr.rel (!%p27_p3) target bundleno = 6 (0x6), region = 126 }
 0x744   :  { %3767 = vsyncpa [#allocation6], 1 }
 0x745   :  { %3769 = vsyncpa [#allocation6 + $0x1], 1 }

</bundles_post_ra>
